<compile_context>
chip_gen: v7x
topology: tpu7x:2x2x1
jax: 0.10.0
libtpu: 0.0.40
codegen_flags: <defaults>
</compile_context>

<pallas_src>
import jax
import jax.numpy as jnp
from jax.experimental import pallas as pl
from jax.experimental.pallas import tpu as pltpu

IN_DIM = 100
HID = 784
IN_PAD = 128     # 100 -> one clean 128-wide MXU K tile
HID_PAD = 896    # 784 -> 7 * 128 lanes: unmasked loads/stores


def _round_up(n, m):
    return ((n + m - 1) // m) * m


def mlp_kernel(x_ref, w1_ref, b1_ref, w2_ref, b2_ref, w3_ref, b3_ref, o_ref):
    # Layer 1: Linear(100 -> 784) + ReLU. bf16 operands, f32 accumulation.
    h = jnp.dot(x_ref[...], w1_ref[...], preferred_element_type=jnp.float32)
    h = jnp.maximum(h + b1_ref[...], 0.0)                 # f32 epilogue
    # Layer 2: Linear(784 -> 784) + ReLU
    h = jnp.dot(h.astype(jnp.bfloat16), w2_ref[...],
                preferred_element_type=jnp.float32)
    h = jnp.maximum(h + b2_ref[...], 0.0)
    # Layer 3: Linear(784 -> 784) + tanh
    h = jnp.dot(h.astype(jnp.bfloat16), w3_ref[...],
                preferred_element_type=jnp.float32)
    o_ref[...] = jnp.tanh(h + b3_ref[...])


def _pad2(a, rows, cols):
    return jnp.pad(a, ((0, rows - a.shape[0]), (0, cols - a.shape[1])))


def g_forward(x, w1, b1, w2, b2, w3, b3):
    B = x.shape[0]
    Bp = _round_up(B, 8)
    if Bp >= 128:
        TB = 128
        Bp = _round_up(Bp, TB)
    else:
        TB = Bp

    # Pad to lane-dense shapes; weights in bf16 (halves HBM DMA bytes, which
    # dominate at small batch), biases stay f32 for the f32 epilogue.
    x_p = _pad2(x, Bp, IN_PAD).astype(jnp.bfloat16)
    w1_p = _pad2(w1, IN_PAD, HID_PAD).astype(jnp.bfloat16)
    w2_p = _pad2(w2, HID_PAD, HID_PAD).astype(jnp.bfloat16)
    w3_p = _pad2(w3, HID_PAD, HID_PAD).astype(jnp.bfloat16)
    b1_p = _pad2(b1, 1, HID_PAD)
    b2_p = _pad2(b2, 1, HID_PAD)
    b3_p = _pad2(b3, 1, HID_PAD)

    row_spec = lambda shape: pl.BlockSpec(shape, lambda i: (i, 0))
    const_spec = lambda shape: pl.BlockSpec(shape, lambda i: (0, 0))

    out = pl.pallas_call(
        mlp_kernel,
        out_shape=jax.ShapeDtypeStruct((Bp, HID_PAD), jnp.float32),
        grid=(Bp // TB,),
        in_specs=[
            row_spec((TB, IN_PAD)),            # x: tiled over batch
            const_spec((IN_PAD, HID_PAD)),     # w1: resident
            const_spec((1, HID_PAD)),          # b1
            const_spec((HID_PAD, HID_PAD)),    # w2
            const_spec((1, HID_PAD)),          # b2
            const_spec((HID_PAD, HID_PAD)),    # w3
            const_spec((1, HID_PAD)),          # b3
        ],
        out_specs=row_spec((TB, HID_PAD)),
        compiler_params=pltpu.CompilerParams(
            dimension_semantics=("parallel",),
            vmem_limit_bytes=32 << 20,
        ),
    )(x_p, w1_p, b1_p, w2_p, b2_p, w3_p, b3_p)
    return out[:B, :HID]


def init_params(key):
    # Deterministic init mimicking nn.Linear's U(-1/sqrt(fan_in), 1/sqrt(fan_in)).
    ks = jax.random.split(key, 6)

    def lin(kw, kb, fan_in, fan_out):
        bound = 1.0 / jnp.sqrt(fan_in)
        w = jax.random.uniform(kw, (fan_in, fan_out), jnp.float32, -bound, bound)
        b = jax.random.uniform(kb, (1, fan_out), jnp.float32, -bound, bound)
        return w, b

    w1, b1 = lin(ks[0], ks[1], IN_DIM, HID)
    w2, b2 = lin(ks[2], ks[3], HID, HID)
    w3, b3 = lin(ks[4], ks[5], HID, HID)
    return w1, b1, w2, b2, w3, b3


if __name__ == "__main__":
    key = jax.random.PRNGKey(0)
    k_x, k_p = jax.random.split(key)
    batch = 8
    x = jax.random.normal(k_x, (batch, IN_DIM), jnp.float32)
    params = init_params(k_p)

    out = jax.block_until_ready(g_forward(x, *params))

    # Reference check against plain-JAX fp32 forward (same math as the PyTorch
    # module). Tolerance loosened because matmul operands are bf16 in-kernel.
    w1, b1, w2, b2, w3, b3 = params
    ref = jnp.maximum(x @ w1 + b1, 0.0)
    ref = jnp.maximum(ref @ w2 + b2, 0.0)
    ref = jnp.tanh(ref @ w3 + b3)
    assert out.shape == (batch, HID)
    max_err = float(jnp.max(jnp.abs(out - ref)))
    assert jnp.allclose(out, ref, atol=3e-2, rtol=3e-2), max_err

    print("KERNEL_OK")
</pallas_src>

<mosaic_0001>
module attributes {stable_mosaic.version = 11 : i64} {
  func.func @mlp_kernel(%arg0: i32, %arg1: memref<8x128xbf16, #tpu.memory_space<vmem>>, %arg2: memref<128x896xbf16, #tpu.memory_space<vmem>>, %arg3: memref<1x896xf32, #tpu.memory_space<vmem>>, %arg4: memref<896x896xbf16, #tpu.memory_space<vmem>>, %arg5: memref<1x896xf32, #tpu.memory_space<vmem>>, %arg6: memref<896x896xbf16, #tpu.memory_space<vmem>>, %arg7: memref<1x896xf32, #tpu.memory_space<vmem>>, %arg8: memref<8x896xf32, #tpu.memory_space<vmem>>) attributes {dimension_semantics = [#tpu.dimension_semantics<parallel>], iteration_bounds = array<i64: 1>, scalar_prefetch = 0 : i64, scratch_operands = 0 : i64, tpu.core_type = #tpu.core_type<tc>, window_params = [{transform_indices = @transform_0, window_bounds = array<i64: 8, 128>}, {pipeline_mode = #tpu.pipeline_mode<synchronous>, transform_indices = @transform_1, window_bounds = array<i64: 128, 896>}, {pipeline_mode = #tpu.pipeline_mode<synchronous>, transform_indices = @transform_2, window_bounds = array<i64: 1, 896>}, {pipeline_mode = #tpu.pipeline_mode<synchronous>, transform_indices = @transform_3, window_bounds = array<i64: 896, 896>}, {pipeline_mode = #tpu.pipeline_mode<synchronous>, transform_indices = @transform_4, window_bounds = array<i64: 1, 896>}, {pipeline_mode = #tpu.pipeline_mode<synchronous>, transform_indices = @transform_5, window_bounds = array<i64: 896, 896>}, {pipeline_mode = #tpu.pipeline_mode<synchronous>, transform_indices = @transform_6, window_bounds = array<i64: 1, 896>}, {transform_indices = @transform_7, window_bounds = array<i64: 8, 896>}]} {
    %c0 = arith.constant 0 : index
    %c0_0 = arith.constant 0 : index
    %0 = vector.load %arg1[%c0, %c0_0] : memref<8x128xbf16, #tpu.memory_space<vmem>>, vector<8x128xbf16>
    %c0_1 = arith.constant 0 : index
    %c0_2 = arith.constant 0 : index
    %1 = vector.load %arg2[%c0_1, %c0_2] : memref<128x896xbf16, #tpu.memory_space<vmem>>, vector<128x896xbf16>
    %cst = arith.constant dense<0.000000e+00> : vector<8x896xf32>
    %2 = tpu.matmul %0, %1, %cst {dimension_numbers = #tpu.dot_dimension_numbers<[1], [0], [0], [1], [0, 0, 1, 1], [], []>} : vector<8x128xbf16>, vector<128x896xbf16>, vector<8x896xf32> -> vector<8x896xf32>
    %c0_3 = arith.constant 0 : index
    %c0_4 = arith.constant 0 : index
    %3 = vector.load %arg3[%c0_3, %c0_4] : memref<1x896xf32, #tpu.memory_space<vmem>>, vector<1x896xf32>
    %4 = vector.broadcast %3 : vector<1x896xf32> to vector<8x896xf32>
    %5 = arith.addf %2, %4 : vector<8x896xf32>
    %cst_5 = arith.constant 0.000000e+00 : f32
    %6 = vector.broadcast %cst_5 : f32 to vector<8x896xf32>
    %7 = arith.maximumf %5, %6 : vector<8x896xf32>
    %8 = arith.truncf %7 : vector<8x896xf32> to vector<8x896xbf16>
    %c0_6 = arith.constant 0 : index
    %c0_7 = arith.constant 0 : index
    %9 = vector.load %arg4[%c0_6, %c0_7] : memref<896x896xbf16, #tpu.memory_space<vmem>>, vector<896x896xbf16>
    %cst_8 = arith.constant dense<0.000000e+00> : vector<8x896xf32>
    %10 = tpu.matmul %8, %9, %cst_8 {dimension_numbers = #tpu.dot_dimension_numbers<[1], [0], [0], [1], [0, 0, 1, 1], [], []>} : vector<8x896xbf16>, vector<896x896xbf16>, vector<8x896xf32> -> vector<8x896xf32>
    %c0_9 = arith.constant 0 : index
    %c0_10 = arith.constant 0 : index
    %11 = vector.load %arg5[%c0_9, %c0_10] : memref<1x896xf32, #tpu.memory_space<vmem>>, vector<1x896xf32>
    %12 = vector.broadcast %11 : vector<1x896xf32> to vector<8x896xf32>
    %13 = arith.addf %10, %12 : vector<8x896xf32>
    %cst_11 = arith.constant 0.000000e+00 : f32
    %14 = vector.broadcast %cst_11 : f32 to vector<8x896xf32>
    %15 = arith.maximumf %13, %14 : vector<8x896xf32>
    %16 = arith.truncf %15 : vector<8x896xf32> to vector<8x896xbf16>
    %c0_12 = arith.constant 0 : index
    %c0_13 = arith.constant 0 : index
    %17 = vector.load %arg6[%c0_12, %c0_13] : memref<896x896xbf16, #tpu.memory_space<vmem>>, vector<896x896xbf16>
    %cst_14 = arith.constant dense<0.000000e+00> : vector<8x896xf32>
    %18 = tpu.matmul %16, %17, %cst_14 {dimension_numbers = #tpu.dot_dimension_numbers<[1], [0], [0], [1], [0, 0, 1, 1], [], []>} : vector<8x896xbf16>, vector<896x896xbf16>, vector<8x896xf32> -> vector<8x896xf32>
    %c0_15 = arith.constant 0 : index
    %c0_16 = arith.constant 0 : index
    %19 = vector.load %arg7[%c0_15, %c0_16] : memref<1x896xf32, #tpu.memory_space<vmem>>, vector<1x896xf32>
    %20 = vector.broadcast %19 : vector<1x896xf32> to vector<8x896xf32>
    %21 = arith.addf %18, %20 : vector<8x896xf32>
    %22 = math.tanh %21 : vector<8x896xf32>
    %c0_17 = arith.constant 0 : index
    %c0_18 = arith.constant 0 : index
    %23 = vector.load %arg8[%c0_17, %c0_18] : memref<8x896xf32, #tpu.memory_space<vmem>>, vector<8x896xf32>
    tpu.vector_store %arg8[%c0_17, %c0_18], %22 {strides = array<i32>} : memref<8x896xf32, #tpu.memory_space<vmem>>, vector<8x896xf32>,
    return
  }
  func.func @transform_0(%arg0: i32) -> (i32, i32) {
    %c0_i32 = arith.constant 0 : i32
    %c0_i32_0 = arith.constant 0 : i32
    return %arg0, %c0_i32 : i32, i32
  }
  func.func @transform_1(%arg0: i32) -> (i32, i32) {
    %c0_i32 = arith.constant 0 : i32
    %c0_i32_0 = arith.constant 0 : i32
    %c0_i32_1 = arith.constant 0 : i32
    return %c0_i32, %c0_i32_0 : i32, i32
  }
  func.func @transform_2(%arg0: i32) -> (i32, i32) {
    %c0_i32 = arith.constant 0 : i32
    %c0_i32_0 = arith.constant 0 : i32
    %c0_i32_1 = arith.constant 0 : i32
    return %c0_i32, %c0_i32_0 : i32, i32
  }
  func.func @transform_3(%arg0: i32) -> (i32, i32) {
    %c0_i32 = arith.constant 0 : i32
    %c0_i32_0 = arith.constant 0 : i32
    %c0_i32_1 = arith.constant 0 : i32
    return %c0_i32, %c0_i32_0 : i32, i32
  }
  func.func @transform_4(%arg0: i32) -> (i32, i32) {
    %c0_i32 = arith.constant 0 : i32
    %c0_i32_0 = arith.constant 0 : i32
    %c0_i32_1 = arith.constant 0 : i32
    return %c0_i32, %c0_i32_0 : i32, i32
  }
  func.func @transform_5(%arg0: i32) -> (i32, i32) {
    %c0_i32 = arith.constant 0 : i32
    %c0_i32_0 = arith.constant 0 : i32
    %c0_i32_1 = arith.constant 0 : i32
    return %c0_i32, %c0_i32_0 : i32, i32
  }
  func.func @transform_6(%arg0: i32) -> (i32, i32) {
    %c0_i32 = arith.constant 0 : i32
    %c0_i32_0 = arith.constant 0 : i32
    %c0_i32_1 = arith.constant 0 : i32
    return %c0_i32, %c0_i32_0 : i32, i32
  }
  func.func @transform_7(%arg0: i32) -> (i32, i32) {
    %c0_i32 = arith.constant 0 : i32
    %c0_i32_0 = arith.constant 0 : i32
    return %arg0, %c0_i32 : i32, i32
  }
}

</mosaic_0001>

<bundles_post_ra>
// kernel: tpu_custom_call.1
= control target key start
LH: loop header
LB: loop body
LE: loop exit
PB: predicated region body
PF: predicated region fallthrough
CT: control target
= control target key end

     0   :  { %12 = vsyncpa [#allocation3], 0  ;;  %s9975_s0 = inlined_call_operand.hbm [shape: bf16[8,128], index: 0, kind: input, shape index: {}]   ;;  %s9976_s1 = inlined_call_operand.hbm [shape: bf16[128,896], index: 1, kind: input, shape index: {}]   ;;  %s9977_s2 = inlined_call_operand.hbm [shape: f32[1,896], index: 2, kind: input, shape index: {}]   ;;  %s9978_s3 = inlined_call_operand.hbm [shape: bf16[896,896], index: 3, kind: input, shape index: {}]   ;;  %s9979_s4 = inlined_call_operand.hbm [shape: f32[1,896], index: 4, kind: input, shape index: {}]   ;;  %s9980_s5 = inlined_call_operand.hbm [shape: bf16[896,896], index: 5, kind: input, shape index: {}]   ;;  %s9981_s6 = inlined_call_operand.hbm [shape: f32[1,896], index: 6, kind: input, shape index: {}]   ;;  %s9982_s7 = inlined_call_operand.hbm [shape: f32[8,896], index: 7, kind: output, shape index: {}]  }
   0x1   :  { %13 = vsyncpa [#allocation6], 0 }
   0x2   :  { %14 = vsyncpa [#allocation9], 0 }
   0x3   :  { %15 = vsyncpa [#allocation12], 0 }
   0x4   :  { %16 = vsyncpa [#allocation4], 0  ;;  %s9591_s24 = smov [#allocation5]   ;;  %s9405_s28 = scalar_lea.hbm %s9976_s1, 7168 }
   0x5   :  { %s32_s25 = sshll.u32 %s9591_s24, 4  ;;  %p9406_p0 = scmp.ne.s32.totalorder %s9976_s1, %s9405_s28  ;;  %s33_s25 = int_to_ptr.vmem [resolvable:$true] %s32_s25 }
   0x6   :  { %p9409_p1 = scmp.lt.u32.totalorder %s9405_s28, %s9976_s1 }
   0x8   :  { %p9411_p2 = pnand %p9409_p1, %p9406_p0 }
   0xa   :  { %9414 = shalt.err (!%p9411_p2)
}
   0xb   :  { %s9415_s10 = scalar_lea.vmem %s33_s25, 7168  ;;  %p9420_p4 = scmp.lt.s32.totalorder %s33_s25, %s33_s25 }
   0xc   :  { %p9416_p3 = scmp.ne.s32.totalorder %s33_s25, %s9415_s10  ;;  %p9421_p5 = scmp.lt.s32.totalorder %s9415_s10, %s9415_s10 }
   0xe   :  { %p9422_p6 = por %p9421_p5, %p9420_p4 }
  0x10   :  { %p9423_p7 = pnand %p9422_p6, %p9416_p3 }
  0x12   :  { %9426 = shalt.err (!%p9423_p7)
}
  0x13   :  { %s9592_s11 = smov 448   ;;  %s9593_s12 = smov 28  }
  0x14   :  { %38 = dma.hbm_to_vmem [thread:$0]  %s9976_s1, 7168, %s33_s25, [#allocation6], %s9592_s11, %s9592_s11, %s9593_s12  }
  0x15   :  { %s9594_s15 = smov [#allocation8]   ;;  %s9595_s17 = smov [#allocation11]  }
  0x16   :  { %s54_s16 = sshll.u32 %s9594_s15, 4  ;;  %s76_s18 = sshll.u32 %s9595_s17, 4  ;;  %s55_s16 = int_to_ptr.vmem [resolvable:$true] %s54_s16  ;;  %s77_s18 = int_to_ptr.vmem [resolvable:$true] %s76_s18 }
  0x17   :  { %s9427_s21 = scalar_lea.hbm %s9978_s3, 50176 }
  0x18   :  { %p9428_p8 = scmp.ne.s32.totalorder %s9978_s3, %s9427_s21  ;;  %p9431_p9 = scmp.lt.u32.totalorder %s9427_s21, %s9978_s3 }
  0x1a   :  { %p9433_p10 = pnand %p9431_p9, %p9428_p8 }
  0x1c   :  { %9436 = shalt.err (!%p9433_p10)
}
  0x1d   :  { %s9437_s1 = scalar_lea.vmem %s55_s16, 50176  ;;  %p9442_p12 = scmp.lt.s32.totalorder %s55_s16, %s55_s16 }
  0x1e   :  { %p9438_p11 = scmp.ne.s32.totalorder %s55_s16, %s9437_s1  ;;  %p9443_p13 = scmp.lt.s32.totalorder %s9437_s1, %s9437_s1 }
  0x20   :  { %p9444_p0 = por %p9443_p13, %p9442_p12 }
  0x22   :  { %p9445_p1 = pnand %p9444_p0, %p9438_p11 }
  0x24   :  { %9448 = shalt.err (!%p9445_p1)
}
  0x25   :  { %60 = dma.hbm_to_vmem [thread:$0]  %s9978_s3, 50176, %s55_s16, [#allocation9], %s9592_s11, %s9592_s11, %s9593_s12  }
  0x26   :  { %s9449_s30 = scalar_lea.hbm %s9980_s5, 50176 }
  0x27   :  { %p9450_p2 = scmp.ne.s32.totalorder %s9980_s5, %s9449_s30  ;;  %p9453_p3 = scmp.lt.u32.totalorder %s9449_s30, %s9980_s5 }
  0x29   :  { %p9455_p4 = pnand %p9453_p3, %p9450_p2 }
  0x2b   :  { %9458 = shalt.err (!%p9455_p4)
}
  0x2c   :  { %s9459_s14 = scalar_lea.vmem %s77_s18, 50176  ;;  %p9464_p6 = scmp.lt.s32.totalorder %s77_s18, %s77_s18 }
  0x2d   :  { %p9460_p5 = scmp.ne.s32.totalorder %s77_s18, %s9459_s14  ;;  %p9465_p7 = scmp.lt.s32.totalorder %s9459_s14, %s9459_s14 }
  0x2f   :  { %p9466_p8 = por %p9465_p7, %p9464_p6 }
  0x31   :  { %p9467_p9 = pnand %p9466_p8, %p9460_p5 }
  0x33   :  { %9470 = shalt.err (!%p9467_p9)
}
  0x34   :  { %82 = dma.hbm_to_vmem [thread:$0]  %s9980_s5, 50176, %s77_s18, [#allocation12], %s9592_s11, %s9592_s11, %s9593_s12  }
  0x35   :  { %s9596_s16 = smov [#allocation2]   ;;  %s9597_s19 = smov [#allocation7]  }
  0x36   :  { %s23_s17 = sshll.u32 %s9596_s16, 4  ;;  %s45_s20 = sshll.u32 %s9597_s19, 4  ;;  %s24_s17 = int_to_ptr.vmem [resolvable:$true] %s23_s17  ;;  %s46_s20 = int_to_ptr.vmem [resolvable:$true] %s45_s20 }
  0x37   :  { %s9471_s23 = scalar_lea.hbm %s9975_s0, 64 }
  0x38   :  { %p9472_p10 = scmp.ne.s32.totalorder %s9975_s0, %s9471_s23  ;;  %p9475_p11 = scmp.lt.u32.totalorder %s9471_s23, %s9975_s0 }
  0x3a   :  { %p9477_p12 = pnand %p9475_p11, %p9472_p10 }
  0x3c   :  { %9480 = shalt.err (!%p9477_p12)
}
  0x3d   :  { %s9481_s5 = scalar_lea.vmem %s24_s17, 64  ;;  %p9486_p0 = scmp.lt.s32.totalorder %s24_s17, %s24_s17 }
  0x3e   :  { %p9482_p13 = scmp.ne.s32.totalorder %s24_s17, %s9481_s5  ;;  %p9487_p1 = scmp.lt.s32.totalorder %s9481_s5, %s9481_s5 }
  0x40   :  { %p9488_p2 = por %p9487_p1, %p9486_p0 }
  0x42   :  { %p9489_p3 = pnand %p9488_p2, %p9482_p13 }
  0x44   :  { %9492 = shalt.err (!%p9489_p3)
}
  0x45   :  { %26 = dma.hbm_to_vmem [thread:$0]  %s9975_s0, 64, %s24_s17, [#allocation3]  }
  0x46   :  { %s9493_s28 = scalar_lea.hbm %s9977_s2, 112 }
  0x47   :  { %p9494_p4 = scmp.ne.s32.totalorder %s9977_s2, %s9493_s28  ;;  %p9497_p5 = scmp.lt.u32.totalorder %s9493_s28, %s9977_s2 }
  0x49   :  { %p9499_p6 = pnand %p9497_p5, %p9494_p4 }
  0x4b   :  { %9502 = shalt.err (!%p9499_p6)
}
  0x4c   :  { %s9503_s10 = scalar_lea.vmem %s46_s20, 112  ;;  %s9507_s13 = scalar_lea.vmem %s46_s20, 128 }
  0x4d   :  { %p9504_p7 = scmp.ne.s32.totalorder %s46_s20, %s9503_s10  ;;  %p9508_p8 = scmp.lt.s32.totalorder %s46_s20, %s46_s20 }
  0x4e   :  { %p9509_p9 = scmp.lt.s32.totalorder %s9507_s13, %s9503_s10 }
  0x50   :  { %p9510_p10 = por %p9509_p9, %p9508_p8 }
  0x52   :  { %p9511_p11 = pnand %p9510_p10, %p9504_p7 }
  0x54   :  { %9514 = shalt.err (!%p9511_p11)
}
  0x55   :  { %48 = dma.hbm_to_vmem [thread:$0]  %s9977_s2, 112, %s46_s20, [#allocation6]  }
  0x56   :  { %s9598_s3 = smov [#allocation10]   ;;  %s9599_s16 = smov [#allocation13]  }
  0x57   :  { %s67_s15 = sshll.u32 %s9598_s3, 4  ;;  %s89_s17 = sshll.u32 %s9599_s16, 4  ;;  %s68_s15 = int_to_ptr.vmem [resolvable:$true] %s67_s15  ;;  %s90_s17 = int_to_ptr.vmem [resolvable:$true] %s89_s17 }
  0x58   :  { %s9515_s22 = scalar_lea.hbm %s9979_s4, 112 }
  0x59   :  { %p9516_p12 = scmp.ne.s32.totalorder %s9979_s4, %s9515_s22  ;;  %p9519_p13 = scmp.lt.u32.totalorder %s9515_s22, %s9979_s4 }
  0x5b   :  { %p9521_p0 = pnand %p9519_p13, %p9516_p12 }
  0x5d   :  { %9524 = shalt.err (!%p9521_p0)
}
  0x5e   :  { %s9525_s2 = scalar_lea.vmem %s68_s15, 112  ;;  %s9529_s20 = scalar_lea.vmem %s68_s15, 128 }
  0x5f   :  { %p9526_p1 = scmp.ne.s32.totalorder %s68_s15, %s9525_s2  ;;  %p9530_p2 = scmp.lt.s32.totalorder %s68_s15, %s68_s15 }
  0x60   :  { %p9531_p3 = scmp.lt.s32.totalorder %s9529_s20, %s9525_s2 }
  0x62   :  { %p9532_p4 = por %p9531_p3, %p9530_p2 }
  0x64   :  { %p9533_p5 = pnand %p9532_p4, %p9526_p1 }
  0x66   :  { %9536 = shalt.err (!%p9533_p5)
}
  0x67   :  { %70 = dma.hbm_to_vmem [thread:$0]  %s9979_s4, 112, %s68_s15, [#allocation9]  }
  0x68   :  { %s9537_s18 = scalar_lea.hbm %s9981_s6, 112 }
  0x69   :  { %p9538_p6 = scmp.ne.s32.totalorder %s9981_s6, %s9537_s18  ;;  %p9541_p7 = scmp.lt.u32.totalorder %s9537_s18, %s9981_s6 }
  0x6b   :  { %p9543_p8 = pnand %p9541_p7, %p9538_p6 }
  0x6d   :  { %9546 = shalt.err (!%p9543_p8)
}
  0x6e   :  { %s9547_s8 = scalar_lea.vmem %s90_s17, 112  ;;  %s9551_s9 = scalar_lea.vmem %s90_s17, 128 }
  0x6f   :  { %p9548_p9 = scmp.ne.s32.totalorder %s90_s17, %s9547_s8  ;;  %p9552_p10 = scmp.lt.s32.totalorder %s90_s17, %s90_s17 }
  0x70   :  { %p9553_p11 = scmp.lt.s32.totalorder %s9551_s9, %s9547_s8 }
  0x72   :  { %p9554_p12 = por %p9553_p11, %p9552_p10 }
  0x74   :  { %p9555_p13 = pnand %p9554_p12, %p9548_p9 }
  0x76   :  { %9558 = shalt.err (!%p9555_p13)
}
  0x77   :  { %92 = dma.hbm_to_vmem [thread:$0]  %s9981_s6, 112, %s90_s17, [#allocation12]  }
  0x78   :  { %9581 = dma.done.wait [#allocation3], 64  }
  0x79   :  { %9582 = vsyncadd [#allocation3], 4294967232 }
  0x7a   :  { %9583 = dma.done.wait [#allocation6], 7280  }
  0x7b   :  { %9584 = vsyncadd [#allocation6], 4294960016 }
  0x7c   :  { %9585 = dma.done.wait [#allocation9], 50288  }
  0x7d   :  { %9586 = vsyncadd [#allocation9], 4294917008 }
  0x7e   :  { %9587 = dma.done.wait [#allocation12], 50288  }
  0x7f   :  { %9588 = vsyncadd [#allocation12], 4294917008  ;;  %v9600_v0 = vmov 0   ;;  %v8190_v1 = vld [vmem:[#allocation5 + $0x4] ss:$28 sps:$4 sm:$0xff]   ;;  %v9601_v43 = vmov 0.0  }
  0x80   :  { %537 = vmatprep.mubr.bf16.mxu0 %v9600_v0  ;;  %578 = vmatprep.mubr.bf16.mxu1 %v9600_v0  ;;  %v8192_v2 = vld [vmem:[#allocation5] ss:$28 sps:$4 sm:$0xff]   ;;  %v8195_v4 = vld [vmem:[#allocation5 + $0x38] ss:$28 sps:$4 sm:$0xff]   ;;  %v8198_v6 = vld [vmem:[#allocation5 + $0x70] ss:$28 sps:$4 sm:$0xff]  }
  0x81   :  { %505 = vmatprep.subr.bf16.mxu0 %v8190_v1  ;;  %v8193_v3 = vld [vmem:[#allocation5 + $0x3c] ss:$28 sps:$4 sm:$0xff]   ;;  %v8196_v5 = vld [vmem:[#allocation5 + $0x74] ss:$28 sps:$4 sm:$0xff]   ;;  %v8199_v7 = vld [vmem:[#allocation5 + $0xac] ss:$28 sps:$4 sm:$0xff]  }
  0x82   :  { %506 = vmatpush1.bf16.msra.mxu0 %v8192_v2  ;;  %v8201_v8 = vld [vmem:[#allocation5 + $0xa8] ss:$28 sps:$4 sm:$0xff]   ;;  %v8204_v13 = vld [vmem:[#allocation5 + $0xe0] ss:$28 sps:$4 sm:$0xff]   ;;  %v8207_v17 = vld [vmem:[#allocation5 + $0x118] ss:$28 sps:$4 sm:$0xff]  }
  0x83   :  { %507 = vmatprep.subr.bf16.mxu0 %v8193_v3  ;;  %v8202_v9 = vld [vmem:[#allocation5 + $0xe4] ss:$28 sps:$4 sm:$0xff]   ;;  %v8214_v10 = vld [vmem:[#allocation5 + $0xc] ss:$28 sps:$4 sm:$0xff]   ;;  %v8220_v15 = vld [vmem:[#allocation5 + $0x7c] ss:$28 sps:$4 sm:$0xff]  }
  0x84   :  { %v8216_v11 = vld [vmem:[#allocation5 + $0x8] ss:$28 sps:$4 sm:$0xff]   ;;  %546 = vmatprep.subr.bf16.mxu1 %v8214_v10  ;;  %v8219_v14 = vld [vmem:[#allocation5 + $0x40] ss:$28 sps:$4 sm:$0xff]   ;;  %v8222_v18 = vld [vmem:[#allocation5 + $0x78] ss:$28 sps:$4 sm:$0xff]  }
  0x85   :  { %v8217_v12 = vld [vmem:[#allocation5 + $0x44] ss:$28 sps:$4 sm:$0xff]   ;;  %547 = vmatpush1.bf16.msra.mxu1 %v8216_v11  ;;  %v8205_v16 = vld [vmem:[#allocation5 + $0x11c] ss:$28 sps:$4 sm:$0xff]   ;;  %v8223_v19 = vld [vmem:[#allocation5 + $0xb4] ss:$28 sps:$4 sm:$0xff]  }
  0x86   :  { %508 = vmatpush1.bf16.msra.mxu0 %v8195_v4  ;;  %548 = vmatprep.subr.bf16.mxu1 %v8217_v12  ;;  %v8208_v20 = vld [vmem:[#allocation5 + $0x154] ss:$28 sps:$4 sm:$0xff]   ;;  %v8226_v23 = vld [vmem:[#allocation5 + $0xec] ss:$28 sps:$4 sm:$0xff]   ;;  %v8229_v27 = vld [vmem:[#allocation5 + $0x124] ss:$28 sps:$4 sm:$0xff]  }
  0x87   :  { %509 = vmatprep.subr.bf16.mxu0 %v8196_v5  ;;  %v8210_v21 = vld [vmem:[#allocation5 + $0x150] ss:$28 sps:$4 sm:$0xff]   ;;  %v8213_v25 = vld [vmem:[#allocation5 + $0x188] ss:$28 sps:$4 sm:$0xff]   ;;  %v9739_v29 = vld [vmem:[#allocation2] sm:$0xf] }
  0x88   :  { %v8225_v22 = vld [vmem:[#allocation5 + $0xb0] ss:$28 sps:$4 sm:$0xff]   ;;  %v8228_v26 = vld [vmem:[#allocation5 + $0xe8] ss:$28 sps:$4 sm:$0xff]   ;;  %v8231_v30 = vld [vmem:[#allocation5 + $0x120] ss:$28 sps:$4 sm:$0xff]  }
  0x89   :  { %549 = vmatpush1.bf16.msra.mxu1 %v8219_v14  ;;  %v8211_v24 = vld [vmem:[#allocation5 + $0x18c] ss:$28 sps:$4 sm:$0xff]   ;;  %v8240_v28 = vld [vmem:[#allocation5 + $0x14] ss:$28 sps:$4 sm:$0xff]   ;;  %v8232_v31 = vld [vmem:[#allocation5 + $0x15c] ss:$28 sps:$4 sm:$0xff]  }
  0x8a   :  { %510 = vmatpush1.bf16.msra.mxu0 %v8198_v6  ;;  %550 = vmatprep.subr.bf16.mxu1 %v8220_v15  ;;  %v8238_v32 = vld [vmem:[#allocation5 + $0x10] ss:$28 sps:$4 sm:$0xff]   ;;  %v8234_v34 = vld [vmem:[#allocation5 + $0x158] ss:$28 sps:$4 sm:$0xff]   ;;  %v8241_v36 = vld [vmem:[#allocation5 + $0x48] ss:$28 sps:$4 sm:$0xff]  }
  0x8b   :  { %511 = vmatprep.subr.bf16.mxu0 %v8199_v7  ;;  %v8243_v33 = vld [vmem:[#allocation5 + $0x4c] ss:$28 sps:$4 sm:$0xff]   ;;  %v8235_v35 = vld [vmem:[#allocation5 + $0x194] ss:$28 sps:$4 sm:$0xff]   ;;  %v8246_v37 = vld [vmem:[#allocation5 + $0x84] ss:$28 sps:$4 sm:$0xff]  }
  0x8c   :  { %v8237_v38 = vld [vmem:[#allocation5 + $0x190] ss:$28 sps:$4 sm:$0xff]   ;;  %v8244_v39 = vld [vmem:[#allocation5 + $0x80] ss:$28 sps:$4 sm:$0xff]   ;;  %v8262_v41 = vld [vmem:[#allocation5 + $0x18] ss:$28 sps:$4 sm:$0xff]  }
  0x8d   :  { %551 = vmatpush1.bf16.msra.mxu1 %v8222_v18  ;;  %v8249_v40 = vld [vmem:[#allocation5 + $0xbc] ss:$28 sps:$4 sm:$0xff]   ;;  %v8252_v44 = vld [vmem:[#allocation5 + $0xf4] ss:$28 sps:$4 sm:$0xff]   ;;  %vm9602_vm0 = vmmov 0   ;;  %s9603_s6 = smov [#allocation14]  }
  0x8e   :  { %512 = vmatpush1.bf16.msra.mxu0 %v8201_v8  ;;  %552 = vmatprep.subr.bf16.mxu1 %v8223_v19  ;;  %v8247_v42 = vld [vmem:[#allocation5 + $0xb8] ss:$28 sps:$4 sm:$0xff]   ;;  %v8263_v45 = vld [vmem:[#allocation5 + $0x50] ss:$28 sps:$4 sm:$0xff]   ;;  %v8264_v48 = vld [vmem:[#allocation5 + $0x88] ss:$28 sps:$4 sm:$0xff]  }
  0x8f   :  { %513 = vmatprep.subr.bf16.mxu0 %v8202_v9  ;;  %v8250_v46 = vld [vmem:[#allocation5 + $0xf0] ss:$28 sps:$4 sm:$0xff]   ;;  %v8253_v49 = vld [vmem:[#allocation5 + $0x128] ss:$28 sps:$4 sm:$0xff]   ;;  %v8265_v51 = vld [vmem:[#allocation5 + $0xc0] ss:$28 sps:$4 sm:$0xff]  }
  0x90   :  { %v8255_v47 = vld [vmem:[#allocation5 + $0x12c] ss:$28 sps:$4 sm:$0xff]   ;;  %v8258_v50 = vld [vmem:[#allocation5 + $0x164] ss:$28 sps:$4 sm:$0xff]   ;;  %v8261_v53 = vld [vmem:[#allocation5 + $0x19c] ss:$28 sps:$4 sm:$0xff]  }
  0x91   :  { %553 = vmatpush1.bf16.msra.mxu1 %v8225_v22  ;;  %v8256_v52 = vld [vmem:[#allocation5 + $0x160] ss:$28 sps:$4 sm:$0xff]   ;;  %v8266_v54 = vld [vmem:[#allocation5 + $0xf8] ss:$28 sps:$4 sm:$0xff]   ;;  %v8272_v56 = vld [vmem:[#allocation8 + $0x4] ss:$28 sps:$4 sm:$0xff]  }
  0x92   :  { %514 = vmatpush1.bf16.msra.mxu0 %v8204_v13  ;;  %554 = vmatprep.subr.bf16.mxu1 %v8226_v23  ;;  %v8259_v55 = vld [vmem:[#allocation5 + $0x198] ss:$28 sps:$4 sm:$0xff]   ;;  %v8267_v57 = vld [vmem:[#allocation5 + $0x130] ss:$28 sps:$4 sm:$0xff]   ;;  %v8270_v58 = vld [vmem:[#allocation8] ss:$28 sps:$4 sm:$0xff]  }
  0x93   :  { %515 = vmatprep.subr.bf16.mxu0 %v8205_v16  ;;  %v8278_v59 = vld [vmem:[#allocation8 + $0x3c] ss:$28 sps:$4 sm:$0xff]   ;;  %v8284_v62 = vld [vmem:[#allocation8 + $0x74] ss:$28 sps:$4 sm:$0xff]   ;;  %v8275_v1 = vld [vmem:[#allocation8 + $0xc] ss:$28 sps:$4 sm:$0xff]  }
  0x94   :  { %v8268_v60 = vld [vmem:[#allocation5 + $0x168] ss:$28 sps:$4 sm:$0xff]   ;;  %v8276_v61 = vld [vmem:[#allocation8 + $0x38] ss:$28 sps:$4 sm:$0xff]   ;;  %v8282_v2 = vld [vmem:[#allocation8 + $0x70] ss:$28 sps:$4 sm:$0xff]  }
  0x95   :  { %555 = vmatpush1.bf16.msra.mxu1 %v8228_v26  ;;  %v8269_v63 = vld [vmem:[#allocation5 + $0x1a0] ss:$28 sps:$4 sm:$0xff]   ;;  %v8290_v3 = vld [vmem:[#allocation8 + $0xac] ss:$28 sps:$4 sm:$0xff]   ;;  %v8281_v5 = vld [vmem:[#allocation8 + $0x44] ss:$28 sps:$4 sm:$0xff]  }
  0x96   :  { %516 = vmatpush1.bf16.msra.mxu0 %v8207_v17  ;;  %556 = vmatprep.subr.bf16.mxu1 %v8229_v27  ;;  %v8273_v4 = vld [vmem:[#allocation8 + $0x8] ss:$28 sps:$4 sm:$0xff]   ;;  %v8279_v8 = vld [vmem:[#allocation8 + $0x40] ss:$28 sps:$4 sm:$0xff]   ;;  %v8285_v12 = vld [vmem:[#allocation8 + $0x78] ss:$28 sps:$4 sm:$0xff]  }
  0x97   :  { %517 = vmatprep.subr.bf16.mxu0 %v8208_v20  ;;  %v8288_v6 = vld [vmem:[#allocation8 + $0xa8] ss:$28 sps:$4 sm:$0xff]   ;;  %v8287_v9 = vld [vmem:[#allocation8 + $0x7c] ss:$28 sps:$4 sm:$0xff]   ;;  %v8293_v13 = vld [vmem:[#allocation8 + $0xb4] ss:$28 sps:$4 sm:$0xff]  }
  0x98   :  { %v8296_v7 = vld [vmem:[#allocation8 + $0xe4] ss:$28 sps:$4 sm:$0xff]   ;;  %v8302_v11 = vld [vmem:[#allocation8 + $0x11c] ss:$28 sps:$4 sm:$0xff]   ;;  %v8308_v15 = vld [vmem:[#allocation8 + $0x154] ss:$28 sps:$4 sm:$0xff]  }
  0x99   :  { %557 = vmatpush1.bf16.msra.mxu1 %v8231_v30  ;;  %v8294_v10 = vld [vmem:[#allocation8 + $0xe0] ss:$28 sps:$4 sm:$0xff]   ;;  %v8300_v14 = vld [vmem:[#allocation8 + $0x118] ss:$28 sps:$4 sm:$0xff]   ;;  %v8291_v16 = vld [vmem:[#allocation8 + $0xb0] ss:$28 sps:$4 sm:$0xff]  }
  0x9a   :  { %518 = vmatpush1.bf16.msra.mxu0 %v8210_v21  ;;  %558 = vmatprep.subr.bf16.mxu1 %v8232_v31  ;;  %v8299_v17 = vld [vmem:[#allocation8 + $0xec] ss:$28 sps:$4 sm:$0xff]   ;;  %v8305_v21 = vld [vmem:[#allocation8 + $0x124] ss:$28 sps:$4 sm:$0xff]   ;;  %v8326_v27 = vld [vmem:[#allocation8 + $0x1fc] ss:$28 sps:$4 sm:$0xff]  }
  0x9b   :  { %519 = vmatprep.subr.bf16.mxu0 %v8211_v24  ;;  %v8306_v18 = vld [vmem:[#allocation8 + $0x150] ss:$28 sps:$4 sm:$0xff]   ;;  %v8297_v20 = vld [vmem:[#allocation8 + $0xe8] ss:$28 sps:$4 sm:$0xff]   ;;  %v8303_v24 = vld [vmem:[#allocation8 + $0x120] ss:$28 sps:$4 sm:$0xff]  }
  0x9c   :  { %v8314_v19 = vld [vmem:[#allocation8 + $0x18c] ss:$28 sps:$4 sm:$0xff]   ;;  %v8320_v23 = vld [vmem:[#allocation8 + $0x1c4] ss:$28 sps:$4 sm:$0xff]   ;;  %v8324_v30 = vld [vmem:[#allocation8 + $0x1f8] ss:$28 sps:$4 sm:$0xff]  }
  0x9d   :  { %559 = vmatpush1.bf16.msra.mxu1 %v8234_v34  ;;  %v8312_v22 = vld [vmem:[#allocation8 + $0x188] ss:$28 sps:$4 sm:$0xff]   ;;  %v8318_v26 = vld [vmem:[#allocation8 + $0x1c0] ss:$28 sps:$4 sm:$0xff]   ;;  %v8332_v31 = vld [vmem:[#allocation8 + $0x234] ss:$28 sps:$4 sm:$0xff]  }
  0x9e   :  { %520 = vmatpush1.bf16.msra.mxu0 %v8213_v25  ;;  %560 = vmatprep.subr.bf16.mxu1 %v8235_v35  ;;  %v8311_v25 = vld [vmem:[#allocation8 + $0x15c] ss:$28 sps:$4 sm:$0xff]   ;;  %v8330_v34 = vld [vmem:[#allocation8 + $0x230] ss:$28 sps:$4 sm:$0xff]   ;;  %s7022_s13 = sshll.u32 %s9603_s6, 4  ;;  %s7023_s13 = int_to_ptr.vmem [resolvable:$true] %s7022_s13 }
  0x9f   :  { %587 = vmatprep.subr.bf16.mxu0 %v8240_v28  ;;  %v8309_v28 = vld [vmem:[#allocation8 + $0x158] ss:$28 sps:$4 sm:$0xff]   ;;  %v8338_v35 = vld [vmem:[#allocation8 + $0x26c] ss:$28 sps:$4 sm:$0xff]   ;;  %s9559_s0 = scalar_lea.vmem %s7023_s13, 896  ;;  %p9564_p1 = scmp.lt.s32.totalorder %s7023_s13, %s7023_s13 }
  0xa0   :  { %p9560_p0 = scmp.ne.s32.totalorder %s7023_s13, %s9559_s0  ;;  %p9565_p2 = scmp.lt.s32.totalorder %s9559_s0, %s9559_s0 }
  0xa1   :  { %538 = vmatmul.mubr.bf16.vlgmr.msra.gmra.mrb[0].mxu0 %v9739_v29  ;;  %561 = vmatpush1.bf16.msra.mxu1 %v8237_v38  ;;  %v8336_v38 = vld [vmem:[#allocation8 + $0x268] ss:$28 sps:$4 sm:$0xff]  }
  0xa2   :  { %588 = vmatpush1.bf16.msra.mxu0 %v8238_v32  ;;  %619 = vmatprep.mubr.bf16.mxu0 %v9600_v0  ;;  %v8315_v32 = vld [vmem:[#allocation8 + $0x190] ss:$28 sps:$4 sm:$0xff]   ;;  %p9566_p3 = por %p9565_p2, %p9564_p1 }
  0xa3   :  { %589 = vmatprep.subr.bf16.mxu0 %v8243_v33  ;;  %8033 = vmatprep.subr.bf16.mxu1 %v9601_v43  ;;  %v8323_v33 = vld [vmem:[#allocation8 + $0x1cc] ss:$28 sps:$4 sm:$0xff]  }
  0xa4   :  { %579 = vmatmul.mubr.bf16.vlgmr.msra.gmra.mrb[0].mxu1 %v9739_v29  ;;  %p9567_p4 = pnand %p9566_p3, %p9560_p0 }
  0xa5   :  { %8034 = vmatpush3.bf16.msra.mxu1 %v8262_v41  ;;  %8049 = vmatprep.mubr.msk.bf16.mxu1 %vm9602_vm0, %v9601_v43  ;;  %v8335_v41 = vld [vmem:[#allocation8 + $0x23c] ss:$28 sps:$4 sm:$0xff]  }
  0xa6   :  { %590 = vmatpush1.bf16.msra.mxu0 %v8241_v36  ;;  %8035 = vmatprep.subr.bf16.mxu1 %v9601_v43  ;;  %v8321_v36 = vld [vmem:[#allocation8 + $0x1c8] ss:$28 sps:$4 sm:$0xff]  }
  0xa7   :  { %591 = vmatprep.subr.bf16.mxu0 %v8246_v37  ;;  %v8329_v37 = vld [vmem:[#allocation8 + $0x204] ss:$28 sps:$4 sm:$0xff]  }
  0xa9   :  { %8036 = vmatpush3.bf16.msra.mxu1 %v8263_v45  ;;  %v8333_v45 = vld [vmem:[#allocation8 + $0x238] ss:$28 sps:$4 sm:$0xff]  }
  0xaa   :  { %592 = vmatpush1.bf16.msra.mxu0 %v8244_v39  ;;  %8037 = vmatprep.subr.bf16.mxu1 %v9601_v43  ;;  %v8344_v39 = vld [vmem:[#allocation8 + $0x2a4] ss:$28 sps:$4 sm:$0xff]  }
  0xab   :  { %593 = vmatprep.subr.bf16.mxu0 %v8249_v40  ;;  %v8327_v40 = vld [vmem:[#allocation8 + $0x200] ss:$28 sps:$4 sm:$0xff]  }
  0xad   :  { %8038 = vmatpush3.bf16.msra.mxu1 %v8264_v48  ;;  %v8339_v48 = vld [vmem:[#allocation8 + $0x270] ss:$28 sps:$4 sm:$0xff]  }
  0xae   :  { %594 = vmatpush1.bf16.msra.mxu0 %v8247_v42  ;;  %8039 = vmatprep.subr.bf16.mxu1 %v9601_v43  ;;  %v8342_v42 = vld [vmem:[#allocation8 + $0x2a0] ss:$28 sps:$4 sm:$0xff]  }
  0xaf   :  { %595 = vmatprep.subr.bf16.mxu0 %v8252_v44  ;;  %v8350_v44 = vld [vmem:[#allocation8 + $0x2dc] ss:$28 sps:$4 sm:$0xff]  }
  0xb1   :  { %8040 = vmatpush3.bf16.msra.mxu1 %v8265_v51  ;;  %v8354_v51 = vld [vmem:[#allocation8 + $0x310] ss:$28 sps:$4 sm:$0xff]  }
  0xb2   :  { %596 = vmatpush1.bf16.msra.mxu0 %v8250_v46  ;;  %8041 = vmatprep.subr.bf16.mxu1 %v9601_v43  ;;  %v8341_v46 = vld [vmem:[#allocation8 + $0x274] ss:$28 sps:$4 sm:$0xff]  }
  0xb3   :  { %597 = vmatprep.subr.bf16.mxu0 %v8255_v47  ;;  %v8348_v47 = vld [vmem:[#allocation8 + $0x2d8] ss:$28 sps:$4 sm:$0xff]  }
  0xb5   :  { %8042 = vmatpush3.bf16.msra.mxu1 %v8266_v54  ;;  %v8353_v54 = vld [vmem:[#allocation8 + $0x2e4] ss:$28 sps:$4 sm:$0xff]  }
  0xb6   :  { %598 = vmatpush1.bf16.msra.mxu0 %v8253_v49  ;;  %8043 = vmatprep.subr.bf16.mxu1 %v9601_v43  ;;  %v8356_v49 = vld [vmem:[#allocation8 + $0x314] ss:$28 sps:$4 sm:$0xff]  }
  0xb7   :  { %599 = vmatprep.subr.bf16.mxu0 %v8258_v50  ;;  %v8347_v50 = vld [vmem:[#allocation8 + $0x2ac] ss:$28 sps:$4 sm:$0xff]  }
  0xb9   :  { %8044 = vmatpush3.bf16.msra.mxu1 %v8267_v57  ;;  %v8368_v57 = vld [vmem:[#allocation8 + $0x384] ss:$28 sps:$4 sm:$0xff]  }
  0xba   :  { %600 = vmatpush1.bf16.msra.mxu0 %v8256_v52  ;;  %8045 = vmatprep.subr.bf16.mxu1 %v9601_v43  ;;  %v8345_v52 = vld [vmem:[#allocation8 + $0x2a8] ss:$28 sps:$4 sm:$0xff]  }
  0xbb   :  { %601 = vmatprep.subr.bf16.mxu0 %v8261_v53  ;;  %v8362_v53 = vld [vmem:[#allocation8 + $0x34c] ss:$28 sps:$4 sm:$0xff]  }
  0xbd   :  { %8046 = vmatpush3.bf16.msra.mxu1 %v8268_v60  ;;  %v8365_v60 = vld [vmem:[#allocation8 + $0x354] ss:$28 sps:$4 sm:$0xff]  }
  0xbe   :  { %602 = vmatpush1.bf16.msra.mxu0 %v8259_v55  ;;  %8047 = vmatprep.subr.bf16.mxu1 %v9601_v43  ;;  %v8360_v55 = vld [vmem:[#allocation8 + $0x348] ss:$28 sps:$4 sm:$0xff]  }
  0xbf   :  { %3183 = vmatprep.subr.bf16.mxu0 %v8272_v56  ;;  %v8351_v56 = vld [vmem:[#allocation8 + $0x2e0] ss:$28 sps:$4 sm:$0xff]  }
  0xc1   :  { %620 = vmatmul.mubr.bf16.vlgmr.msra.gmra.mrb[4].mxu0 %v9739_v29  ;;  %8048 = vmatpush3.bf16.msra.mxu1 %v8269_v63  ;;  %v182_v63 = vlaneseq }
  0xc2   :  { %3184 = vmatpush1.bf16.msra.mxu0 %v8270_v58  ;;  %3347 = vmatprep.subr.bf16.mxu1 %v8275_v1  ;;  %v8359_v58 = vld [vmem:[#allocation8 + $0x31c] ss:$28 sps:$4 sm:$0xff]  }
  0xc3   :  { %3185 = vmatprep.subr.bf16.mxu0 %v8278_v59  ;;  %v8357_v59 = vld [vmem:[#allocation8 + $0x318] ss:$28 sps:$4 sm:$0xff]   ;;  %v9756_v1 = vshrl.u32 %v182_v63, 7  ;;  %v8414_v63 = vld [vmem:[#allocation8 + $0x540] ss:$28 sps:$4 sm:$0xff]  }
  0xc4   :  { %8050 = vmatmul.mubr.bf16.vlgmr.msra.gmra.mrb[4].mxu1 %v9739_v29  ;;  %v8317_v29 = vld [vmem:[#allocation8 + $0x194] ss:$28 sps:$4 sm:$0xff]  }
  0xc5   :  { %3348 = vmatpush1.bf16.msra.mxu1 %v8273_v4  ;;  %v9764_v4 = vsub.s32 1, %v9756_v1 }
  0xc6   :  { %3186 = vmatpush1.bf16.msra.mxu0 %v8276_v61  ;;  %3349 = vmatprep.subr.bf16.mxu1 %v8281_v5  ;;  %v8363_v61 = vld [vmem:[#allocation8 + $0x350] ss:$28 sps:$4 sm:$0xff]  }
  0xc7   :  { %3187 = vmatprep.subr.bf16.mxu0 %v8284_v62  ;;  %v8371_v62 = vld [vmem:[#allocation8 + $0x38c] ss:$28 sps:$4 sm:$0xff]  }
  0xc9   :  { %3350 = vmatpush1.bf16.msra.mxu1 %v8279_v8 }
  0xca   :  { %3188 = vmatpush1.bf16.msra.mxu0 %v8282_v2  ;;  %3351 = vmatprep.subr.bf16.mxu1 %v8287_v9  ;;  %v9759_v2 = vsub.s32 0, %v9756_v1 }
  0xcb   :  { %3189 = vmatprep.subr.bf16.mxu0 %v8290_v3  ;;  %v9761_v3 = vld [vmem:[#allocation7] sm:$0xff] }
  0xcc   :  { %v185_v5 = vrot.slane %v9761_v3, %v9759_v2 }
  0xcd   :  { %3352 = vmatpush1.bf16.msra.mxu1 %v8285_v12 }
  0xce   :  { %3190 = vmatpush1.bf16.msra.mxu0 %v8288_v6  ;;  %3353 = vmatprep.subr.bf16.mxu1 %v8293_v13  ;;  %v189_v6 = vrot.slane %v9761_v3, %v9764_v4 }
  0xcf   :  { %3191 = vmatprep.subr.bf16.mxu0 %v8296_v7 }
  0xd1   :  { %3354 = vmatpush1.bf16.msra.mxu1 %v8291_v16  ;;  %v8369_v16 = vld [vmem:[#allocation8 + $0x388] ss:$28 sps:$4 sm:$0xff]  }
  0xd2   :  { %3192 = vmatpush1.bf16.msra.mxu0 %v8294_v10  ;;  %3355 = vmatprep.subr.bf16.mxu1 %v8299_v17  ;;  %v9771_v17 = vsub.s32 3, %v9756_v1 }
  0xd3   :  { %3193 = vmatprep.subr.bf16.mxu0 %v8302_v11 }
  0xd5   :  { %3356 = vmatpush1.bf16.msra.mxu1 %v8297_v20  ;;  %v8374_v20 = vld [vmem:[#allocation8 + $0x3bc] ss:$28 sps:$4 sm:$0xff]  }
  0xd6   :  { %3194 = vmatpush1.bf16.msra.mxu0 %v8300_v14  ;;  %3357 = vmatprep.subr.bf16.mxu1 %v8305_v21  ;;  %v8377_v21 = vld [vmem:[#allocation8 + $0x3c4] ss:$28 sps:$4 sm:$0xff]  }
  0xd7   :  { %3195 = vmatprep.subr.bf16.mxu0 %v8308_v15  ;;  %v8366_v15 = vld [vmem:[#allocation8 + $0x380] ss:$28 sps:$4 sm:$0xff]  }
  0xd9   :  { %3358 = vmatpush1.bf16.msra.mxu1 %v8303_v24  ;;  %v8375_v24 = vld [vmem:[#allocation8 + $0x3c0] ss:$28 sps:$4 sm:$0xff]  }
  0xda   :  { %3196 = vmatpush1.bf16.msra.mxu0 %v8306_v18  ;;  %3359 = vmatprep.subr.bf16.mxu1 %v8311_v25  ;;  %v8380_v25 = vld [vmem:[#allocation8 + $0x3f4] ss:$28 sps:$4 sm:$0xff]  }
  0xdb   :  { %3197 = vmatprep.subr.bf16.mxu0 %v8314_v19 }
  0xdd   :  { %3360 = vmatpush1.bf16.msra.mxu1 %v8309_v28 }
  0xde   :  { %3198 = vmatpush1.bf16.msra.mxu0 %v8312_v22  ;;  %3361 = vmatprep.subr.bf16.mxu1 %v8317_v29  ;;  %v197_v22 = vrot.slane %v9761_v3, %v9771_v17 }
  0xdf   :  { %3199 = vmatprep.subr.bf16.mxu0 %v8320_v23  ;;  %v8372_v23 = vld [vmem:[#allocation8 + $0x3b8] ss:$28 sps:$4 sm:$0xff]  }
  0xe1   :  { %3362 = vmatpush1.bf16.msra.mxu1 %v8315_v32  ;;  %v8381_v32 = vld [vmem:[#allocation8 + $0x3f8] ss:$28 sps:$4 sm:$0xff]  }
  0xe2   :  { %3200 = vmatpush1.bf16.msra.mxu0 %v8318_v26  ;;  %3363 = vmatprep.subr.bf16.mxu1 %v8323_v33  ;;  %v8383_v26 = vld [vmem:[#allocation8 + $0x3fc] ss:$28 sps:$4 sm:$0xff]  }
  0xe3   :  { %3201 = vmatprep.subr.bf16.mxu0 %v8326_v27 }
  0xe5   :  { %3364 = vmatpush1.bf16.msra.mxu1 %v8321_v36 }
  0xe6   :  { %3202 = vmatpush1.bf16.msra.mxu0 %v8324_v30  ;;  %3365 = vmatprep.subr.bf16.mxu1 %v8329_v37 }
  0xe7   :  { %3203 = vmatprep.subr.bf16.mxu0 %v8332_v31  ;;  %v8378_v31 = vld [vmem:[#allocation8 + $0x3f0] ss:$28 sps:$4 sm:$0xff]  }
  0xe9   :  { %3366 = vmatpush1.bf16.msra.mxu1 %v8327_v40  ;;  %v8392_v40 = vld [vmem:[#allocation8 + $0x464] ss:$28 sps:$4 sm:$0xff]  }
  0xea   :  { %3204 = vmatpush1.bf16.msra.mxu0 %v8330_v34  ;;  %3367 = vmatprep.subr.bf16.mxu1 %v8335_v41  ;;  %v8386_v34 = vld [vmem:[#allocation8 + $0x42c] ss:$28 sps:$4 sm:$0xff]  }
  0xeb   :  { %3205 = vmatprep.subr.bf16.mxu0 %v8338_v35  ;;  %v8389_v35 = vld [vmem:[#allocation8 + $0x434] ss:$28 sps:$4 sm:$0xff]   ;;  %v8395_v41 = vld [vmem:[#allocation8 + $0x46c] ss:$28 sps:$4 sm:$0xff]  }
  0xed   :  { %3368 = vmatpush1.bf16.msra.mxu1 %v8333_v45  ;;  %v8398_v45 = vld [vmem:[#allocation8 + $0x49c] ss:$28 sps:$4 sm:$0xff]  }
  0xee   :  { %3206 = vmatpush1.bf16.msra.mxu0 %v8336_v38  ;;  %3369 = vmatprep.subr.bf16.mxu1 %v8341_v46  ;;  %v8384_v38 = vld [vmem:[#allocation8 + $0x428] ss:$28 sps:$4 sm:$0xff]  }
  0xef   :  { %3207 = vmatprep.subr.bf16.mxu0 %v8344_v39  ;;  %v8387_v39 = vld [vmem:[#allocation8 + $0x430] ss:$28 sps:$4 sm:$0xff]   ;;  %v8401_v46 = vld [vmem:[#allocation8 + $0x4a4] ss:$28 sps:$4 sm:$0xff]  }
  0xf1   :  { %3370 = vmatpush1.bf16.msra.mxu1 %v8339_v48  ;;  %v8399_v48 = vld [vmem:[#allocation8 + $0x4a0] ss:$28 sps:$4 sm:$0xff]  }
  0xf2   :  { %3208 = vmatpush1.bf16.msra.mxu0 %v8342_v42  ;;  %3371 = vmatprep.subr.bf16.mxu1 %v8347_v50  ;;  %v8390_v42 = vld [vmem:[#allocation8 + $0x460] ss:$28 sps:$4 sm:$0xff]  }
  0xf3   :  { %3209 = vmatprep.subr.bf16.mxu0 %v8350_v44  ;;  %v8393_v44 = vld [vmem:[#allocation8 + $0x468] ss:$28 sps:$4 sm:$0xff]   ;;  %v8407_v50 = vld [vmem:[#allocation8 + $0x4dc] ss:$28 sps:$4 sm:$0xff]  }
  0xf5   :  { %3372 = vmatpush1.bf16.msra.mxu1 %v8345_v52  ;;  %v8405_v52 = vld [vmem:[#allocation8 + $0x4d8] ss:$28 sps:$4 sm:$0xff]  }
  0xf6   :  { %3210 = vmatpush1.bf16.msra.mxu0 %v8348_v47  ;;  %3373 = vmatprep.subr.bf16.mxu1 %v8353_v54  ;;  %v8396_v47 = vld [vmem:[#allocation8 + $0x498] ss:$28 sps:$4 sm:$0xff]  }
  0xf7   :  { %3211 = vmatprep.subr.bf16.mxu0 %v8356_v49  ;;  %v8404_v49 = vld [vmem:[#allocation8 + $0x4d4] ss:$28 sps:$4 sm:$0xff]  }
  0xf8   :  { %v8413_v54 = vld [vmem:[#allocation8 + $0x514] ss:$28 sps:$4 sm:$0xff]  }
  0xf9   :  { %3374 = vmatpush1.bf16.msra.mxu1 %v8351_v56 }
  0xfa   :  { %3212 = vmatpush1.bf16.msra.mxu0 %v8354_v51  ;;  %3375 = vmatprep.subr.bf16.mxu1 %v8359_v58  ;;  %v8402_v51 = vld [vmem:[#allocation8 + $0x4d0] ss:$28 sps:$4 sm:$0xff]  }
  0xfb   :  { %3213 = vmatprep.subr.bf16.mxu0 %v8362_v53  ;;  %v8410_v53 = vld [vmem:[#allocation8 + $0x50c] ss:$28 sps:$4 sm:$0xff]  }
  0xfc   :  { %v8411_v58 = vld [vmem:[#allocation8 + $0x510] ss:$28 sps:$4 sm:$0xff]  }
  0xfd   :  { %3376 = vmatpush1.bf16.msra.mxu1 %v8357_v59 }
  0xfe   :  { %3214 = vmatpush1.bf16.msra.mxu0 %v8360_v55  ;;  %3377 = vmatprep.subr.bf16.mxu1 %v8365_v60  ;;  %v8416_v60 = vld [vmem:[#allocation8 + $0x544] ss:$28 sps:$4 sm:$0xff]  }
  0xff   :  { %3224 = vmatprep.subr.bf16.mxu0 %v8368_v57  ;;  %v8408_v57 = vld [vmem:[#allocation8 + $0x508] ss:$28 sps:$4 sm:$0xff]  }
 0x101   :  { %3378 = vmatpush1.bf16.msra.mxu1 %v8363_v61  ;;  %v8419_v61 = vld [vmem:[#allocation8 + $0x54c] ss:$28 sps:$4 sm:$0xff]  }
 0x102   :  { %3388 = vmatprep.subr.bf16.mxu1 %v8371_v62 }
 0x174   :  { %v539_v7 = vpop.f32.mrb[0].mxu0 }
 0x175   :  { %v540_v8 = vadd.f32 %v539_v7, %v185_v5  ;;  %v541_v9 = vpop.f32.mrb[1].mxu0  ;;  %v8417_v5 = vld [vmem:[#allocation8 + $0x548] ss:$28 sps:$4 sm:$0xff]  }
 0x176   :  { %v542_v10 = vadd.f32 %v541_v9, %v189_v6  ;;  %v543_v11 = vpop.f32.mrb[2].mxu0  ;;  %v8422_v6 = vld [vmem:[#allocation8 + $0x57c] ss:$28 sps:$4 sm:$0xff]   ;;  %v8425_v7 = vld [vmem:[#allocation8 + $0x584] ss:$28 sps:$4 sm:$0xff]  }
 0x177   :  { %v668_v12 = vmax.f32 %v540_v8, 0.0  ;;  %v544_v13 = vpop.f32.mrb[3].mxu0  ;;  %v9783_v27 = vpop.f32.mrb[0].mxu1  ;;  %v8420_v8 = vld [vmem:[#allocation8 + $0x578] ss:$28 sps:$4 sm:$0xff]  }
 0x178   :  { %v669_v14 = vmax.f32 %v542_v10, 0.0  ;;  %v582_v28 = vpop.f32.mrb[1].mxu1  ;;  %v8423_v9 = vld [vmem:[#allocation8 + $0x580] ss:$28 sps:$4 sm:$0xff]   ;;  %v8428_v10 = vld [vmem:[#allocation8 + $0x5b4] ss:$28 sps:$4 sm:$0xff]  }
 0x179   :  { %v9775_v19 = vpack.c.bf16 %v668_v12, %v668_v12  ;;  %v583_v29 = vadd.f32 %v582_v28, %v197_v22  ;;  %v584_v30 = vpop.f32.mrb[2].mxu1  ;;  %v8431_v11 = vld [vmem:[#allocation8 + $0x5bc] ss:$28 sps:$4 sm:$0xff]   ;;  %v8426_v13 = vld [vmem:[#allocation8 + $0x5b0] ss:$28 sps:$4 sm:$0xff]  }
 0x17a   :  { %v9773_v18 = vpack.c.bf16 %v669_v14, %v669_v14  ;;  %v585_v33 = vpop.f32.mrb[3].mxu1  ;;  %v8437_v22 = vld [vmem:[#allocation8 + $0x5f4] ss:$28 sps:$4 sm:$0xff]   ;;  %v8438_v28 = vld [vmem:[#allocation8 + $0x620] ss:$28 sps:$4 sm:$0xff]   ;;  %v9796_v30 = vsub.s32 2, %v9756_v1 }
 0x17b   :  { %v671_v36 = vmax.f32 %v583_v29, 0.0  ;;  %v8441_v29 = vld [vmem:[#allocation8 + $0x628] ss:$28 sps:$4 sm:$0xff]   ;;  %v8444_v33 = vld [vmem:[#allocation8 + $0x658] ss:$28 sps:$4 sm:$0xff]  }
 0x17c   :  { %3215 = vmatprep.mubr.bf16.mxu0 %v9773_v18  ;;  %3379 = vmatprep.mubr.bf16.mxu1 %v9773_v18 }
 0x17d   :  { %3216 = vmatmul.mubr.bf16.vlgmr.msra.gmra.mrb[8].mxu0 %v9775_v19  ;;  %3380 = vmatmul.mubr.bf16.vlgmr.msra.gmra.mrb[8].mxu1 %v9775_v19  ;;  %v9785_v37 = vpack.c.bf16 %v671_v36, %v671_v36  ;;  %v193_v36 = vrot.slane %v9761_v3, %v9796_v30 }
 0x17e   :  { %3225 = vmatpush1.bf16.msra.mxu0 %v8366_v15  ;;  %3389 = vmatpush1.bf16.msra.mxu1 %v8369_v16  ;;  %v8429_v15 = vld [vmem:[#allocation8 + $0x5b8] ss:$28 sps:$4 sm:$0xff]  }
 0x17f   :  { %3226 = vmatprep.subr.bf16.mxu0 %v8374_v20  ;;  %3390 = vmatprep.subr.bf16.mxu1 %v8377_v21  ;;  %v8434_v21 = vld [vmem:[#allocation8 + $0x5ec] ss:$28 sps:$4 sm:$0xff]  }
 0x180   :  { %3256 = vmatprep.mubr.bf16.mxu0 %v9785_v37  ;;  %3420 = vmatprep.mubr.bf16.mxu1 %v9785_v37 }
 0x182   :  { %3227 = vmatpush1.bf16.msra.mxu0 %v8372_v23  ;;  %3391 = vmatpush1.bf16.msra.mxu1 %v8375_v24  ;;  %v8432_v23 = vld [vmem:[#allocation8 + $0x5e8] ss:$28 sps:$4 sm:$0xff]   ;;  %v8435_v24 = vld [vmem:[#allocation8 + $0x5f0] ss:$28 sps:$4 sm:$0xff]  }
 0x183   :  { %3228 = vmatprep.subr.bf16.mxu0 %v8380_v25  ;;  %3392 = vmatprep.subr.bf16.mxu1 %v8383_v26  ;;  %v8440_v25 = vld [vmem:[#allocation8 + $0x624] ss:$28 sps:$4 sm:$0xff]   ;;  %v8443_v26 = vld [vmem:[#allocation8 + $0x62c] ss:$28 sps:$4 sm:$0xff]  }
 0x186   :  { %3229 = vmatpush1.bf16.msra.mxu0 %v8378_v31  ;;  %3393 = vmatpush1.bf16.msra.mxu1 %v8381_v32  ;;  %v8446_v31 = vld [vmem:[#allocation8 + $0x65c] ss:$28 sps:$4 sm:$0xff]   ;;  %v8449_v32 = vld [vmem:[#allocation8 + $0x664] ss:$28 sps:$4 sm:$0xff]  }
 0x187   :  { %3230 = vmatprep.subr.bf16.mxu0 %v8386_v34  ;;  %3394 = vmatprep.subr.bf16.mxu1 %v8389_v35  ;;  %v9799_v34 = vsub.s32 5, %v9756_v1  ;;  %v8447_v35 = vld [vmem:[#allocation8 + $0x660] ss:$28 sps:$4 sm:$0xff]  }
 0x18a   :  { %3231 = vmatpush1.bf16.msra.mxu0 %v8384_v38  ;;  %3395 = vmatpush1.bf16.msra.mxu1 %v8387_v39  ;;  %v8452_v38 = vld [vmem:[#allocation8 + $0x694] ss:$28 sps:$4 sm:$0xff]   ;;  %v8455_v39 = vld [vmem:[#allocation8 + $0x69c] ss:$28 sps:$4 sm:$0xff]  }
 0x18b   :  { %3232 = vmatprep.subr.bf16.mxu0 %v8392_v40  ;;  %3396 = vmatprep.subr.bf16.mxu1 %v8395_v41  ;;  %v8450_v40 = vld [vmem:[#allocation8 + $0x690] ss:$28 sps:$4 sm:$0xff]   ;;  %v205_v41 = vrot.slane %v9761_v3, %v9799_v34 }
 0x18c   :  { %v8467_v3 = vld [vmem:[#allocation8 + $0x70c] ss:$28 sps:$4 sm:$0xff]  }
 0x18e   :  { %3233 = vmatpush1.bf16.msra.mxu0 %v8390_v42  ;;  %3397 = vmatpush1.bf16.msra.mxu1 %v8393_v44  ;;  %v581_v42 = vadd.f32 %v9783_v27, %v193_v36  ;;  %v8453_v44 = vld [vmem:[#allocation8 + $0x698] ss:$28 sps:$4 sm:$0xff]   ;;  %v8513_v36 = vld [vmem:[#allocation8 + $0x8c8] ss:$28 sps:$4 sm:$0xff]  }
 0x18f   :  { %3234 = vmatprep.subr.bf16.mxu0 %v8398_v45  ;;  %3398 = vmatprep.subr.bf16.mxu1 %v8401_v46  ;;  %v8458_v45 = vld [vmem:[#allocation8 + $0x6cc] ss:$28 sps:$4 sm:$0xff]   ;;  %v8461_v46 = vld [vmem:[#allocation8 + $0x6d4] ss:$28 sps:$4 sm:$0xff]  }
 0x192   :  { %3235 = vmatpush1.bf16.msra.mxu0 %v8396_v47  ;;  %3399 = vmatpush1.bf16.msra.mxu1 %v8399_v48  ;;  %v8456_v47 = vld [vmem:[#allocation8 + $0x6c8] ss:$28 sps:$4 sm:$0xff]  }
 0x193   :  { %3236 = vmatprep.subr.bf16.mxu0 %v8404_v49  ;;  %3400 = vmatprep.subr.bf16.mxu1 %v8407_v50  ;;  %v670_v49 = vmax.f32 %v581_v42, 0.0  ;;  %v8459_v50 = vld [vmem:[#allocation8 + $0x6d0] ss:$28 sps:$4 sm:$0xff]  }
 0x194   :  { %v9789_v55 = vpop.f32.mrb[4].mxu0  ;;  %v8524_v42 = vld [vmem:[#allocation8 + $0x934] ss:$28 sps:$4 sm:$0xff]  }
 0x195   :  { %v9791_v56 = vpop.f32.mrb[5].mxu0 }
 0x196   :  { %3237 = vmatpush1.bf16.msra.mxu0 %v8402_v51  ;;  %3401 = vmatpush1.bf16.msra.mxu1 %v8405_v52  ;;  %v625_v59 = vpop.f32.mrb[6].mxu0  ;;  %v624_v48 = vadd.f32 %v9791_v56, %v205_v41  ;;  %v8464_v51 = vld [vmem:[#allocation8 + $0x704] ss:$28 sps:$4 sm:$0xff]   ;;  %v8468_v56 = vld [vmem:[#allocation8 + $0x738] ss:$28 sps:$4 sm:$0xff]  }
 0x197   :  { %3238 = vmatprep.subr.bf16.mxu0 %v8410_v53  ;;  %3402 = vmatprep.subr.bf16.mxu1 %v8413_v54  ;;  %v626_v62 = vpop.f32.mrb[7].mxu0  ;;  %v9793_v12 = vpop.f32.mrb[4].mxu1  ;;  %v8462_v52 = vld [vmem:[#allocation8 + $0x700] ss:$28 sps:$4 sm:$0xff]   ;;  %v9807_v53 = vpack.c.bf16 %v670_v49, %v670_v49  ;;  %v8465_v54 = vld [vmem:[#allocation8 + $0x708] ss:$28 sps:$4 sm:$0xff]  }
 0x198   :  { %v8051_v14 = vpop.f32.mrb[5].mxu1  ;;  %v673_v27 = vmax.f32 %v624_v48, 0.0  ;;  %v8479_v62 = vld [vmem:[#allocation8 + $0x77c] ss:$28 sps:$4 sm:$0xff]   ;;  %v8533_v48 = vld [vmem:[#allocation8 + $0x974] ss:$28 sps:$4 sm:$0xff]  }
 0x199   :  { %v665_v16 = vpop.f32.mrb[6].mxu1  ;;  %v8489_v14 = vld [vmem:[#allocation8 + $0x7e8] ss:$28 sps:$4 sm:$0xff]   ;;  %v8519_v41 = vld [vmem:[#allocation8 + $0x900] ss:$28 sps:$4 sm:$0xff]  }
 0x19a   :  { %3239 = vmatpush1.bf16.msra.mxu0 %v8408_v57  ;;  %3403 = vmatpush1.bf16.msra.mxu1 %v8411_v58  ;;  %v8052_v20 = vpop.f32.mrb[7].mxu1  ;;  %v8470_v57 = vld [vmem:[#allocation8 + $0x73c] ss:$28 sps:$4 sm:$0xff]   ;;  %v8473_v58 = vld [vmem:[#allocation8 + $0x744] ss:$28 sps:$4 sm:$0xff]   ;;  %v9809_v59 = vpack.c.bf16 %v673_v27, %v673_v27  ;;  %v9816_v27 = vsub.s32 4, %v9756_v1 }
 0x19b   :  { %3240 = vmatprep.subr.bf16.mxu0 %v8416_v60  ;;  %3404 = vmatprep.subr.bf16.mxu1 %v8419_v61  ;;  %v8471_v60 = vld [vmem:[#allocation8 + $0x740] ss:$28 sps:$4 sm:$0xff]   ;;  %v8476_v61 = vld [vmem:[#allocation8 + $0x774] ss:$28 sps:$4 sm:$0xff]   ;;  %v8528_v49 = vld [vmem:[#allocation8 + $0x968] ss:$28 sps:$4 sm:$0xff]  }
 0x19c   :  { %v8497_v16 = vld [vmem:[#allocation8 + $0x824] ss:$28 sps:$4 sm:$0xff]   ;;  %v8492_v20 = vld [vmem:[#allocation8 + $0x818] ss:$28 sps:$4 sm:$0xff]  }
 0x19e   :  { %3241 = vmatpush1.bf16.msra.mxu0 %v8414_v63  ;;  %3405 = vmatpush1.bf16.msra.mxu1 %v8417_v5  ;;  %v8474_v63 = vld [vmem:[#allocation8 + $0x770] ss:$28 sps:$4 sm:$0xff]   ;;  %v8477_v5 = vld [vmem:[#allocation8 + $0x778] ss:$28 sps:$4 sm:$0xff]  }
 0x19f   :  { %3242 = vmatprep.subr.bf16.mxu0 %v8422_v6  ;;  %3406 = vmatprep.subr.bf16.mxu1 %v8425_v7  ;;  %v8482_v6 = vld [vmem:[#allocation8 + $0x7ac] ss:$28 sps:$4 sm:$0xff]   ;;  %v8485_v7 = vld [vmem:[#allocation8 + $0x7b4] ss:$28 sps:$4 sm:$0xff]  }
 0x1a2   :  { %3243 = vmatpush1.bf16.msra.mxu0 %v8420_v8  ;;  %3407 = vmatpush1.bf16.msra.mxu1 %v8423_v9  ;;  %v8480_v8 = vld [vmem:[#allocation8 + $0x7a8] ss:$28 sps:$4 sm:$0xff]   ;;  %v8483_v9 = vld [vmem:[#allocation8 + $0x7b0] ss:$28 sps:$4 sm:$0xff]  }
 0x1a3   :  { %3244 = vmatprep.subr.bf16.mxu0 %v8428_v10  ;;  %3408 = vmatprep.subr.bf16.mxu1 %v8431_v11  ;;  %v8488_v10 = vld [vmem:[#allocation8 + $0x7e4] ss:$28 sps:$4 sm:$0xff]   ;;  %v8491_v11 = vld [vmem:[#allocation8 + $0x7ec] ss:$28 sps:$4 sm:$0xff]  }
 0x1a6   :  { %3245 = vmatpush1.bf16.msra.mxu0 %v8426_v13  ;;  %3409 = vmatpush1.bf16.msra.mxu1 %v8429_v15  ;;  %v8486_v13 = vld [vmem:[#allocation8 + $0x7e0] ss:$28 sps:$4 sm:$0xff]  }
 0x1a7   :  { %3246 = vmatprep.subr.bf16.mxu0 %v8434_v21  ;;  %3410 = vmatprep.subr.bf16.mxu1 %v8437_v22  ;;  %v8494_v15 = vld [vmem:[#allocation8 + $0x81c] ss:$28 sps:$4 sm:$0xff]   ;;  %v8500_v22 = vld [vmem:[#allocation8 + $0x854] ss:$28 sps:$4 sm:$0xff]  }
 0x1a8   :  { %v8495_v21 = vld [vmem:[#allocation8 + $0x820] ss:$28 sps:$4 sm:$0xff]  }
 0x1aa   :  { %3247 = vmatpush1.bf16.msra.mxu0 %v8432_v23  ;;  %3411 = vmatpush1.bf16.msra.mxu1 %v8435_v24  ;;  %v8503_v23 = vld [vmem:[#allocation8 + $0x85c] ss:$28 sps:$4 sm:$0xff]   ;;  %v8498_v24 = vld [vmem:[#allocation8 + $0x850] ss:$28 sps:$4 sm:$0xff]  }
 0x1ab   :  { %3248 = vmatprep.subr.bf16.mxu0 %v8440_v25  ;;  %3412 = vmatprep.subr.bf16.mxu1 %v8443_v26  ;;  %v8501_v25 = vld [vmem:[#allocation8 + $0x858] ss:$28 sps:$4 sm:$0xff]   ;;  %v8506_v26 = vld [vmem:[#allocation8 + $0x88c] ss:$28 sps:$4 sm:$0xff]  }
 0x1ae   :  { %3249 = vmatpush1.bf16.msra.mxu0 %v8438_v28  ;;  %3413 = vmatpush1.bf16.msra.mxu1 %v8441_v29  ;;  %v8509_v28 = vld [vmem:[#allocation8 + $0x894] ss:$28 sps:$4 sm:$0xff]   ;;  %v8504_v29 = vld [vmem:[#allocation8 + $0x888] ss:$28 sps:$4 sm:$0xff]  }
 0x1af   :  { %3250 = vmatprep.subr.bf16.mxu0 %v8446_v31  ;;  %3414 = vmatprep.subr.bf16.mxu1 %v8449_v32  ;;  %v8507_v31 = vld [vmem:[#allocation8 + $0x890] ss:$28 sps:$4 sm:$0xff]   ;;  %v8512_v32 = vld [vmem:[#allocation8 + $0x8c4] ss:$28 sps:$4 sm:$0xff]  }
 0x1b2   :  { %3251 = vmatpush1.bf16.msra.mxu0 %v8444_v33  ;;  %3415 = vmatpush1.bf16.msra.mxu1 %v8447_v35  ;;  %v8515_v33 = vld [vmem:[#allocation8 + $0x8cc] ss:$28 sps:$4 sm:$0xff]   ;;  %v8510_v35 = vld [vmem:[#allocation8 + $0x8c0] ss:$28 sps:$4 sm:$0xff]  }
 0x1b3   :  { %3252 = vmatprep.subr.bf16.mxu0 %v8452_v38  ;;  %3416 = vmatprep.subr.bf16.mxu1 %v8455_v39  ;;  %v8518_v38 = vld [vmem:[#allocation8 + $0x8fc] ss:$28 sps:$4 sm:$0xff]   ;;  %v8521_v39 = vld [vmem:[#allocation8 + $0x904] ss:$28 sps:$4 sm:$0xff]  }
 0x1b6   :  { %3253 = vmatpush1.bf16.msra.mxu0 %v8450_v40  ;;  %3417 = vmatpush1.bf16.msra.mxu1 %v8453_v44  ;;  %v8516_v40 = vld [vmem:[#allocation8 + $0x8f8] ss:$28 sps:$4 sm:$0xff]  }
 0x1b7   :  { %3254 = vmatprep.subr.bf16.mxu0 %v8458_v45  ;;  %3418 = vmatprep.subr.bf16.mxu1 %v8461_v46  ;;  %v8527_v44 = vld [vmem:[#allocation8 + $0x93c] ss:$28 sps:$4 sm:$0xff]   ;;  %v8522_v45 = vld [vmem:[#allocation8 + $0x930] ss:$28 sps:$4 sm:$0xff]  }
 0x1b8   :  { %v8525_v46 = vld [vmem:[#allocation8 + $0x938] ss:$28 sps:$4 sm:$0xff]  }
 0x1ba   :  { %3255 = vmatpush1.bf16.msra.mxu0 %v8456_v47  ;;  %3419 = vmatpush1.bf16.msra.mxu1 %v8459_v50  ;;  %v8530_v47 = vld [vmem:[#allocation8 + $0x96c] ss:$28 sps:$4 sm:$0xff]  }
 0x1bb   :  { %3265 = vmatprep.subr.bf16.mxu0 %v8464_v51  ;;  %3429 = vmatprep.subr.bf16.mxu1 %v8467_v3  ;;  %v8531_v50 = vld [vmem:[#allocation8 + $0x970] ss:$28 sps:$4 sm:$0xff]   ;;  %v8536_v51 = vld [vmem:[#allocation8 + $0x9a4] ss:$28 sps:$4 sm:$0xff]  }
 0x1bc   :  { %v8539_v3 = vld [vmem:[#allocation8 + $0x9ac] ss:$28 sps:$4 sm:$0xff]  }
 0x1bd   :  { %3257 = vmatmul.mubr.bf16.vlgmr.msra.gmra.mrb[8].mxu0 %v9807_v53  ;;  %3421 = vmatmul.mubr.bf16.vlgmr.msra.gmra.mrb[8].mxu1 %v9807_v53 }
 0x1be   :  { %3266 = vmatpush1.bf16.msra.mxu0 %v8462_v52  ;;  %3430 = vmatpush1.bf16.msra.mxu1 %v8465_v54  ;;  %v8534_v52 = vld [vmem:[#allocation8 + $0x9a0] ss:$28 sps:$4 sm:$0xff]   ;;  %v8537_v54 = vld [vmem:[#allocation8 + $0x9a8] ss:$28 sps:$4 sm:$0xff]  }
 0x1bf   :  { %3267 = vmatprep.subr.bf16.mxu0 %v8470_v57  ;;  %3431 = vmatprep.subr.bf16.mxu1 %v8473_v58  ;;  %v8542_v57 = vld [vmem:[#allocation8 + $0x9dc] ss:$28 sps:$4 sm:$0xff]   ;;  %v8545_v58 = vld [vmem:[#allocation8 + $0x9e4] ss:$28 sps:$4 sm:$0xff]  }
 0x1c0   :  { %3297 = vmatprep.mubr.bf16.mxu0 %v9809_v59  ;;  %3461 = vmatprep.mubr.bf16.mxu1 %v9809_v59 }
 0x1c2   :  { %3268 = vmatpush1.bf16.msra.mxu0 %v8468_v56  ;;  %3432 = vmatpush1.bf16.msra.mxu1 %v8471_v60  ;;  %v8540_v56 = vld [vmem:[#allocation8 + $0x9d8] ss:$28 sps:$4 sm:$0xff]  }
 0x1c3   :  { %3269 = vmatprep.subr.bf16.mxu0 %v8476_v61  ;;  %3433 = vmatprep.subr.bf16.mxu1 %v8479_v62  ;;  %v9818_v60 = vld [vmem:[#allocation7] sm:$0xff] }
 0x1c4   :  { %v201_v61 = vrot.slane %v9818_v60, %v9816_v27  ;;  %v8543_v62 = vld [vmem:[#allocation8 + $0x9e0] ss:$28 sps:$4 sm:$0xff]  }
 0x1c6   :  { %3270 = vmatpush1.bf16.msra.mxu0 %v8474_v63  ;;  %3434 = vmatpush1.bf16.msra.mxu1 %v8477_v5  ;;  %v8548_v63 = vld [vmem:[#allocation8 + $0xa14] ss:$28 sps:$4 sm:$0xff]   ;;  %v8551_v5 = vld [vmem:[#allocation8 + $0xa1c] ss:$28 sps:$4 sm:$0xff]  }
 0x1c7   :  { %3271 = vmatprep.subr.bf16.mxu0 %v8482_v6  ;;  %3435 = vmatprep.subr.bf16.mxu1 %v8485_v7  ;;  %v8546_v6 = vld [vmem:[#allocation8 + $0xa10] ss:$28 sps:$4 sm:$0xff]   ;;  %v622_v7 = vadd.f32 %v9789_v55, %v201_v61  ;;  %v8561_v55 = vld [vmem:[#allocation8 + $0xa88] ss:$28 sps:$4 sm:$0xff]   ;;  %v8609_v61 = vld [vmem:[#allocation8 + $0x1d8] ss:$28 sps:$4 sm:$0xff]  }
 0x1ca   :  { %3272 = vmatpush1.bf16.msra.mxu0 %v8480_v8  ;;  %3436 = vmatpush1.bf16.msra.mxu1 %v8483_v9  ;;  %v8549_v8 = vld [vmem:[#allocation8 + $0xa18] ss:$28 sps:$4 sm:$0xff]   ;;  %v8554_v9 = vld [vmem:[#allocation8 + $0xa4c] ss:$28 sps:$4 sm:$0xff]  }
 0x1cb   :  { %3273 = vmatprep.subr.bf16.mxu0 %v8488_v10  ;;  %3437 = vmatprep.subr.bf16.mxu1 %v8491_v11  ;;  %v8557_v10 = vld [vmem:[#allocation8 + $0xa54] ss:$28 sps:$4 sm:$0xff]   ;;  %v8552_v11 = vld [vmem:[#allocation8 + $0xa48] ss:$28 sps:$4 sm:$0xff]  }
 0x1ce   :  { %3274 = vmatpush1.bf16.msra.mxu0 %v8486_v13  ;;  %3438 = vmatpush1.bf16.msra.mxu1 %v8489_v14  ;;  %v672_v13 = vmax.f32 %v622_v7, 0.0  ;;  %v8555_v14 = vld [vmem:[#allocation8 + $0xa50] ss:$28 sps:$4 sm:$0xff]   ;;  %v8611_v7 = vld [vmem:[#allocation8 + $0x48] ss:$28 sps:$4 sm:$0xff]  }
 0x1cf   :  { %3275 = vmatprep.subr.bf16.mxu0 %v8494_v15  ;;  %3439 = vmatprep.subr.bf16.mxu1 %v8497_v16  ;;  %v8560_v15 = vld [vmem:[#allocation8 + $0xa84] ss:$28 sps:$4 sm:$0xff]   ;;  %v8563_v16 = vld [vmem:[#allocation8 + $0xa8c] ss:$28 sps:$4 sm:$0xff]  }
 0x1d2   :  { %3276 = vmatpush1.bf16.msra.mxu0 %v8492_v20  ;;  %3440 = vmatpush1.bf16.msra.mxu1 %v8495_v21  ;;  %v8558_v20 = vld [vmem:[#allocation8 + $0xa80] ss:$28 sps:$4 sm:$0xff]   ;;  %v9823_v21 = vpack.c.bf16 %v672_v13, %v672_v13  ;;  %v8620_v13 = vld [vmem:[#allocation8 + $0x88] ss:$28 sps:$4 sm:$0xff]  }
 0x1d3   :  { %3277 = vmatprep.subr.bf16.mxu0 %v8500_v22  ;;  %3441 = vmatprep.subr.bf16.mxu1 %v8503_v23  ;;  %v8566_v22 = vld [vmem:[#allocation8 + $0xabc] ss:$28 sps:$4 sm:$0xff]   ;;  %v8569_v23 = vld [vmem:[#allocation8 + $0xac4] ss:$28 sps:$4 sm:$0xff]  }
 0x1d6   :  { %3278 = vmatpush1.bf16.msra.mxu0 %v8498_v24  ;;  %3442 = vmatpush1.bf16.msra.mxu1 %v8501_v25  ;;  %v8564_v24 = vld [vmem:[#allocation8 + $0xab8] ss:$28 sps:$4 sm:$0xff]   ;;  %v8567_v25 = vld [vmem:[#allocation8 + $0xac0] ss:$28 sps:$4 sm:$0xff]  }
 0x1d7   :  { %3279 = vmatprep.subr.bf16.mxu0 %v8506_v26  ;;  %3443 = vmatprep.subr.bf16.mxu1 %v8509_v28  ;;  %v8572_v26 = vld [vmem:[#allocation8 + $0xaf4] ss:$28 sps:$4 sm:$0xff]   ;;  %v8575_v28 = vld [vmem:[#allocation8 + $0xafc] ss:$28 sps:$4 sm:$0xff]  }
 0x1da   :  { %3280 = vmatpush1.bf16.msra.mxu0 %v8504_v29  ;;  %3444 = vmatpush1.bf16.msra.mxu1 %v8507_v31  ;;  %v8570_v29 = vld [vmem:[#allocation8 + $0xaf0] ss:$28 sps:$4 sm:$0xff]   ;;  %v8573_v31 = vld [vmem:[#allocation8 + $0xaf8] ss:$28 sps:$4 sm:$0xff]  }
 0x1db   :  { %3281 = vmatprep.subr.bf16.mxu0 %v8512_v32  ;;  %3445 = vmatprep.subr.bf16.mxu1 %v8515_v33  ;;  %v8578_v32 = vld [vmem:[#allocation8 + $0xb2c] ss:$28 sps:$4 sm:$0xff]   ;;  %v8581_v33 = vld [vmem:[#allocation8 + $0xb34] ss:$28 sps:$4 sm:$0xff]  }
 0x1de   :  { %3282 = vmatpush1.bf16.msra.mxu0 %v8510_v35  ;;  %3446 = vmatpush1.bf16.msra.mxu1 %v8513_v36  ;;  %v8576_v35 = vld [vmem:[#allocation8 + $0xb28] ss:$28 sps:$4 sm:$0xff]   ;;  %v8579_v36 = vld [vmem:[#allocation8 + $0xb30] ss:$28 sps:$4 sm:$0xff]  }
 0x1df   :  { %3283 = vmatprep.subr.bf16.mxu0 %v8518_v38  ;;  %3447 = vmatprep.subr.bf16.mxu1 %v8521_v39  ;;  %v8584_v38 = vld [vmem:[#allocation8 + $0xb64] ss:$28 sps:$4 sm:$0xff]   ;;  %v8587_v39 = vld [vmem:[#allocation8 + $0xb6c] ss:$28 sps:$4 sm:$0xff]  }
 0x1e2   :  { %3284 = vmatpush1.bf16.msra.mxu0 %v8516_v40  ;;  %3448 = vmatpush1.bf16.msra.mxu1 %v8519_v41  ;;  %v9830_v40 = vsub.s32 6, %v9756_v1  ;;  %v8582_v41 = vld [vmem:[#allocation8 + $0xb60] ss:$28 sps:$4 sm:$0xff]  }
 0x1e3   :  { %3285 = vmatprep.subr.bf16.mxu0 %v8524_v42  ;;  %3449 = vmatprep.subr.bf16.mxu1 %v8527_v44  ;;  %v8585_v42 = vld [vmem:[#allocation8 + $0xb68] ss:$28 sps:$4 sm:$0xff]   ;;  %v8590_v44 = vld [vmem:[#allocation8 + $0xb9c] ss:$28 sps:$4 sm:$0xff]  }
 0x1e4   :  { %v8599_v1 = vld [vmem:[#allocation8 + $0xbdc] ss:$28 sps:$4 sm:$0xff]  }
 0x1e6   :  { %3286 = vmatpush1.bf16.msra.mxu0 %v8522_v45  ;;  %3450 = vmatpush1.bf16.msra.mxu1 %v8525_v46  ;;  %v8593_v45 = vld [vmem:[#allocation8 + $0xba4] ss:$28 sps:$4 sm:$0xff]   ;;  %v8588_v46 = vld [vmem:[#allocation8 + $0xb98] ss:$28 sps:$4 sm:$0xff]  }
 0x1e7   :  { %3287 = vmatprep.subr.bf16.mxu0 %v8530_v47  ;;  %3451 = vmatprep.subr.bf16.mxu1 %v8533_v48  ;;  %v209_v47 = vrot.slane %v9818_v60, %v9830_v40  ;;  %v8591_v48 = vld [vmem:[#allocation8 + $0xba0] ss:$28 sps:$4 sm:$0xff]   ;;  %v8608_v60 = vld [vmem:[#allocation8 + $0x14] ss:$28 sps:$4 sm:$0xff]  }
 0x1ea   :  { %3288 = vmatpush1.bf16.msra.mxu0 %v8528_v49  ;;  %3452 = vmatpush1.bf16.msra.mxu1 %v8531_v50  ;;  %v8596_v49 = vld [vmem:[#allocation8 + $0xbd4] ss:$28 sps:$4 sm:$0xff]   ;;  %v663_v50 = vadd.f32 %v9793_v12, %v209_v47 }
 0x1eb   :  { %3289 = vmatprep.subr.bf16.mxu0 %v8536_v51  ;;  %3453 = vmatprep.subr.bf16.mxu1 %v8539_v3  ;;  %v8594_v51 = vld [vmem:[#allocation8 + $0xbd0] ss:$28 sps:$4 sm:$0xff]   ;;  %v8597_v3 = vld [vmem:[#allocation8 + $0xbd8] ss:$28 sps:$4 sm:$0xff]  }
 0x1ec   :  { %v8610_v12 = vld [vmem:[#allocation8 + $0x18] ss:$28 sps:$4 sm:$0xff]   ;;  %v8654_v47 = vld [vmem:[#allocation8 + $0x590] ss:$28 sps:$4 sm:$0xff]  }
 0x1ee   :  { %3290 = vmatpush1.bf16.msra.mxu0 %v8534_v52  ;;  %3454 = vmatpush1.bf16.msra.mxu1 %v8537_v54  ;;  %v8602_v52 = vld [vmem:[#allocation8 + $0xc0c] ss:$28 sps:$4 sm:$0xff]   ;;  %v8605_v54 = vld [vmem:[#allocation8 + $0xc14] ss:$28 sps:$4 sm:$0xff]  }
 0x1ef   :  { %3291 = vmatprep.subr.bf16.mxu0 %v8542_v57  ;;  %3455 = vmatprep.subr.bf16.mxu1 %v8545_v58  ;;  %v674_v57 = vmax.f32 %v663_v50, 0.0  ;;  %v8600_v58 = vld [vmem:[#allocation8 + $0xc08] ss:$28 sps:$4 sm:$0xff]  }
 0x1f0   :  { %v8659_v50 = vld [vmem:[#allocation8 + $0x5c8] ss:$28 sps:$4 sm:$0xff]  }
 0x1f2   :  { %3292 = vmatpush1.bf16.msra.mxu0 %v8540_v56  ;;  %3456 = vmatpush1.bf16.msra.mxu1 %v8543_v62  ;;  %v8603_v56 = vld [vmem:[#allocation8 + $0xc10] ss:$28 sps:$4 sm:$0xff]  }
 0x1f3   :  { %3293 = vmatprep.subr.bf16.mxu0 %v8548_v63  ;;  %3457 = vmatprep.subr.bf16.mxu1 %v8551_v5  ;;  %v8606_v62 = vld [vmem:[#allocation8 + $0x10] ss:$28 sps:$4 sm:$0xff]   ;;  %v9835_v63 = vpack.c.bf16 %v674_v57, %v674_v57  ;;  %v8661_v57 = vld [vmem:[#allocation8 + $0x278] ss:$28 sps:$4 sm:$0xff]  }
 0x1f4   :  { %v8613_v5 = vld [vmem:[#allocation8 + $0x4c] ss:$28 sps:$4 sm:$0xff]  }
 0x1f6   :  { %3294 = vmatpush1.bf16.msra.mxu0 %v8546_v6  ;;  %3458 = vmatpush1.bf16.msra.mxu1 %v8549_v8  ;;  %v8614_v6 = vld [vmem:[#allocation8 + $0x210] ss:$28 sps:$4 sm:$0xff]  }
 0x1f7   :  { %3295 = vmatprep.subr.bf16.mxu0 %v8554_v9  ;;  %3459 = vmatprep.subr.bf16.mxu1 %v8557_v10  ;;  %v8615_v8 = vld [vmem:[#allocation8 + $0x50] ss:$28 sps:$4 sm:$0xff]   ;;  %v8618_v9 = vld [vmem:[#allocation8 + $0x84] ss:$28 sps:$4 sm:$0xff]  }
 0x1f8   :  { %v8619_v10 = vld [vmem:[#allocation8 + $0x248] ss:$28 sps:$4 sm:$0xff]  }
 0x1fa   :  { %3296 = vmatpush1.bf16.msra.mxu0 %v8552_v11  ;;  %3460 = vmatpush1.bf16.msra.mxu1 %v8555_v14  ;;  %v8616_v11 = vld [vmem:[#allocation8 + $0x80] ss:$28 sps:$4 sm:$0xff]  }
 0x1fb   :  { %3306 = vmatprep.subr.bf16.mxu0 %v8560_v15  ;;  %3470 = vmatprep.subr.bf16.mxu1 %v8563_v16  ;;  %v8623_v14 = vld [vmem:[#allocation8 + $0xbc] ss:$28 sps:$4 sm:$0xff]  }
 0x1fc   :  { %v8624_v15 = vld [vmem:[#allocation8 + $0x280] ss:$28 sps:$4 sm:$0xff]   ;;  %v8621_v16 = vld [vmem:[#allocation8 + $0xb8] ss:$28 sps:$4 sm:$0xff]  }
 0x1fd   :  { %3298 = vmatmul.mubr.bf16.vlgmr.msra.gmra.mrb[8].mxu0 %v9823_v21  ;;  %3462 = vmatmul.mubr.bf16.vlgmr.msra.gmra.mrb[8].mxu1 %v9823_v21 }
 0x1fe   :  { %3307 = vmatpush1.bf16.msra.mxu0 %v8558_v20  ;;  %3471 = vmatpush1.bf16.msra.mxu1 %v8561_v55  ;;  %v8625_v20 = vld [vmem:[#allocation8 + $0xc0] ss:$28 sps:$4 sm:$0xff]   ;;  %v8628_v55 = vld [vmem:[#allocation8 + $0xf4] ss:$28 sps:$4 sm:$0xff]  }
 0x1ff   :  { %3308 = vmatprep.subr.bf16.mxu0 %v8566_v22  ;;  %3472 = vmatprep.subr.bf16.mxu1 %v8569_v23  ;;  %v8629_v22 = vld [vmem:[#allocation8 + $0x2b8] ss:$28 sps:$4 sm:$0xff]  }
 0x200   :  { %3338 = vmatprep.mubr.bf16.mxu0 %v9600_v0  ;;  %3502 = vmatprep.mubr.bf16.mxu1 %v9600_v0  ;;  %v8630_v23 = vld [vmem:[#allocation8 + $0xf8] ss:$28 sps:$4 sm:$0xff]  }
 0x202   :  { %3309 = vmatpush1.bf16.msra.mxu0 %v8564_v24  ;;  %3473 = vmatpush1.bf16.msra.mxu1 %v8567_v25  ;;  %v8633_v24 = vld [vmem:[#allocation8 + $0x12c] ss:$28 sps:$4 sm:$0xff]  }
 0x203   :  { %3310 = vmatprep.subr.bf16.mxu0 %v8572_v26  ;;  %3474 = vmatprep.subr.bf16.mxu1 %v8575_v28  ;;  %v8634_v25 = vld [vmem:[#allocation8 + $0x2f0] ss:$28 sps:$4 sm:$0xff]   ;;  %v8631_v26 = vld [vmem:[#allocation8 + $0x128] ss:$28 sps:$4 sm:$0xff]  }
 0x204   :  { %v8635_v28 = vld [vmem:[#allocation8 + $0x130] ss:$28 sps:$4 sm:$0xff]  }
 0x206   :  { %3311 = vmatpush1.bf16.msra.mxu0 %v8570_v29  ;;  %3475 = vmatpush1.bf16.msra.mxu1 %v8573_v31  ;;  %v8638_v29 = vld [vmem:[#allocation8 + $0x164] ss:$28 sps:$4 sm:$0xff]  }
 0x207   :  { %3312 = vmatprep.subr.bf16.mxu0 %v8578_v32  ;;  %3476 = vmatprep.subr.bf16.mxu1 %v8581_v33  ;;  %v8639_v31 = vld [vmem:[#allocation8 + $0x328] ss:$28 sps:$4 sm:$0xff]   ;;  %v8636_v32 = vld [vmem:[#allocation8 + $0x160] ss:$28 sps:$4 sm:$0xff]  }
 0x208   :  { %v8640_v33 = vld [vmem:[#allocation8 + $0x168] ss:$28 sps:$4 sm:$0xff]  }
 0x20a   :  { %3313 = vmatpush1.bf16.msra.mxu0 %v8576_v35  ;;  %3477 = vmatpush1.bf16.msra.mxu1 %v8579_v36  ;;  %v8643_v35 = vld [vmem:[#allocation8 + $0x19c] ss:$28 sps:$4 sm:$0xff]  }
 0x20b   :  { %3314 = vmatprep.subr.bf16.mxu0 %v8584_v38  ;;  %3478 = vmatprep.subr.bf16.mxu1 %v8587_v39  ;;  %v8644_v36 = vld [vmem:[#allocation8 + $0x360] ss:$28 sps:$4 sm:$0xff]   ;;  %v8641_v38 = vld [vmem:[#allocation8 + $0x198] ss:$28 sps:$4 sm:$0xff]  }
 0x20c   :  { %v8645_v39 = vld [vmem:[#allocation8 + $0x1a0] ss:$28 sps:$4 sm:$0xff]  }
 0x20e   :  { %3315 = vmatpush1.bf16.msra.mxu0 %v8582_v41  ;;  %3479 = vmatpush1.bf16.msra.mxu1 %v8585_v42  ;;  %v8648_v41 = vld [vmem:[#allocation8 + $0x1d4] ss:$28 sps:$4 sm:$0xff]  }
 0x20f   :  { %3316 = vmatprep.subr.bf16.mxu0 %v8590_v44  ;;  %3480 = vmatprep.subr.bf16.mxu1 %v8593_v45  ;;  %v8649_v42 = vld [vmem:[#allocation8 + $0x558] ss:$28 sps:$4 sm:$0xff]   ;;  %v8646_v44 = vld [vmem:[#allocation8 + $0x1d0] ss:$28 sps:$4 sm:$0xff]  }
 0x210   :  { %v8650_v45 = vld [vmem:[#allocation8 + $0x398] ss:$28 sps:$4 sm:$0xff]  }
 0x212   :  { %3317 = vmatpush1.bf16.msra.mxu0 %v8588_v46  ;;  %3481 = vmatpush1.bf16.msra.mxu1 %v8591_v48  ;;  %v8653_v46 = vld [vmem:[#allocation8 + $0x20c] ss:$28 sps:$4 sm:$0xff]  }
 0x213   :  { %3318 = vmatprep.subr.bf16.mxu0 %v8596_v49  ;;  %3482 = vmatprep.subr.bf16.mxu1 %v8599_v1  ;;  %v8651_v48 = vld [vmem:[#allocation8 + $0x208] ss:$28 sps:$4 sm:$0xff]   ;;  %v8655_v49 = vld [vmem:[#allocation8 + $0x3d0] ss:$28 sps:$4 sm:$0xff]  }
 0x214   :  { %v8658_v1 = vld [vmem:[#allocation8 + $0x244] ss:$28 sps:$4 sm:$0xff]  }
 0x216   :  { %3319 = vmatpush1.bf16.msra.mxu0 %v8594_v51  ;;  %3483 = vmatpush1.bf16.msra.mxu1 %v8597_v3  ;;  %v8656_v51 = vld [vmem:[#allocation8 + $0x240] ss:$28 sps:$4 sm:$0xff]   ;;  %v8660_v3 = vld [vmem:[#allocation8 + $0x408] ss:$28 sps:$4 sm:$0xff]  }
 0x217   :  { %3320 = vmatprep.subr.bf16.mxu0 %v8602_v52  ;;  %3484 = vmatprep.subr.bf16.mxu1 %v8605_v54  ;;  %v8663_v52 = vld [vmem:[#allocation8 + $0x27c] ss:$28 sps:$4 sm:$0xff]  }
 0x218   :  { %v8664_v54 = vld [vmem:[#allocation8 + $0x600] ss:$28 sps:$4 sm:$0xff]  }
 0x21a   :  { %3321 = vmatpush1.bf16.msra.mxu0 %v8600_v58  ;;  %3485 = vmatpush1.bf16.msra.mxu1 %v8603_v56  ;;  %v8665_v58 = vld [vmem:[#allocation8 + $0x440] ss:$28 sps:$4 sm:$0xff]   ;;  %v8668_v56 = vld [vmem:[#allocation8 + $0x2b4] ss:$28 sps:$4 sm:$0xff]  }
 0x21b   :  { %3511 = vmatprep.subr.bf16.mxu0 %v8608_v60  ;;  %7883 = vmatprep.subr.bf16.mxu1 %v8609_v61  ;;  %v8669_v60 = vld [vmem:[#allocation8 + $0x638] ss:$28 sps:$4 sm:$0xff]   ;;  %v8666_v61 = vld [vmem:[#allocation8 + $0x2b0] ss:$28 sps:$4 sm:$0xff]  }
 0x21d   :  { %3339 = vmatmul.mubr.bf16.vlgmr.msra.gmra.mrb[8].mxu0 %v9835_v63  ;;  %3503 = vmatmul.mubr.bf16.vlgmr.msra.gmra.mrb[8].mxu1 %v9835_v63 }
 0x21e   :  { %3512 = vmatpush1.bf16.msra.mxu0 %v8606_v62  ;;  %3543 = vmatprep.mubr.bf16.mxu0 %v9773_v18  ;;  %v8670_v62 = vld [vmem:[#allocation8 + $0x478] ss:$28 sps:$4 sm:$0xff]  }
 0x21f   :  { %7884 = vmatpush3.bf16.msra.mxu1 %v8610_v12  ;;  %3707 = vmatprep.mubr.bf16.mxu1 %v9773_v18  ;;  %v8626_v18 = vld [vmem:[#allocation8 + $0xf0] ss:$28 sps:$4 sm:$0xff]  }
 0x220   :  { %3513 = vmatprep.subr.bf16.mxu0 %v8613_v5  ;;  %7885 = vmatprep.subr.bf16.mxu1 %v8614_v6  ;;  %v8673_v12 = vld [vmem:[#allocation8 + $0x2ec] ss:$28 sps:$4 sm:$0xff]  }
 0x221   :  { %v8674_v5 = vld [vmem:[#allocation8 + $0x670] ss:$28 sps:$4 sm:$0xff]   ;;  %v8671_v6 = vld [vmem:[#allocation8 + $0x2e8] ss:$28 sps:$4 sm:$0xff]  }
 0x222   :  { %3514 = vmatpush1.bf16.msra.mxu0 %v8611_v7  ;;  %v8675_v7 = vld [vmem:[#allocation8 + $0x4b0] ss:$28 sps:$4 sm:$0xff]  }
 0x223   :  { %7886 = vmatpush3.bf16.msra.mxu1 %v8615_v8  ;;  %3515 = vmatprep.subr.bf16.mxu0 %v8618_v9  ;;  %v8678_v8 = vld [vmem:[#allocation8 + $0x324] ss:$28 sps:$4 sm:$0xff]  }
 0x224   :  { %7887 = vmatprep.subr.bf16.mxu1 %v8619_v10  ;;  %v8679_v9 = vld [vmem:[#allocation8 + $0x6a8] ss:$28 sps:$4 sm:$0xff]   ;;  %v8676_v10 = vld [vmem:[#allocation8 + $0x320] ss:$28 sps:$4 sm:$0xff]  }
 0x226   :  { %3516 = vmatpush1.bf16.msra.mxu0 %v8616_v11  ;;  %v8680_v11 = vld [vmem:[#allocation8 + $0x4e8] ss:$28 sps:$4 sm:$0xff]  }
 0x227   :  { %7888 = vmatpush3.bf16.msra.mxu1 %v8620_v13  ;;  %3517 = vmatprep.subr.bf16.mxu0 %v8623_v14  ;;  %v8683_v13 = vld [vmem:[#allocation8 + $0x35c] ss:$28 sps:$4 sm:$0xff]  }
 0x228   :  { %7889 = vmatprep.subr.bf16.mxu1 %v8624_v15  ;;  %v8684_v14 = vld [vmem:[#allocation8 + $0x6e0] ss:$28 sps:$4 sm:$0xff]   ;;  %v8681_v15 = vld [vmem:[#allocation8 + $0x358] ss:$28 sps:$4 sm:$0xff]  }
 0x22a   :  { %3518 = vmatpush1.bf16.msra.mxu0 %v8621_v16  ;;  %v8685_v16 = vld [vmem:[#allocation8 + $0x520] ss:$28 sps:$4 sm:$0xff]  }
 0x22b   :  { %7890 = vmatpush3.bf16.msra.mxu1 %v8625_v20  ;;  %3519 = vmatprep.subr.bf16.mxu0 %v8628_v55  ;;  %v8688_v20 = vld [vmem:[#allocation8 + $0x394] ss:$28 sps:$4 sm:$0xff]  }
 0x22c   :  { %7891 = vmatprep.subr.bf16.mxu1 %v8629_v22  ;;  %v8689_v55 = vld [vmem:[#allocation8 + $0x8d8] ss:$28 sps:$4 sm:$0xff]   ;;  %v8686_v22 = vld [vmem:[#allocation8 + $0x390] ss:$28 sps:$4 sm:$0xff]  }
 0x22e   :  { %3520 = vmatpush1.bf16.msra.mxu0 %v8626_v18  ;;  %v8690_v18 = vld [vmem:[#allocation8 + $0x718] ss:$28 sps:$4 sm:$0xff]  }
 0x22f   :  { %7892 = vmatpush3.bf16.msra.mxu1 %v8630_v23  ;;  %3521 = vmatprep.subr.bf16.mxu0 %v8633_v24  ;;  %v8693_v23 = vld [vmem:[#allocation8 + $0x3cc] ss:$28 sps:$4 sm:$0xff]  }
 0x230   :  { %7893 = vmatprep.subr.bf16.mxu1 %v8634_v25  ;;  %v8694_v24 = vld [vmem:[#allocation8 + $0x910] ss:$28 sps:$4 sm:$0xff]   ;;  %v8691_v25 = vld [vmem:[#allocation8 + $0x3c8] ss:$28 sps:$4 sm:$0xff]  }
 0x232   :  { %3522 = vmatpush1.bf16.msra.mxu0 %v8631_v26  ;;  %v8695_v26 = vld [vmem:[#allocation8 + $0x750] ss:$28 sps:$4 sm:$0xff]  }
 0x233   :  { %7894 = vmatpush3.bf16.msra.mxu1 %v8635_v28  ;;  %3523 = vmatprep.subr.bf16.mxu0 %v8638_v29  ;;  %v8698_v28 = vld [vmem:[#allocation8 + $0x404] ss:$28 sps:$4 sm:$0xff]  }
 0x234   :  { %7895 = vmatprep.subr.bf16.mxu1 %v8639_v31  ;;  %v8699_v29 = vld [vmem:[#allocation8 + $0x948] ss:$28 sps:$4 sm:$0xff]   ;;  %v8696_v31 = vld [vmem:[#allocation8 + $0x400] ss:$28 sps:$4 sm:$0xff]  }
 0x236   :  { %3524 = vmatpush1.bf16.msra.mxu0 %v8636_v32  ;;  %v8703_v32 = vld [vmem:[#allocation8 + $0x43c] ss:$28 sps:$4 sm:$0xff]  }
 0x237   :  { %7896 = vmatpush3.bf16.msra.mxu1 %v8640_v33  ;;  %3525 = vmatprep.subr.bf16.mxu0 %v8643_v35  ;;  %v8704_v33 = vld [vmem:[#allocation8 + $0x980] ss:$28 sps:$4 sm:$0xff]   ;;  %v8701_v35 = vld [vmem:[#allocation8 + $0x438] ss:$28 sps:$4 sm:$0xff]  }
 0x238   :  { %7897 = vmatprep.subr.bf16.mxu1 %v8644_v36  ;;  %v8708_v36 = vld [vmem:[#allocation8 + $0x474] ss:$28 sps:$4 sm:$0xff]  }
 0x23a   :  { %3526 = vmatpush1.bf16.msra.mxu0 %v8641_v38  ;;  %v8709_v38 = vld [vmem:[#allocation8 + $0x9b8] ss:$28 sps:$4 sm:$0xff]  }
 0x23b   :  { %7898 = vmatpush3.bf16.msra.mxu1 %v8645_v39  ;;  %3527 = vmatprep.subr.bf16.mxu0 %v8648_v41  ;;  %v8706_v39 = vld [vmem:[#allocation8 + $0x470] ss:$28 sps:$4 sm:$0xff]   ;;  %v8710_v41 = vld [vmem:[#allocation8 + $0x7f8] ss:$28 sps:$4 sm:$0xff]  }
 0x23c   :  { %7905 = vmatprep.subr.bf16.mxu1 %v8649_v42  ;;  %v8713_v42 = vld [vmem:[#allocation8 + $0x4ac] ss:$28 sps:$4 sm:$0xff]  }
 0x23e   :  { %3708 = vmatmul.mubr.bf16.vlgmr.msra.gmra.mrb[12].mxu1 %v9775_v19  ;;  %3528 = vmatpush1.bf16.msra.mxu0 %v8646_v44  ;;  %v8714_v44 = vld [vmem:[#allocation8 + $0x9f0] ss:$28 sps:$4 sm:$0xff]  }
 0x23f   :  { %7906 = vmatpush3.bf16.msra.mxu1 %v8650_v45  ;;  %3747 = vmatprep.mubr.bf16.mxu1 %v9785_v37  ;;  %v8711_v45 = vld [vmem:[#allocation8 + $0x4a8] ss:$28 sps:$4 sm:$0xff]  }
 0x240   :  { %3529 = vmatprep.subr.bf16.mxu0 %v8653_v46  ;;  %7907 = vmatprep.subr.bf16.mxu1 %v8654_v47  ;;  %v8715_v46 = vld [vmem:[#allocation8 + $0x830] ss:$28 sps:$4 sm:$0xff]   ;;  %v8718_v47 = vld [vmem:[#allocation8 + $0x4e4] ss:$28 sps:$4 sm:$0xff]  }
 0x242   :  { %3530 = vmatpush1.bf16.msra.mxu0 %v8651_v48  ;;  %v8719_v48 = vld [vmem:[#allocation8 + $0xa28] ss:$28 sps:$4 sm:$0xff]  }
 0x243   :  { %7908 = vmatpush3.bf16.msra.mxu1 %v8655_v49  ;;  %3531 = vmatprep.subr.bf16.mxu0 %v8658_v1  ;;  %v8716_v49 = vld [vmem:[#allocation8 + $0x4e0] ss:$28 sps:$4 sm:$0xff]   ;;  %v8720_v1 = vld [vmem:[#allocation8 + $0x868] ss:$28 sps:$4 sm:$0xff]  }
 0x244   :  { %7909 = vmatprep.subr.bf16.mxu1 %v8659_v50  ;;  %v8723_v50 = vld [vmem:[#allocation8 + $0x51c] ss:$28 sps:$4 sm:$0xff]  }
 0x246   :  { %3532 = vmatpush1.bf16.msra.mxu0 %v8656_v51  ;;  %v8724_v51 = vld [vmem:[#allocation8 + $0xa60] ss:$28 sps:$4 sm:$0xff]  }
 0x247   :  { %7910 = vmatpush3.bf16.msra.mxu1 %v8660_v3  ;;  %3533 = vmatprep.subr.bf16.mxu0 %v8663_v52  ;;  %v8721_v3 = vld [vmem:[#allocation8 + $0x518] ss:$28 sps:$4 sm:$0xff]   ;;  %v8725_v52 = vld [vmem:[#allocation8 + $0x8a0] ss:$28 sps:$4 sm:$0xff]  }
 0x248   :  { %7911 = vmatprep.subr.bf16.mxu1 %v8664_v54  ;;  %v8728_v54 = vld [vmem:[#allocation8 + $0x554] ss:$28 sps:$4 sm:$0xff]  }
 0x24a   :  { %3534 = vmatpush1.bf16.msra.mxu0 %v8661_v57  ;;  %v8726_v57 = vld [vmem:[#allocation8 + $0x550] ss:$28 sps:$4 sm:$0xff]  }
 0x24b   :  { %7912 = vmatpush3.bf16.msra.mxu1 %v8665_v58  ;;  %3535 = vmatprep.subr.bf16.mxu0 %v8668_v56  ;;  %v8729_v58 = vld [vmem:[#allocation8 + $0xa98] ss:$28 sps:$4 sm:$0xff]   ;;  %v8732_v56 = vld [vmem:[#allocation8 + $0x58c] ss:$28 sps:$4 sm:$0xff]  }
 0x24c   :  { %7913 = vmatprep.subr.bf16.mxu1 %v8669_v60  ;;  %v8730_v60 = vld [vmem:[#allocation8 + $0x588] ss:$28 sps:$4 sm:$0xff]  }
 0x24e   :  { %3536 = vmatpush1.bf16.msra.mxu0 %v8666_v61  ;;  %v8733_v61 = vld [vmem:[#allocation8 + $0xad0] ss:$28 sps:$4 sm:$0xff]  }
 0x24f   :  { %7914 = vmatpush3.bf16.msra.mxu1 %v8670_v62  ;;  %3537 = vmatprep.subr.bf16.mxu0 %v8673_v12  ;;  %v8736_v62 = vld [vmem:[#allocation8 + $0x5c4] ss:$28 sps:$4 sm:$0xff]  }
 0x250   :  { %7915 = vmatprep.subr.bf16.mxu1 %v8674_v5  ;;  %v8734_v12 = vld [vmem:[#allocation8 + $0x5c0] ss:$28 sps:$4 sm:$0xff]   ;;  %v8737_v5 = vld [vmem:[#allocation8 + $0xb08] ss:$28 sps:$4 sm:$0xff]  }
 0x252   :  { %3538 = vmatpush1.bf16.msra.mxu0 %v8671_v6  ;;  %v8740_v6 = vld [vmem:[#allocation8 + $0x5fc] ss:$28 sps:$4 sm:$0xff]  }
 0x253   :  { %7916 = vmatpush3.bf16.msra.mxu1 %v8675_v7  ;;  %3539 = vmatprep.subr.bf16.mxu0 %v8678_v8  ;;  %v8738_v7 = vld [vmem:[#allocation8 + $0x5f8] ss:$28 sps:$4 sm:$0xff]   ;;  %v8741_v8 = vld [vmem:[#allocation8 + $0xb40] ss:$28 sps:$4 sm:$0xff]  }
 0x254   :  { %7917 = vmatprep.subr.bf16.mxu1 %v8679_v9  ;;  %v8744_v9 = vld [vmem:[#allocation8 + $0x634] ss:$28 sps:$4 sm:$0xff]  }
 0x256   :  { %3540 = vmatpush1.bf16.msra.mxu0 %v8676_v10  ;;  %v8742_v10 = vld [vmem:[#allocation8 + $0x630] ss:$28 sps:$4 sm:$0xff]  }
 0x257   :  { %7918 = vmatpush3.bf16.msra.mxu1 %v8680_v11  ;;  %3541 = vmatprep.subr.bf16.mxu0 %v8683_v13  ;;  %v8745_v11 = vld [vmem:[#allocation8 + $0xb78] ss:$28 sps:$4 sm:$0xff]   ;;  %v8748_v13 = vld [vmem:[#allocation8 + $0x66c] ss:$28 sps:$4 sm:$0xff]  }
 0x258   :  { %7919 = vmatprep.subr.bf16.mxu1 %v8684_v14  ;;  %v8746_v14 = vld [vmem:[#allocation8 + $0x668] ss:$28 sps:$4 sm:$0xff]  }
 0x25a   :  { %3542 = vmatpush1.bf16.msra.mxu0 %v8681_v15  ;;  %v8749_v15 = vld [vmem:[#allocation8 + $0xbb0] ss:$28 sps:$4 sm:$0xff]  }
 0x25b   :  { %7920 = vmatpush3.bf16.msra.mxu1 %v8685_v16  ;;  %3552 = vmatprep.subr.bf16.mxu0 %v8688_v20  ;;  %v8752_v16 = vld [vmem:[#allocation8 + $0x6a4] ss:$28 sps:$4 sm:$0xff]  }
 0x25c   :  { %7927 = vmatprep.subr.bf16.mxu1 %v8689_v55  ;;  %v8750_v20 = vld [vmem:[#allocation8 + $0x6a0] ss:$28 sps:$4 sm:$0xff]   ;;  %v8753_v55 = vld [vmem:[#allocation8 + $0xbe8] ss:$28 sps:$4 sm:$0xff]  }
 0x25d   :  { %3544 = vmatmul.mubr.bf16.vlgmr.msra.gmra.mrb[12].mxu0 %v9775_v19  ;;  %v8700_v19 = vld [vmem:[#allocation8 + $0x788] ss:$28 sps:$4 sm:$0xff]  }
 0x25e   :  { %3748 = vmatmul.mubr.bf16.vlgmr.msra.gmra.mrb[16].mxu1 %v9807_v53  ;;  %3553 = vmatpush1.bf16.msra.mxu0 %v8686_v22  ;;  %v8756_v22 = vld [vmem:[#allocation8 + $0x6dc] ss:$28 sps:$4 sm:$0xff]  }
 0x25f   :  { %3584 = vmatprep.mubr.bf16.mxu0 %v9785_v37  ;;  %7928 = vmatpush3.bf16.msra.mxu1 %v8690_v18  ;;  %v8705_v37 = vld [vmem:[#allocation8 + $0x7c0] ss:$28 sps:$4 sm:$0xff]   ;;  %v8754_v18 = vld [vmem:[#allocation8 + $0x6d8] ss:$28 sps:$4 sm:$0xff]  }
 0x260   :  { %3787 = vmatprep.mubr.bf16.mxu1 %v9809_v59  ;;  %3554 = vmatprep.subr.bf16.mxu0 %v8693_v23  ;;  %v8757_v23 = vld [vmem:[#allocation8 + $0xc20] ss:$28 sps:$4 sm:$0xff]  }
 0x261   :  { %7929 = vmatprep.subr.bf16.mxu1 %v8694_v24  ;;  %v8760_v24 = vld [vmem:[#allocation8 + $0x714] ss:$28 sps:$4 sm:$0xff]  }
 0x262   :  { %3555 = vmatpush1.bf16.msra.mxu0 %v8691_v25  ;;  %v8781_v25 = vld [vmem:[#allocation11 + $0x4] ss:$28 sps:$4 sm:$0xff]  }
 0x263   :  { %7930 = vmatpush3.bf16.msra.mxu1 %v8695_v26  ;;  %3556 = vmatprep.subr.bf16.mxu0 %v8698_v28  ;;  %v8758_v26 = vld [vmem:[#allocation8 + $0x710] ss:$28 sps:$4 sm:$0xff]  }
 0x264   :  { %7931 = vmatprep.subr.bf16.mxu1 %v8699_v29  ;;  %v8763_v28 = vld [vmem:[#allocation8 + $0x74c] ss:$28 sps:$4 sm:$0xff]  }
 0x265   :  { %v8779_v29 = vld [vmem:[#allocation11] ss:$28 sps:$4 sm:$0xff]  }
 0x266   :  { %3557 = vmatpush1.bf16.msra.mxu0 %v8696_v31  ;;  %v8787_v31 = vld [vmem:[#allocation11 + $0x3c] ss:$28 sps:$4 sm:$0xff]  }
 0x267   :  { %7932 = vmatpush3.bf16.msra.mxu1 %v8700_v19  ;;  %3558 = vmatprep.subr.bf16.mxu0 %v8703_v32  ;;  %v8761_v19 = vld [vmem:[#allocation8 + $0x748] ss:$28 sps:$4 sm:$0xff]  }
 0x268   :  { %7933 = vmatprep.subr.bf16.mxu1 %v8704_v33  ;;  %v8766_v32 = vld [vmem:[#allocation8 + $0x784] ss:$28 sps:$4 sm:$0xff]  }
 0x269   :  { %v8785_v33 = vld [vmem:[#allocation11 + $0x38] ss:$28 sps:$4 sm:$0xff]  }
 0x26a   :  { %3559 = vmatpush1.bf16.msra.mxu0 %v8701_v35  ;;  %v8793_v35 = vld [vmem:[#allocation11 + $0x74] ss:$28 sps:$4 sm:$0xff]  }
 0x26b   :  { %7934 = vmatpush3.bf16.msra.mxu1 %v8705_v37  ;;  %3560 = vmatprep.subr.bf16.mxu0 %v8708_v36  ;;  %v8764_v37 = vld [vmem:[#allocation8 + $0x780] ss:$28 sps:$4 sm:$0xff]  }
 0x26c   :  { %7935 = vmatprep.subr.bf16.mxu1 %v8709_v38  ;;  %v8769_v36 = vld [vmem:[#allocation8 + $0x7bc] ss:$28 sps:$4 sm:$0xff]  }
 0x26d   :  { %v8791_v38 = vld [vmem:[#allocation11 + $0x70] ss:$28 sps:$4 sm:$0xff]  }
 0x26e   :  { %3561 = vmatpush1.bf16.msra.mxu0 %v8706_v39  ;;  %v8767_v39 = vld [vmem:[#allocation8 + $0x7b8] ss:$28 sps:$4 sm:$0xff]  }
 0x26f   :  { %7936 = vmatpush3.bf16.msra.mxu1 %v8710_v41  ;;  %3562 = vmatprep.subr.bf16.mxu0 %v8713_v42  ;;  %v8772_v41 = vld [vmem:[#allocation8 + $0x7f4] ss:$28 sps:$4 sm:$0xff]   ;;  %v8805_v42 = vld [vmem:[#allocation11 + $0xe4] ss:$28 sps:$4 sm:$0xff]  }
 0x270   :  { %7937 = vmatprep.subr.bf16.mxu1 %v8714_v44  ;;  %v8770_v44 = vld [vmem:[#allocation8 + $0x7f0] ss:$28 sps:$4 sm:$0xff]  }
 0x272   :  { %3563 = vmatpush1.bf16.msra.mxu0 %v8711_v45  ;;  %v8775_v45 = vld [vmem:[#allocation8 + $0x82c] ss:$28 sps:$4 sm:$0xff]  }
 0x273   :  { %7938 = vmatpush3.bf16.msra.mxu1 %v8715_v46  ;;  %3564 = vmatprep.subr.bf16.mxu0 %v8718_v47  ;;  %v8803_v46 = vld [vmem:[#allocation11 + $0xe0] ss:$28 sps:$4 sm:$0xff]  }
 0x274   :  { %7939 = vmatprep.subr.bf16.mxu1 %v8719_v48  ;;  %v8811_v47 = vld [vmem:[#allocation11 + $0x11c] ss:$28 sps:$4 sm:$0xff]  }
 0x275   :  { %v8773_v48 = vld [vmem:[#allocation8 + $0x828] ss:$28 sps:$4 sm:$0xff]  }
 0x276   :  { %3565 = vmatpush1.bf16.msra.mxu0 %v8716_v49  ;;  %v8778_v49 = vld [vmem:[#allocation8 + $0x864] ss:$28 sps:$4 sm:$0xff]  }
 0x277   :  { %7940 = vmatpush3.bf16.msra.mxu1 %v8720_v1  ;;  %3566 = vmatprep.subr.bf16.mxu0 %v8723_v50  ;;  %v8809_v1 = vld [vmem:[#allocation11 + $0x118] ss:$28 sps:$4 sm:$0xff]  }
 0x278   :  { %7941 = vmatprep.subr.bf16.mxu1 %v8724_v51  ;;  %v8817_v50 = vld [vmem:[#allocation11 + $0x154] ss:$28 sps:$4 sm:$0xff]  }
 0x279   :  { %v8776_v51 = vld [vmem:[#allocation8 + $0x860] ss:$28 sps:$4 sm:$0xff]  }
 0x27a   :  { %3567 = vmatpush1.bf16.msra.mxu0 %v8721_v3  ;;  %v8784_v3 = vld [vmem:[#allocation8 + $0x89c] ss:$28 sps:$4 sm:$0xff]  }
 0x27b   :  { %7942 = vmatpush3.bf16.msra.mxu1 %v8725_v52  ;;  %3568 = vmatprep.subr.bf16.mxu0 %v8728_v54  ;;  %v8815_v52 = vld [vmem:[#allocation11 + $0x150] ss:$28 sps:$4 sm:$0xff]  }
 0x27c   :  { %8053 = vmatprep.subr.bf16.mxu1 %v9601_v43  ;;  %v8823_v54 = vld [vmem:[#allocation11 + $0x18c] ss:$28 sps:$4 sm:$0xff]  }
 0x27e   :  { %3788 = vmatmul.mubr.bf16.vlgmr.msra.gmra.mrb[20].mxu1 %v9823_v21  ;;  %3569 = vmatpush1.bf16.msra.mxu0 %v8726_v57  ;;  %v8782_v57 = vld [vmem:[#allocation8 + $0x898] ss:$28 sps:$4 sm:$0xff]  }
 0x27f   :  { %8054 = vmatpush3.bf16.msra.mxu1 %v8729_v58  ;;  %3570 = vmatprep.subr.bf16.mxu0 %v8732_v56  ;;  %v8790_v58 = vld [vmem:[#allocation8 + $0x8d4] ss:$28 sps:$4 sm:$0xff]  }
 0x280   :  { %8055 = vmatprep.subr.bf16.mxu1 %v9601_v43  ;;  %8069 = vmatprep.mubr.msk.bf16.mxu1 %vm9602_vm0, %v9601_v43  ;;  %v8821_v56 = vld [vmem:[#allocation11 + $0x188] ss:$28 sps:$4 sm:$0xff]  }
 0x282   :  { %3571 = vmatpush1.bf16.msra.mxu0 %v8730_v60  ;;  %v8829_v60 = vld [vmem:[#allocation11 + $0x1c4] ss:$28 sps:$4 sm:$0xff]  }
 0x283   :  { %8056 = vmatpush3.bf16.msra.mxu1 %v8733_v61  ;;  %3572 = vmatprep.subr.bf16.mxu0 %v8736_v62  ;;  %v8788_v61 = vld [vmem:[#allocation8 + $0x8d0] ss:$28 sps:$4 sm:$0xff]  }
 0x284   :  { %8057 = vmatprep.subr.bf16.mxu1 %v9601_v43  ;;  %v8796_v62 = vld [vmem:[#allocation8 + $0x90c] ss:$28 sps:$4 sm:$0xff]  }
 0x286   :  { %3573 = vmatpush1.bf16.msra.mxu0 %v8734_v12  ;;  %v8827_v12 = vld [vmem:[#allocation11 + $0x1c0] ss:$28 sps:$4 sm:$0xff]  }
 0x287   :  { %8058 = vmatpush3.bf16.msra.mxu1 %v8737_v5  ;;  %3574 = vmatprep.subr.bf16.mxu0 %v8740_v6  ;;  %v8835_v5 = vld [vmem:[#allocation11 + $0x1fc] ss:$28 sps:$4 sm:$0xff]  }
 0x288   :  { %8059 = vmatprep.subr.bf16.mxu1 %v9601_v43  ;;  %v8794_v6 = vld [vmem:[#allocation8 + $0x908] ss:$28 sps:$4 sm:$0xff]  }
 0x28a   :  { %3575 = vmatpush1.bf16.msra.mxu0 %v8738_v7  ;;  %v8802_v7 = vld [vmem:[#allocation8 + $0x944] ss:$28 sps:$4 sm:$0xff]  }
 0x28b   :  { %8060 = vmatpush3.bf16.msra.mxu1 %v8741_v8  ;;  %3576 = vmatprep.subr.bf16.mxu0 %v8744_v9  ;;  %v8833_v8 = vld [vmem:[#allocation11 + $0x1f8] ss:$28 sps:$4 sm:$0xff]  }
 0x28c   :  { %8061 = vmatprep.subr.bf16.mxu1 %v9601_v43  ;;  %v8841_v9 = vld [vmem:[#allocation11 + $0x234] ss:$28 sps:$4 sm:$0xff]  }
 0x28e   :  { %3577 = vmatpush1.bf16.msra.mxu0 %v8742_v10  ;;  %v8800_v10 = vld [vmem:[#allocation8 + $0x940] ss:$28 sps:$4 sm:$0xff]  }
 0x28f   :  { %8062 = vmatpush3.bf16.msra.mxu1 %v8745_v11  ;;  %3578 = vmatprep.subr.bf16.mxu0 %v8748_v13  ;;  %v8808_v11 = vld [vmem:[#allocation8 + $0x97c] ss:$28 sps:$4 sm:$0xff]  }
 0x290   :  { %8063 = vmatprep.subr.bf16.mxu1 %v9601_v43  ;;  %v8839_v13 = vld [vmem:[#allocation11 + $0x230] ss:$28 sps:$4 sm:$0xff]  }
 0x292   :  { %3579 = vmatpush1.bf16.msra.mxu0 %v8746_v14  ;;  %v8847_v14 = vld [vmem:[#allocation11 + $0x26c] ss:$28 sps:$4 sm:$0xff]  }
 0x293   :  { %8064 = vmatpush3.bf16.msra.mxu1 %v8749_v15  ;;  %3580 = vmatprep.subr.bf16.mxu0 %v8752_v16  ;;  %v8806_v15 = vld [vmem:[#allocation8 + $0x978] ss:$28 sps:$4 sm:$0xff]  }
 0x294   :  { %8065 = vmatprep.subr.bf16.mxu1 %v9601_v43  ;;  %v8814_v16 = vld [vmem:[#allocation8 + $0x9b4] ss:$28 sps:$4 sm:$0xff]  }
 0x296   :  { %3581 = vmatpush1.bf16.msra.mxu0 %v8750_v20  ;;  %v8845_v20 = vld [vmem:[#allocation11 + $0x268] ss:$28 sps:$4 sm:$0xff]  }
 0x297   :  { %8066 = vmatpush3.bf16.msra.mxu1 %v8753_v55  ;;  %3582 = vmatprep.subr.bf16.mxu0 %v8756_v22  ;;  %v8853_v55 = vld [vmem:[#allocation11 + $0x2a4] ss:$28 sps:$4 sm:$0xff]  }
 0x298   :  { %8067 = vmatprep.subr.bf16.mxu1 %v9601_v43  ;;  %v8812_v22 = vld [vmem:[#allocation8 + $0x9b0] ss:$28 sps:$4 sm:$0xff]  }
 0x29a   :  { %3583 = vmatpush1.bf16.msra.mxu0 %v8754_v18  ;;  %v8820_v18 = vld [vmem:[#allocation8 + $0x9ec] ss:$28 sps:$4 sm:$0xff]  }
 0x29b   :  { %8068 = vmatpush3.bf16.msra.mxu1 %v8757_v23  ;;  %3593 = vmatprep.subr.bf16.mxu0 %v8760_v24  ;;  %v8851_v23 = vld [vmem:[#allocation11 + $0x2a0] ss:$28 sps:$4 sm:$0xff]  }
 0x29c   :  { %6350 = vmatprep.subr.bf16.mxu1 %v8781_v25  ;;  %v8859_v24 = vld [vmem:[#allocation11 + $0x2dc] ss:$28 sps:$4 sm:$0xff]  }
 0x29d   :  { %3585 = vmatmul.mubr.bf16.vlgmr.msra.gmra.mrb[12].mxu0 %v9807_v53  ;;  %v8799_v53 = vld [vmem:[#allocation11 + $0xac] ss:$28 sps:$4 sm:$0xff]   ;;  %v8818_v25 = vld [vmem:[#allocation8 + $0x9e8] ss:$28 sps:$4 sm:$0xff]  }
 0x29e   :  { %8070 = vmatmul.mubr.bf16.vlgmr.msra.gmra.mrb[24].mxu1 %v9835_v63  ;;  %3594 = vmatpush1.bf16.msra.mxu0 %v8758_v26  ;;  %v8826_v26 = vld [vmem:[#allocation8 + $0xa24] ss:$28 sps:$4 sm:$0xff]  }
 0x29f   :  { %3625 = vmatprep.mubr.bf16.mxu0 %v9809_v59  ;;  %3595 = vmatprep.subr.bf16.mxu0 %v8763_v28  ;;  %v8797_v59 = vld [vmem:[#allocation11 + $0xa8] ss:$28 sps:$4 sm:$0xff]   ;;  %v8857_v28 = vld [vmem:[#allocation11 + $0x2d8] ss:$28 sps:$4 sm:$0xff]  }
 0x2a0   :  { %6351 = vmatpush1.bf16.msra.mxu1 %v8779_v29  ;;  %v8865_v29 = vld [vmem:[#allocation11 + $0x314] ss:$28 sps:$4 sm:$0xff]  }
 0x2a1   :  { %6352 = vmatprep.subr.bf16.mxu1 %v8787_v31  ;;  %v8824_v31 = vld [vmem:[#allocation8 + $0xa20] ss:$28 sps:$4 sm:$0xff]  }
 0x2a2   :  { %3596 = vmatpush1.bf16.msra.mxu0 %v8761_v19  ;;  %v8832_v19 = vld [vmem:[#allocation8 + $0xa5c] ss:$28 sps:$4 sm:$0xff]  }
 0x2a3   :  { %3597 = vmatprep.subr.bf16.mxu0 %v8766_v32  ;;  %v8863_v32 = vld [vmem:[#allocation11 + $0x310] ss:$28 sps:$4 sm:$0xff]  }
 0x2a4   :  { %6353 = vmatpush1.bf16.msra.mxu1 %v8785_v33  ;;  %v8871_v33 = vld [vmem:[#allocation11 + $0x34c] ss:$28 sps:$4 sm:$0xff]  }
 0x2a5   :  { %6354 = vmatprep.subr.bf16.mxu1 %v8793_v35  ;;  %v8830_v35 = vld [vmem:[#allocation8 + $0xa58] ss:$28 sps:$4 sm:$0xff]  }
 0x2a6   :  { %3598 = vmatpush1.bf16.msra.mxu0 %v8764_v37  ;;  %v8838_v37 = vld [vmem:[#allocation8 + $0xa94] ss:$28 sps:$4 sm:$0xff]  }
 0x2a7   :  { %3599 = vmatprep.subr.bf16.mxu0 %v8769_v36  ;;  %v8869_v36 = vld [vmem:[#allocation11 + $0x348] ss:$28 sps:$4 sm:$0xff]  }
 0x2a8   :  { %6355 = vmatpush1.bf16.msra.mxu1 %v8791_v38  ;;  %v8877_v38 = vld [vmem:[#allocation11 + $0x384] ss:$28 sps:$4 sm:$0xff]  }
 0x2a9   :  { %6356 = vmatprep.subr.bf16.mxu1 %v8799_v53  ;;  %v8836_v53 = vld [vmem:[#allocation8 + $0xa90] ss:$28 sps:$4 sm:$0xff]  }
 0x2aa   :  { %3600 = vmatpush1.bf16.msra.mxu0 %v8767_v39  ;;  %v8844_v39 = vld [vmem:[#allocation8 + $0xacc] ss:$28 sps:$4 sm:$0xff]  }
 0x2ab   :  { %3601 = vmatprep.subr.bf16.mxu0 %v8772_v41  ;;  %v8842_v41 = vld [vmem:[#allocation8 + $0xac8] ss:$28 sps:$4 sm:$0xff]  }
 0x2ac   :  { %6357 = vmatpush1.bf16.msra.mxu1 %v8797_v59  ;;  %v8850_v59 = vld [vmem:[#allocation8 + $0xb04] ss:$28 sps:$4 sm:$0xff]  }
 0x2ad   :  { %6358 = vmatprep.subr.bf16.mxu1 %v8805_v42  ;;  %v8848_v42 = vld [vmem:[#allocation8 + $0xb00] ss:$28 sps:$4 sm:$0xff]  }
 0x2ae   :  { %3602 = vmatpush1.bf16.msra.mxu0 %v8770_v44  ;;  %v8856_v44 = vld [vmem:[#allocation8 + $0xb3c] ss:$28 sps:$4 sm:$0xff]  }
 0x2af   :  { %3603 = vmatprep.subr.bf16.mxu0 %v8775_v45  ;;  %v8854_v45 = vld [vmem:[#allocation8 + $0xb38] ss:$28 sps:$4 sm:$0xff]  }
 0x2b0   :  { %6359 = vmatpush1.bf16.msra.mxu1 %v8803_v46  ;;  %v8862_v46 = vld [vmem:[#allocation8 + $0xb74] ss:$28 sps:$4 sm:$0xff]  }
 0x2b1   :  { %6360 = vmatprep.subr.bf16.mxu1 %v8811_v47  ;;  %v8860_v47 = vld [vmem:[#allocation8 + $0xb70] ss:$28 sps:$4 sm:$0xff]  }
 0x2b2   :  { %3604 = vmatpush1.bf16.msra.mxu0 %v8773_v48  ;;  %v9863_v48 = vld [vmem:[#allocation10] sm:$0xff] }
 0x2b3   :  { %3605 = vmatprep.subr.bf16.mxu0 %v8778_v49  ;;  %v1135_v49 = vrot.slane %v9863_v48, %v9759_v2 }
 0x2b4   :  { %6361 = vmatpush1.bf16.msra.mxu1 %v8809_v1  ;;  %v1139_v1 = vrot.slane %v9863_v48, %v9764_v4 }
 0x2b5   :  { %6362 = vmatprep.subr.bf16.mxu1 %v8817_v50  ;;  %v1147_v50 = vrot.slane %v9863_v48, %v9771_v17 }
 0x2b6   :  { %3606 = vmatpush1.bf16.msra.mxu0 %v8776_v51  ;;  %v8866_v51 = vld [vmem:[#allocation8 + $0xba8] ss:$28 sps:$4 sm:$0xff]  }
 0x2b7   :  { %3607 = vmatprep.subr.bf16.mxu0 %v8784_v3  ;;  %v8874_v3 = vld [vmem:[#allocation8 + $0xbe4] ss:$28 sps:$4 sm:$0xff]  }
 0x2b8   :  { %6363 = vmatpush1.bf16.msra.mxu1 %v8815_v52 }
 0x2b9   :  { %6364 = vmatprep.subr.bf16.mxu1 %v8823_v54 }
 0x2ba   :  { %3608 = vmatpush1.bf16.msra.mxu0 %v8782_v57 }
 0x2bb   :  { %3609 = vmatprep.subr.bf16.mxu0 %v8790_v58 }
 0x2bc   :  { %6365 = vmatpush1.bf16.msra.mxu1 %v8821_v56 }
 0x2bd   :  { %6366 = vmatprep.subr.bf16.mxu1 %v8829_v60 }
 0x2be   :  { %3610 = vmatpush1.bf16.msra.mxu0 %v8788_v61 }
 0x2bf   :  { %3611 = vmatprep.subr.bf16.mxu0 %v8796_v62 }
 0x2c0   :  { %6367 = vmatpush1.bf16.msra.mxu1 %v8827_v12 }
 0x2c1   :  { %6368 = vmatprep.subr.bf16.mxu1 %v8835_v5  ;;  %v8872_v5 = vld [vmem:[#allocation8 + $0xbe0] ss:$28 sps:$4 sm:$0xff]  }
 0x2c2   :  { %3612 = vmatpush1.bf16.msra.mxu0 %v8794_v6 }
 0x2c3   :  { %3613 = vmatprep.subr.bf16.mxu0 %v8802_v7 }
 0x2c4   :  { %6369 = vmatpush1.bf16.msra.mxu1 %v8833_v8 }
 0x2c5   :  { %6370 = vmatprep.subr.bf16.mxu1 %v8841_v9  ;;  %v8880_v9 = vld [vmem:[#allocation8 + $0xc1c] ss:$28 sps:$4 sm:$0xff]  }
 0x2c6   :  { %3614 = vmatpush1.bf16.msra.mxu0 %v8800_v10 }
 0x2c7   :  { %3615 = vmatprep.subr.bf16.mxu0 %v8808_v11 }
 0x2c8   :  { %6371 = vmatpush1.bf16.msra.mxu1 %v8839_v13 }
 0x2c9   :  { %6372 = vmatprep.subr.bf16.mxu1 %v8847_v14  ;;  %v8875_v14 = vld [vmem:[#allocation11 + $0x380] ss:$28 sps:$4 sm:$0xff]  }
 0x2ca   :  { %3616 = vmatpush1.bf16.msra.mxu0 %v8806_v15  ;;  %v8878_v15 = vld [vmem:[#allocation8 + $0xc18] ss:$28 sps:$4 sm:$0xff]  }
 0x2cb   :  { %3617 = vmatprep.subr.bf16.mxu0 %v8814_v16 }
 0x2cc   :  { %6373 = vmatpush1.bf16.msra.mxu1 %v8845_v20  ;;  %v8883_v20 = vld [vmem:[#allocation11 + $0x3bc] ss:$28 sps:$4 sm:$0xff]  }
 0x2cd   :  { %6374 = vmatprep.subr.bf16.mxu1 %v8853_v55  ;;  %v8886_v55 = vld [vmem:[#allocation11 + $0xc] ss:$28 sps:$4 sm:$0xff]  }
 0x2ce   :  { %3618 = vmatpush1.bf16.msra.mxu0 %v8812_v22 }
 0x2cf   :  { %3619 = vmatprep.subr.bf16.mxu0 %v8820_v18  ;;  %v8881_v18 = vld [vmem:[#allocation11 + $0x3b8] ss:$28 sps:$4 sm:$0xff]  }
 0x2d0   :  { %6375 = vmatpush1.bf16.msra.mxu1 %v8851_v23  ;;  %v8884_v23 = vld [vmem:[#allocation11 + $0x8] ss:$28 sps:$4 sm:$0xff]  }
 0x2d1   :  { %6376 = vmatprep.subr.bf16.mxu1 %v8859_v24  ;;  %v8889_v24 = vld [vmem:[#allocation11 + $0x3f4] ss:$28 sps:$4 sm:$0xff]  }
 0x2d2   :  { %3620 = vmatpush1.bf16.msra.mxu0 %v8818_v25  ;;  %v8892_v25 = vld [vmem:[#allocation11 + $0x44] ss:$28 sps:$4 sm:$0xff]  }
 0x2d3   :  { %3621 = vmatprep.subr.bf16.mxu0 %v8826_v26  ;;  %v8887_v26 = vld [vmem:[#allocation11 + $0x3f0] ss:$28 sps:$4 sm:$0xff]  }
 0x2d4   :  { %6377 = vmatpush1.bf16.msra.mxu1 %v8857_v28  ;;  %v8890_v28 = vld [vmem:[#allocation11 + $0x40] ss:$28 sps:$4 sm:$0xff]  }
 0x2d5   :  { %6378 = vmatprep.subr.bf16.mxu1 %v8865_v29  ;;  %v8895_v29 = vld [vmem:[#allocation11 + $0x42c] ss:$28 sps:$4 sm:$0xff]  }
 0x2d6   :  { %3622 = vmatpush1.bf16.msra.mxu0 %v8824_v31  ;;  %v8898_v31 = vld [vmem:[#allocation11 + $0x7c] ss:$28 sps:$4 sm:$0xff]  }
 0x2d7   :  { %3623 = vmatprep.subr.bf16.mxu0 %v8832_v19  ;;  %v8893_v19 = vld [vmem:[#allocation11 + $0x428] ss:$28 sps:$4 sm:$0xff]  }
 0x2d8   :  { %6379 = vmatpush1.bf16.msra.mxu1 %v8863_v32  ;;  %v8896_v32 = vld [vmem:[#allocation11 + $0x78] ss:$28 sps:$4 sm:$0xff]  }
 0x2d9   :  { %6380 = vmatprep.subr.bf16.mxu1 %v8871_v33  ;;  %v8901_v33 = vld [vmem:[#allocation11 + $0x464] ss:$28 sps:$4 sm:$0xff]  }
 0x2da   :  { %3624 = vmatpush1.bf16.msra.mxu0 %v8830_v35  ;;  %v8904_v35 = vld [vmem:[#allocation11 + $0xb4] ss:$28 sps:$4 sm:$0xff]  }
 0x2db   :  { %3634 = vmatprep.subr.bf16.mxu0 %v8838_v37  ;;  %v8902_v37 = vld [vmem:[#allocation11 + $0xb0] ss:$28 sps:$4 sm:$0xff]  }
 0x2dc   :  { %6381 = vmatpush1.bf16.msra.mxu1 %v8869_v36  ;;  %v8907_v36 = vld [vmem:[#allocation11 + $0x49c] ss:$28 sps:$4 sm:$0xff]  }
 0x2dd   :  { %3626 = vmatmul.mubr.bf16.vlgmr.msra.gmra.mrb[12].mxu0 %v9823_v21  ;;  %6391 = vmatprep.subr.bf16.mxu1 %v8877_v38  ;;  %v8868_v21 = vld [vmem:[#allocation8 + $0xbac] ss:$28 sps:$4 sm:$0xff]   ;;  %v8910_v38 = vld [vmem:[#allocation11 + $0xec] ss:$28 sps:$4 sm:$0xff]  }
 0x2de   :  { %3635 = vmatpush1.bf16.msra.mxu0 %v8836_v53  ;;  %3666 = vmatprep.mubr.bf16.mxu0 %v9600_v0  ;;  %v8905_v53 = vld [vmem:[#allocation11 + $0x498] ss:$28 sps:$4 sm:$0xff]  }
 0x2df   :  { %3636 = vmatprep.subr.bf16.mxu0 %v8844_v39  ;;  %v8908_v39 = vld [vmem:[#allocation11 + $0xe8] ss:$28 sps:$4 sm:$0xff]  }
 0x2e2   :  { %3637 = vmatpush1.bf16.msra.mxu0 %v8842_v41  ;;  %v8913_v41 = vld [vmem:[#allocation11 + $0x4d4] ss:$28 sps:$4 sm:$0xff]  }
 0x2e3   :  { %3638 = vmatprep.subr.bf16.mxu0 %v8850_v59  ;;  %v8916_v59 = vld [vmem:[#allocation11 + $0x124] ss:$28 sps:$4 sm:$0xff]  }
 0x2e6   :  { %3639 = vmatpush1.bf16.msra.mxu0 %v8848_v42  ;;  %v8911_v42 = vld [vmem:[#allocation11 + $0x4d0] ss:$28 sps:$4 sm:$0xff]  }
 0x2e7   :  { %3640 = vmatprep.subr.bf16.mxu0 %v8856_v44  ;;  %v8914_v44 = vld [vmem:[#allocation11 + $0x120] ss:$28 sps:$4 sm:$0xff]  }
 0x2ea   :  { %3641 = vmatpush1.bf16.msra.mxu0 %v8854_v45  ;;  %v8919_v45 = vld [vmem:[#allocation11 + $0x50c] ss:$28 sps:$4 sm:$0xff]  }
 0x2eb   :  { %3642 = vmatprep.subr.bf16.mxu0 %v8862_v46  ;;  %v8922_v46 = vld [vmem:[#allocation11 + $0x15c] ss:$28 sps:$4 sm:$0xff]  }
 0x2ee   :  { %3643 = vmatpush1.bf16.msra.mxu0 %v8860_v47 }
 0x2ef   :  { %3644 = vmatprep.subr.bf16.mxu0 %v8868_v21 }
 0x2f0   :  { %v3340_v52 = vpop.f32.mrb[8].mxu0  ;;  %v9871_v54 = vpop.f32.mrb[8].mxu1 }
 0x2f1   :  { %v8093_v57 = vadd.f32 %v3340_v52, %v1135_v49  ;;  %v3342_v58 = vpop.f32.mrb[9].mxu0  ;;  %v3506_v56 = vpop.f32.mrb[9].mxu1  ;;  %v8917_v49 = vld [vmem:[#allocation11 + $0x508] ss:$28 sps:$4 sm:$0xff]   ;;  %v8928_v52 = vld [vmem:[#allocation11 + $0x194] ss:$28 sps:$4 sm:$0xff]  }
 0x2f2   :  { %v8094_v60 = vadd.f32 %v3342_v58, %v1139_v1  ;;  %v8096_v61 = vadd.f32 %v3506_v56, %v1147_v50  ;;  %v3344_v62 = vpop.f32.mrb[10].mxu0  ;;  %v3508_v12 = vpop.f32.mrb[10].mxu1  ;;  %3645 = vmatpush1.bf16.msra.mxu0 %v8866_v51  ;;  %v8920_v1 = vld [vmem:[#allocation11 + $0x158] ss:$28 sps:$4 sm:$0xff]   ;;  %v8923_v58 = vld [vmem:[#allocation11 + $0x540] ss:$28 sps:$4 sm:$0xff]  }
 0x2f3   :  { %v3835_v6 = vmax.f32 %v8093_v57, 0.0  ;;  %v3345_v7 = vpop.f32.mrb[11].mxu0  ;;  %v3509_v8 = vpop.f32.mrb[11].mxu1  ;;  %3646 = vmatprep.subr.bf16.mxu0 %v8874_v3  ;;  %v8925_v3 = vld [vmem:[#allocation11 + $0x544] ss:$28 sps:$4 sm:$0xff]  }
 0x2f4   :  { %v3836_v10 = vmax.f32 %v8094_v60, 0.0  ;;  %v3838_v11 = vmax.f32 %v8096_v61, 0.0  ;;  %v8926_v56 = vld [vmem:[#allocation11 + $0x190] ss:$28 sps:$4 sm:$0xff]   ;;  %v8931_v60 = vld [vmem:[#allocation11 + $0x57c] ss:$28 sps:$4 sm:$0xff]  }
 0x2f5   :  { %v9875_v16 = vpack.c.bf16 %v3835_v6, %v3835_v6  ;;  %v8934_v61 = vld [vmem:[#allocation11 + $0x1cc] ss:$28 sps:$4 sm:$0xff]   ;;  %v8929_v62 = vld [vmem:[#allocation11 + $0x578] ss:$28 sps:$4 sm:$0xff]   ;;  %v8940_v6 = vld [vmem:[#allocation11 + $0x204] ss:$28 sps:$4 sm:$0xff]  }
 0x2f6   :  { %v9873_v13 = vpack.c.bf16 %v3836_v10, %v3836_v10  ;;  %3647 = vmatpush1.bf16.msra.mxu0 %v8872_v5  ;;  %v9878_v22 = vpack.c.bf16 %v3838_v11, %v3838_v11  ;;  %v8932_v12 = vld [vmem:[#allocation11 + $0x1c8] ss:$28 sps:$4 sm:$0xff]   ;;  %v8937_v5 = vld [vmem:[#allocation11 + $0x5b4] ss:$28 sps:$4 sm:$0xff]   ;;  %v8938_v8 = vld [vmem:[#allocation11 + $0x200] ss:$28 sps:$4 sm:$0xff]  }
 0x2f7   :  { %3648 = vmatprep.subr.bf16.mxu0 %v8880_v9  ;;  %v8935_v7 = vld [vmem:[#allocation11 + $0x5b0] ss:$28 sps:$4 sm:$0xff]   ;;  %v8946_v10 = vld [vmem:[#allocation11 + $0x23c] ss:$28 sps:$4 sm:$0xff]   ;;  %v8941_v11 = vld [vmem:[#allocation11 + $0x5e8] ss:$28 sps:$4 sm:$0xff]  }
 0x2f8   :  { %6382 = vmatprep.mubr.bf16.mxu1 %v9873_v13  ;;  %v8943_v9 = vld [vmem:[#allocation11 + $0x5ec] ss:$28 sps:$4 sm:$0xff]  }
 0x2f9   :  { %6383 = vmatmul.mubr.bf16.vlgmr.msra.gmra.mrb[28].mxu1 %v9875_v16 }
 0x2fa   :  { %6392 = vmatpush1.bf16.msra.mxu1 %v8875_v14  ;;  %3649 = vmatpush1.bf16.msra.mxu0 %v8878_v15  ;;  %v8944_v14 = vld [vmem:[#allocation11 + $0x238] ss:$28 sps:$4 sm:$0xff]   ;;  %v8949_v15 = vld [vmem:[#allocation11 + $0x624] ss:$28 sps:$4 sm:$0xff]  }
 0x2fb   :  { %6423 = vmatprep.mubr.bf16.mxu1 %v9878_v22  ;;  %6393 = vmatprep.subr.bf16.mxu1 %v8883_v20  ;;  %v8952_v20 = vld [vmem:[#allocation11 + $0x274] ss:$28 sps:$4 sm:$0xff]  }
 0x2fc   :  { %6514 = vmatprep.subr.bf16.mxu0 %v8886_v55  ;;  %v8947_v55 = vld [vmem:[#allocation11 + $0x620] ss:$28 sps:$4 sm:$0xff]  }
 0x2fd   :  { %3667 = vmatmul.mubr.bf16.vlgmr.msra.gmra.mrb[12].mxu0 %v9835_v63  ;;  %v8899_v63 = vld [vmem:[#allocation11 + $0x460] ss:$28 sps:$4 sm:$0xff]  }
 0x2fe   :  { %6394 = vmatpush1.bf16.msra.mxu1 %v8881_v18  ;;  %6515 = vmatpush1.bf16.msra.mxu0 %v8884_v23  ;;  %v8950_v18 = vld [vmem:[#allocation11 + $0x270] ss:$28 sps:$4 sm:$0xff]   ;;  %v8955_v23 = vld [vmem:[#allocation11 + $0x65c] ss:$28 sps:$4 sm:$0xff]  }
 0x2ff   :  { %6546 = vmatprep.mubr.bf16.mxu0 %v9873_v13  ;;  %6395 = vmatprep.subr.bf16.mxu1 %v8889_v24  ;;  %v8958_v24 = vld [vmem:[#allocation11 + $0x2ac] ss:$28 sps:$4 sm:$0xff]  }
 0x300   :  { %6516 = vmatprep.subr.bf16.mxu0 %v8892_v25  ;;  %v8953_v25 = vld [vmem:[#allocation11 + $0x658] ss:$28 sps:$4 sm:$0xff]  }
 0x302   :  { %6396 = vmatpush1.bf16.msra.mxu1 %v8887_v26  ;;  %6517 = vmatpush1.bf16.msra.mxu0 %v8890_v28  ;;  %v8956_v26 = vld [vmem:[#allocation11 + $0x2a8] ss:$28 sps:$4 sm:$0xff]   ;;  %v1143_v28 = vrot.slane %v9863_v48, %v9796_v30 }
 0x303   :  { %6397 = vmatprep.subr.bf16.mxu1 %v8895_v29  ;;  %6518 = vmatprep.subr.bf16.mxu0 %v8898_v31  ;;  %v8961_v29 = vld [vmem:[#allocation11 + $0x694] ss:$28 sps:$4 sm:$0xff]   ;;  %v8964_v31 = vld [vmem:[#allocation11 + $0x2e4] ss:$28 sps:$4 sm:$0xff]  }
 0x306   :  { %6398 = vmatpush1.bf16.msra.mxu1 %v8893_v19  ;;  %6519 = vmatpush1.bf16.msra.mxu0 %v8896_v32  ;;  %v8959_v19 = vld [vmem:[#allocation11 + $0x690] ss:$28 sps:$4 sm:$0xff]   ;;  %v8962_v32 = vld [vmem:[#allocation11 + $0x2e0] ss:$28 sps:$4 sm:$0xff]  }
 0x307   :  { %6399 = vmatprep.subr.bf16.mxu1 %v8901_v33  ;;  %6520 = vmatprep.subr.bf16.mxu0 %v8904_v35  ;;  %v8095_v33 = vadd.f32 %v9871_v54, %v1143_v28  ;;  %v1159_v35 = vrot.slane %v9863_v48, %v9830_v40  ;;  %v8973_v54 = vld [vmem:[#allocation11 + $0x354] ss:$28 sps:$4 sm:$0xff]  }
 0x30a   :  { %6400 = vmatpush1.bf16.msra.mxu1 %v8899_v63  ;;  %6521 = vmatpush1.bf16.msra.mxu0 %v8902_v37  ;;  %v8967_v63 = vld [vmem:[#allocation11 + $0x6cc] ss:$28 sps:$4 sm:$0xff]   ;;  %v8970_v37 = vld [vmem:[#allocation11 + $0x31c] ss:$28 sps:$4 sm:$0xff]  }
 0x30b   :  { %6401 = vmatprep.subr.bf16.mxu1 %v8907_v36  ;;  %6522 = vmatprep.subr.bf16.mxu0 %v8910_v38 }
 0x30e   :  { %6402 = vmatpush1.bf16.msra.mxu1 %v8905_v53  ;;  %6523 = vmatpush1.bf16.msra.mxu0 %v8908_v39  ;;  %v8965_v53 = vld [vmem:[#allocation11 + $0x6c8] ss:$28 sps:$4 sm:$0xff]   ;;  %v8968_v39 = vld [vmem:[#allocation11 + $0x318] ss:$28 sps:$4 sm:$0xff]  }
 0x30f   :  { %6403 = vmatprep.subr.bf16.mxu1 %v8913_v41  ;;  %6524 = vmatprep.subr.bf16.mxu0 %v8916_v59  ;;  %v3837_v41 = vmax.f32 %v8095_v33, 0.0  ;;  %v9064_v33 = vld [vmem:[#allocation11 + $0x888] ss:$28 sps:$4 sm:$0xff]  }
 0x311   :  { %v7899_v47 = vpop.f32.mrb[12].mxu1 }
 0x312   :  { %v7900_v21 = vpop.f32.mrb[13].mxu1  ;;  %6404 = vmatpush1.bf16.msra.mxu1 %v8911_v42  ;;  %6525 = vmatpush1.bf16.msra.mxu0 %v8914_v44 }
 0x313   :  { %v9884_v50 = vadd.f32 %v7900_v21, %v7899_v47  ;;  %v7902_v51 = vpop.f32.mrb[14].mxu1  ;;  %6405 = vmatprep.subr.bf16.mxu1 %v8919_v45  ;;  %6526 = vmatprep.subr.bf16.mxu0 %v8922_v46  ;;  %v9024_v45 = vld [vmem:[#allocation11 + $0x704] ss:$28 sps:$4 sm:$0xff]   ;;  %v8971_v21 = vld [vmem:[#allocation11 + $0x350] ss:$28 sps:$4 sm:$0xff]  }
 0x314   :  { %v7903_v57 = vpop.f32.mrb[15].mxu1  ;;  %v8976_v51 = vld [vmem:[#allocation11 + $0x38c] ss:$28 sps:$4 sm:$0xff]  }
 0x315   :  { %v3710_v59 = vadd.f32 %v9884_v50, %v1159_v35  ;;  %v8974_v50 = vld [vmem:[#allocation11 + $0x388] ss:$28 sps:$4 sm:$0xff]   ;;  %v9028_v57 = vld [vmem:[#allocation11 + $0x738] ss:$28 sps:$4 sm:$0xff]  }
 0x316   :  { %6406 = vmatpush1.bf16.msra.mxu1 %v8917_v49  ;;  %6527 = vmatpush1.bf16.msra.mxu0 %v8920_v1  ;;  %v9022_v49 = vld [vmem:[#allocation11 + $0x700] ss:$28 sps:$4 sm:$0xff]   ;;  %v9894_v1 = vpack.c.bf16 %v3837_v41, %v3837_v41  ;;  %v8998_v41 = vld [vmem:[#allocation11 + $0x548] ss:$28 sps:$4 sm:$0xff]  }
 0x317   :  { %6407 = vmatprep.subr.bf16.mxu1 %v8925_v3  ;;  %6528 = vmatprep.subr.bf16.mxu0 %v8928_v52  ;;  %v9030_v3 = vld [vmem:[#allocation11 + $0x73c] ss:$28 sps:$4 sm:$0xff]   ;;  %v8979_v52 = vld [vmem:[#allocation11 + $0x3c4] ss:$28 sps:$4 sm:$0xff]  }
 0x31a   :  { %6408 = vmatpush1.bf16.msra.mxu1 %v8923_v58  ;;  %6529 = vmatpush1.bf16.msra.mxu0 %v8926_v56  ;;  %v9036_v58 = vld [vmem:[#allocation11 + $0x774] ss:$28 sps:$4 sm:$0xff]   ;;  %v8977_v56 = vld [vmem:[#allocation11 + $0x3c0] ss:$28 sps:$4 sm:$0xff]  }
 0x31b   :  { %6409 = vmatprep.subr.bf16.mxu1 %v8931_v60  ;;  %6530 = vmatprep.subr.bf16.mxu0 %v8934_v61  ;;  %v8982_v60 = vld [vmem:[#allocation11 + $0x3fc] ss:$28 sps:$4 sm:$0xff]   ;;  %v9034_v61 = vld [vmem:[#allocation11 + $0x770] ss:$28 sps:$4 sm:$0xff]  }
 0x31e   :  { %6410 = vmatpush1.bf16.msra.mxu1 %v8929_v62  ;;  %6531 = vmatpush1.bf16.msra.mxu0 %v8932_v12  ;;  %v9042_v62 = vld [vmem:[#allocation11 + $0x7ac] ss:$28 sps:$4 sm:$0xff]   ;;  %v8980_v12 = vld [vmem:[#allocation11 + $0x3f8] ss:$28 sps:$4 sm:$0xff]  }
 0x31f   :  { %6411 = vmatprep.subr.bf16.mxu1 %v8937_v5  ;;  %6532 = vmatprep.subr.bf16.mxu0 %v8940_v6  ;;  %v8985_v5 = vld [vmem:[#allocation11 + $0x434] ss:$28 sps:$4 sm:$0xff]   ;;  %v9040_v6 = vld [vmem:[#allocation11 + $0x7a8] ss:$28 sps:$4 sm:$0xff]  }
 0x322   :  { %6412 = vmatpush1.bf16.msra.mxu1 %v8935_v7  ;;  %6533 = vmatpush1.bf16.msra.mxu0 %v8938_v8  ;;  %v9048_v7 = vld [vmem:[#allocation11 + $0x7e4] ss:$28 sps:$4 sm:$0xff]   ;;  %v8983_v8 = vld [vmem:[#allocation11 + $0x430] ss:$28 sps:$4 sm:$0xff]  }
 0x323   :  { %6413 = vmatprep.subr.bf16.mxu1 %v8943_v9  ;;  %6534 = vmatprep.subr.bf16.mxu0 %v8946_v10  ;;  %v8988_v9 = vld [vmem:[#allocation11 + $0x46c] ss:$28 sps:$4 sm:$0xff]   ;;  %v9046_v10 = vld [vmem:[#allocation11 + $0x7e0] ss:$28 sps:$4 sm:$0xff]  }
 0x326   :  { %6414 = vmatpush1.bf16.msra.mxu1 %v8941_v11  ;;  %6535 = vmatpush1.bf16.msra.mxu0 %v8944_v14  ;;  %v9054_v11 = vld [vmem:[#allocation11 + $0x81c] ss:$28 sps:$4 sm:$0xff]   ;;  %v8986_v14 = vld [vmem:[#allocation11 + $0x468] ss:$28 sps:$4 sm:$0xff]  }
 0x327   :  { %6415 = vmatprep.subr.bf16.mxu1 %v8949_v15  ;;  %6536 = vmatprep.subr.bf16.mxu0 %v8952_v20  ;;  %v8991_v15 = vld [vmem:[#allocation11 + $0x4a4] ss:$28 sps:$4 sm:$0xff]   ;;  %v9052_v20 = vld [vmem:[#allocation11 + $0x818] ss:$28 sps:$4 sm:$0xff]  }
 0x32a   :  { %6416 = vmatpush1.bf16.msra.mxu1 %v8947_v55  ;;  %6537 = vmatpush1.bf16.msra.mxu0 %v8950_v18  ;;  %v9060_v55 = vld [vmem:[#allocation11 + $0x854] ss:$28 sps:$4 sm:$0xff]   ;;  %v8989_v18 = vld [vmem:[#allocation11 + $0x4a0] ss:$28 sps:$4 sm:$0xff]  }
 0x32b   :  { %6417 = vmatprep.subr.bf16.mxu1 %v8955_v23  ;;  %6538 = vmatprep.subr.bf16.mxu0 %v8958_v24  ;;  %v8994_v23 = vld [vmem:[#allocation11 + $0x4dc] ss:$28 sps:$4 sm:$0xff]   ;;  %v9058_v24 = vld [vmem:[#allocation11 + $0x850] ss:$28 sps:$4 sm:$0xff]  }
 0x32e   :  { %6418 = vmatpush1.bf16.msra.mxu1 %v8953_v25  ;;  %6539 = vmatpush1.bf16.msra.mxu0 %v8956_v26  ;;  %v9066_v25 = vld [vmem:[#allocation11 + $0x88c] ss:$28 sps:$4 sm:$0xff]  }
 0x32f   :  { %6419 = vmatprep.subr.bf16.mxu1 %v8961_v29  ;;  %6540 = vmatprep.subr.bf16.mxu0 %v8964_v31  ;;  %v8992_v29 = vld [vmem:[#allocation11 + $0x4d8] ss:$28 sps:$4 sm:$0xff]  }
 0x331   :  { %v7921_v36 = vpop.f32.mrb[16].mxu1 }
 0x332   :  { %v7922_v38 = vpop.f32.mrb[17].mxu1  ;;  %6420 = vmatpush1.bf16.msra.mxu1 %v8959_v19  ;;  %6541 = vmatpush1.bf16.msra.mxu0 %v8962_v32  ;;  %v8997_v32 = vld [vmem:[#allocation11 + $0x514] ss:$28 sps:$4 sm:$0xff]  }
 0x333   :  { %v7923_v42 = vadd.f32 %v7922_v38, %v7921_v36  ;;  %v7924_v44 = vpop.f32.mrb[18].mxu1  ;;  %6421 = vmatprep.subr.bf16.mxu1 %v8967_v63  ;;  %6542 = vmatprep.subr.bf16.mxu0 %v8970_v37  ;;  %v9072_v63 = vld [vmem:[#allocation11 + $0x8c4] ss:$28 sps:$4 sm:$0xff]   ;;  %v8995_v36 = vld [vmem:[#allocation11 + $0x510] ss:$28 sps:$4 sm:$0xff]  }
 0x334   :  { %v7925_v46 = vpop.f32.mrb[19].mxu1  ;;  %v9000_v38 = vld [vmem:[#allocation11 + $0x54c] ss:$28 sps:$4 sm:$0xff]   ;;  %v9084_v44 = vld [vmem:[#allocation11 + $0x934] ss:$28 sps:$4 sm:$0xff]  }
 0x335   :  { %v9892_v47 = vadd.f32 %v7923_v42, %v3710_v59  ;;  %v9003_v59 = vld [vmem:[#allocation11 + $0x584] ss:$28 sps:$4 sm:$0xff]   ;;  %v9076_v42 = vld [vmem:[#allocation11 + $0x8f8] ss:$28 sps:$4 sm:$0xff]   ;;  %v9082_v46 = vld [vmem:[#allocation11 + $0x930] ss:$28 sps:$4 sm:$0xff]  }
 0x336   :  { %6422 = vmatpush1.bf16.msra.mxu1 %v8965_v53  ;;  %6543 = vmatpush1.bf16.msra.mxu0 %v8968_v39  ;;  %v9070_v53 = vld [vmem:[#allocation11 + $0x8c0] ss:$28 sps:$4 sm:$0xff]  }
 0x337   :  { %6544 = vmatprep.subr.bf16.mxu0 %v8973_v54  ;;  %6432 = vmatprep.subr.bf16.mxu1 %v9024_v45  ;;  %v9078_v39 = vld [vmem:[#allocation11 + $0x8fc] ss:$28 sps:$4 sm:$0xff]  }
 0x338   :  { %v9001_v54 = vld [vmem:[#allocation11 + $0x580] ss:$28 sps:$4 sm:$0xff]  }
 0x339   :  { %6424 = vmatmul.mubr.bf16.vlgmr.msra.gmra.mrb[28].mxu1 %v9894_v1  ;;  %v9006_v45 = vld [vmem:[#allocation11 + $0x5bc] ss:$28 sps:$4 sm:$0xff]  }
 0x33a   :  { %6545 = vmatpush1.bf16.msra.mxu0 %v8971_v21  ;;  %6433 = vmatpush1.bf16.msra.mxu1 %v9022_v49  ;;  %v9004_v21 = vld [vmem:[#allocation11 + $0x5b8] ss:$28 sps:$4 sm:$0xff]  }
 0x33b   :  { %6555 = vmatprep.subr.bf16.mxu0 %v8976_v51  ;;  %6434 = vmatprep.subr.bf16.mxu1 %v9030_v3  ;;  %v9009_v49 = vld [vmem:[#allocation11 + $0x5f4] ss:$28 sps:$4 sm:$0xff]   ;;  %v9088_v51 = vld [vmem:[#allocation11 + $0x968] ss:$28 sps:$4 sm:$0xff]  }
 0x33c   :  { %v9096_v3 = vld [vmem:[#allocation11 + $0x9a4] ss:$28 sps:$4 sm:$0xff]  }
 0x33d   :  { %6547 = vmatmul.mubr.bf16.vlgmr.msra.gmra.mrb[16].mxu0 %v9875_v16 }
 0x33e   :  { %6556 = vmatpush1.bf16.msra.mxu0 %v8974_v50  ;;  %6587 = vmatprep.mubr.bf16.mxu0 %v9878_v22  ;;  %v9007_v50 = vld [vmem:[#allocation11 + $0x5f0] ss:$28 sps:$4 sm:$0xff]  }
 0x33f   :  { %6557 = vmatprep.subr.bf16.mxu0 %v8979_v52  ;;  %6435 = vmatpush1.bf16.msra.mxu1 %v9028_v57  ;;  %v9012_v52 = vld [vmem:[#allocation11 + $0x62c] ss:$28 sps:$4 sm:$0xff]   ;;  %v9094_v57 = vld [vmem:[#allocation11 + $0x9a0] ss:$28 sps:$4 sm:$0xff]  }
 0x340   :  { %6436 = vmatprep.subr.bf16.mxu1 %v9036_v58  ;;  %v9102_v58 = vld [vmem:[#allocation11 + $0x9dc] ss:$28 sps:$4 sm:$0xff]  }
 0x342   :  { %6558 = vmatpush1.bf16.msra.mxu0 %v8977_v56  ;;  %v9010_v56 = vld [vmem:[#allocation11 + $0x628] ss:$28 sps:$4 sm:$0xff]  }
 0x343   :  { %6559 = vmatprep.subr.bf16.mxu0 %v8982_v60  ;;  %6437 = vmatpush1.bf16.msra.mxu1 %v9034_v61  ;;  %v9015_v60 = vld [vmem:[#allocation11 + $0x664] ss:$28 sps:$4 sm:$0xff]   ;;  %v9100_v61 = vld [vmem:[#allocation11 + $0x9d8] ss:$28 sps:$4 sm:$0xff]  }
 0x344   :  { %6438 = vmatprep.subr.bf16.mxu1 %v9042_v62  ;;  %v9108_v62 = vld [vmem:[#allocation11 + $0xa14] ss:$28 sps:$4 sm:$0xff]  }
 0x346   :  { %6560 = vmatpush1.bf16.msra.mxu0 %v8980_v12  ;;  %v9013_v12 = vld [vmem:[#allocation11 + $0x660] ss:$28 sps:$4 sm:$0xff]  }
 0x347   :  { %6561 = vmatprep.subr.bf16.mxu0 %v8985_v5  ;;  %6439 = vmatpush1.bf16.msra.mxu1 %v9040_v6  ;;  %v9018_v5 = vld [vmem:[#allocation11 + $0x69c] ss:$28 sps:$4 sm:$0xff]   ;;  %v9106_v6 = vld [vmem:[#allocation11 + $0xa10] ss:$28 sps:$4 sm:$0xff]  }
 0x348   :  { %6440 = vmatprep.subr.bf16.mxu1 %v9048_v7  ;;  %v9114_v7 = vld [vmem:[#allocation11 + $0xa4c] ss:$28 sps:$4 sm:$0xff]  }
 0x34a   :  { %6562 = vmatpush1.bf16.msra.mxu0 %v8983_v8 }
 0x34b   :  { %6563 = vmatprep.subr.bf16.mxu0 %v8988_v9  ;;  %6441 = vmatpush1.bf16.msra.mxu1 %v9046_v10 }
 0x34c   :  { %6442 = vmatprep.subr.bf16.mxu1 %v9054_v11  ;;  %v9016_v11 = vld [vmem:[#allocation11 + $0x698] ss:$28 sps:$4 sm:$0xff]  }
 0x34e   :  { %6564 = vmatpush1.bf16.msra.mxu0 %v8986_v14 }
 0x34f   :  { %6565 = vmatprep.subr.bf16.mxu0 %v8991_v15  ;;  %6443 = vmatpush1.bf16.msra.mxu1 %v9052_v20  ;;  %v9021_v15 = vld [vmem:[#allocation11 + $0x6d4] ss:$28 sps:$4 sm:$0xff]   ;;  %v9112_v20 = vld [vmem:[#allocation11 + $0xa48] ss:$28 sps:$4 sm:$0xff]  }
 0x350   :  { %6444 = vmatprep.subr.bf16.mxu1 %v9060_v55 }
 0x351   :  { %v7943_v26 = vpop.f32.mrb[20].mxu1 }
 0x352   :  { %v7944_v28 = vpop.f32.mrb[21].mxu1  ;;  %6566 = vmatpush1.bf16.msra.mxu0 %v8989_v18  ;;  %v9120_v18 = vld [vmem:[#allocation11 + $0xa84] ss:$28 sps:$4 sm:$0xff]  }
 0x353   :  { %v7945_v31 = vadd.f32 %v7944_v28, %v7943_v26  ;;  %v7946_v19 = vpop.f32.mrb[22].mxu1  ;;  %6567 = vmatprep.subr.bf16.mxu0 %v8994_v23  ;;  %6445 = vmatpush1.bf16.msra.mxu1 %v9058_v24  ;;  %v9019_v23 = vld [vmem:[#allocation11 + $0x6d0] ss:$28 sps:$4 sm:$0xff]   ;;  %v9033_v26 = vld [vmem:[#allocation11 + $0x744] ss:$28 sps:$4 sm:$0xff]  }
 0x354   :  { %v7947_v35 = vpop.f32.mrb[23].mxu1  ;;  %6446 = vmatprep.subr.bf16.mxu1 %v9066_v25  ;;  %v9027_v24 = vld [vmem:[#allocation11 + $0x70c] ss:$28 sps:$4 sm:$0xff]   ;;  %v9031_v28 = vld [vmem:[#allocation11 + $0x740] ss:$28 sps:$4 sm:$0xff]  }
 0x355   :  { %v3790_v37 = vadd.f32 %v7945_v31, %v9892_v47  ;;  %v9090_v47 = vld [vmem:[#allocation11 + $0x96c] ss:$28 sps:$4 sm:$0xff]   ;;  %v9037_v31 = vld [vmem:[#allocation11 + $0x778] ss:$28 sps:$4 sm:$0xff]  }
 0x356   :  { %6568 = vmatpush1.bf16.msra.mxu0 %v8992_v29  ;;  %v9025_v25 = vld [vmem:[#allocation11 + $0x708] ss:$28 sps:$4 sm:$0xff]   ;;  %v9039_v29 = vld [vmem:[#allocation11 + $0x77c] ss:$28 sps:$4 sm:$0xff]   ;;  %v9045_v19 = vld [vmem:[#allocation11 + $0x7b4] ss:$28 sps:$4 sm:$0xff]  }
 0x357   :  { %6569 = vmatprep.subr.bf16.mxu0 %v8997_v32  ;;  %6447 = vmatpush1.bf16.msra.mxu1 %v9064_v33  ;;  %v9043_v32 = vld [vmem:[#allocation11 + $0x7b0] ss:$28 sps:$4 sm:$0xff]   ;;  %v9049_v35 = vld [vmem:[#allocation11 + $0x7e8] ss:$28 sps:$4 sm:$0xff]  }
 0x358   :  { %6448 = vmatprep.subr.bf16.mxu1 %v9072_v63  ;;  %v9051_v33 = vld [vmem:[#allocation11 + $0x7ec] ss:$28 sps:$4 sm:$0xff]   ;;  %v9057_v63 = vld [vmem:[#allocation11 + $0x824] ss:$28 sps:$4 sm:$0xff]  }
 0x35a   :  { %6570 = vmatpush1.bf16.msra.mxu0 %v8995_v36  ;;  %v9063_v36 = vld [vmem:[#allocation11 + $0x85c] ss:$28 sps:$4 sm:$0xff]  }
 0x35b   :  { %6571 = vmatprep.subr.bf16.mxu0 %v9000_v38  ;;  %6449 = vmatpush1.bf16.msra.mxu1 %v9070_v53  ;;  %v9061_v38 = vld [vmem:[#allocation11 + $0x858] ss:$28 sps:$4 sm:$0xff]  }
 0x35c   :  { %6450 = vmatprep.subr.bf16.mxu1 %v9078_v39  ;;  %v9069_v53 = vld [vmem:[#allocation11 + $0x894] ss:$28 sps:$4 sm:$0xff]  }
 0x35d   :  { %v9067_v39 = vld [vmem:[#allocation11 + $0x890] ss:$28 sps:$4 sm:$0xff]  }
 0x35e   :  { %6572 = vmatpush1.bf16.msra.mxu0 %v8998_v41  ;;  %v9075_v41 = vld [vmem:[#allocation11 + $0x8cc] ss:$28 sps:$4 sm:$0xff]  }
 0x35f   :  { %6573 = vmatprep.subr.bf16.mxu0 %v9003_v59  ;;  %6451 = vmatpush1.bf16.msra.mxu1 %v9076_v42  ;;  %v9073_v59 = vld [vmem:[#allocation11 + $0x8c8] ss:$28 sps:$4 sm:$0xff]  }
 0x360   :  { %6452 = vmatprep.subr.bf16.mxu1 %v9084_v44  ;;  %v9081_v42 = vld [vmem:[#allocation11 + $0x904] ss:$28 sps:$4 sm:$0xff]  }
 0x361   :  { %v9079_v44 = vld [vmem:[#allocation11 + $0x900] ss:$28 sps:$4 sm:$0xff]  }
 0x362   :  { %6574 = vmatpush1.bf16.msra.mxu0 %v9001_v54  ;;  %v9087_v54 = vld [vmem:[#allocation11 + $0x93c] ss:$28 sps:$4 sm:$0xff]  }
 0x363   :  { %6575 = vmatprep.subr.bf16.mxu0 %v9006_v45  ;;  %6453 = vmatpush1.bf16.msra.mxu1 %v9082_v46  ;;  %v9085_v45 = vld [vmem:[#allocation11 + $0x938] ss:$28 sps:$4 sm:$0xff]  }
 0x364   :  { %6454 = vmatprep.subr.bf16.mxu1 %v9090_v47  ;;  %v9093_v46 = vld [vmem:[#allocation11 + $0x974] ss:$28 sps:$4 sm:$0xff]  }
 0x365   :  { %v9091_v47 = vld [vmem:[#allocation11 + $0x970] ss:$28 sps:$4 sm:$0xff]  }
 0x366   :  { %6576 = vmatpush1.bf16.msra.mxu0 %v9004_v21  ;;  %v9099_v21 = vld [vmem:[#allocation11 + $0x9ac] ss:$28 sps:$4 sm:$0xff]  }
 0x367   :  { %6577 = vmatprep.subr.bf16.mxu0 %v9009_v49  ;;  %6455 = vmatpush1.bf16.msra.mxu1 %v9088_v51  ;;  %v9097_v49 = vld [vmem:[#allocation11 + $0x9a8] ss:$28 sps:$4 sm:$0xff]  }
 0x368   :  { %6456 = vmatprep.subr.bf16.mxu1 %v9096_v3  ;;  %v9105_v51 = vld [vmem:[#allocation11 + $0x9e4] ss:$28 sps:$4 sm:$0xff]  }
 0x369   :  { %v9103_v3 = vld [vmem:[#allocation11 + $0x9e0] ss:$28 sps:$4 sm:$0xff]  }
 0x36a   :  { %6578 = vmatpush1.bf16.msra.mxu0 %v9007_v50  ;;  %v9111_v50 = vld [vmem:[#allocation11 + $0xa1c] ss:$28 sps:$4 sm:$0xff]  }
 0x36b   :  { %6579 = vmatprep.subr.bf16.mxu0 %v9012_v52  ;;  %6457 = vmatpush1.bf16.msra.mxu1 %v9094_v57  ;;  %v9109_v52 = vld [vmem:[#allocation11 + $0xa18] ss:$28 sps:$4 sm:$0xff]  }
 0x36c   :  { %6458 = vmatprep.subr.bf16.mxu1 %v9102_v58  ;;  %v9117_v57 = vld [vmem:[#allocation11 + $0xa54] ss:$28 sps:$4 sm:$0xff]  }
 0x36d   :  { %v9115_v58 = vld [vmem:[#allocation11 + $0xa50] ss:$28 sps:$4 sm:$0xff]  }
 0x36e   :  { %6580 = vmatpush1.bf16.msra.mxu0 %v9010_v56  ;;  %v9123_v56 = vld [vmem:[#allocation11 + $0xa8c] ss:$28 sps:$4 sm:$0xff]  }
 0x36f   :  { %6581 = vmatprep.subr.bf16.mxu0 %v9015_v60  ;;  %6459 = vmatpush1.bf16.msra.mxu1 %v9100_v61  ;;  %v1151_v60 = vrot.slane %v9863_v48, %v9816_v27  ;;  %v1155_v61 = vrot.slane %v9863_v48, %v9799_v34  ;;  %v9124_v48 = vld [vmem:[#allocation11 + $0xab8] ss:$28 sps:$4 sm:$0xff]  }
 0x370   :  { %6460 = vmatprep.subr.bf16.mxu1 %v9108_v62 }
 0x371   :  { %v3829_v8 = vpop.f32.mrb[24].mxu1 }
 0x372   :  { %v9900_v9 = vadd.f32 %v3829_v8, %v3790_v37  ;;  %v8071_v10 = vpop.f32.mrb[25].mxu1  ;;  %6582 = vmatpush1.bf16.msra.mxu0 %v9013_v12  ;;  %v9055_v37 = vld [vmem:[#allocation11 + $0x820] ss:$28 sps:$4 sm:$0xff]  }
 0x373   :  { %v3832_v14 = vpop.f32.mrb[26].mxu1  ;;  %6583 = vmatprep.subr.bf16.mxu0 %v9018_v5  ;;  %6461 = vmatpush1.bf16.msra.mxu1 %v9106_v6 }
 0x374   :  { %v8072_v55 = vpop.f32.mrb[27].mxu1  ;;  %6462 = vmatprep.subr.bf16.mxu1 %v9114_v7 }
 0x376   :  { %6584 = vmatpush1.bf16.msra.mxu0 %v9016_v11 }
 0x377   :  { %6585 = vmatprep.subr.bf16.mxu0 %v9021_v15  ;;  %6463 = vmatpush1.bf16.msra.mxu1 %v9112_v20  ;;  %v9118_v15 = vld [vmem:[#allocation11 + $0xa80] ss:$28 sps:$4 sm:$0xff]   ;;  %v9121_v20 = vld [vmem:[#allocation11 + $0xa88] ss:$28 sps:$4 sm:$0xff]  }
 0x378   :  { %6473 = vmatprep.subr.bf16.mxu1 %v9120_v18  ;;  %v9126_v18 = vld [vmem:[#allocation11 + $0xabc] ss:$28 sps:$4 sm:$0xff]  }
 0x37a   :  { %6586 = vmatpush1.bf16.msra.mxu0 %v9019_v23  ;;  %v9129_v23 = vld [vmem:[#allocation11 + $0xac4] ss:$28 sps:$4 sm:$0xff]  }
 0x37b   :  { %6596 = vmatprep.subr.bf16.mxu0 %v9027_v24  ;;  %v9127_v24 = vld [vmem:[#allocation11 + $0xac0] ss:$28 sps:$4 sm:$0xff]  }
 0x37d   :  { %6588 = vmatmul.mubr.bf16.vlgmr.msra.gmra.mrb[16].mxu0 %v9894_v1 }
 0x37e   :  { %6597 = vmatpush1.bf16.msra.mxu0 %v9025_v25  ;;  %v9132_v25 = vld [vmem:[#allocation11 + $0xaf4] ss:$28 sps:$4 sm:$0xff]  }
 0x37f   :  { %6598 = vmatprep.subr.bf16.mxu0 %v9033_v26  ;;  %v9135_v26 = vld [vmem:[#allocation11 + $0xafc] ss:$28 sps:$4 sm:$0xff]  }
 0x382   :  { %6599 = vmatpush1.bf16.msra.mxu0 %v9031_v28  ;;  %v9130_v28 = vld [vmem:[#allocation11 + $0xaf0] ss:$28 sps:$4 sm:$0xff]  }
 0x383   :  { %6600 = vmatprep.subr.bf16.mxu0 %v9039_v29  ;;  %v9133_v29 = vld [vmem:[#allocation11 + $0xaf8] ss:$28 sps:$4 sm:$0xff]  }
 0x386   :  { %6601 = vmatpush1.bf16.msra.mxu0 %v9037_v31  ;;  %v9138_v31 = vld [vmem:[#allocation11 + $0xb2c] ss:$28 sps:$4 sm:$0xff]  }
 0x387   :  { %6602 = vmatprep.subr.bf16.mxu0 %v9045_v19  ;;  %v9141_v19 = vld [vmem:[#allocation11 + $0xb34] ss:$28 sps:$4 sm:$0xff]  }
 0x38a   :  { %6603 = vmatpush1.bf16.msra.mxu0 %v9043_v32  ;;  %v9136_v32 = vld [vmem:[#allocation11 + $0xb28] ss:$28 sps:$4 sm:$0xff]  }
 0x38b   :  { %6604 = vmatprep.subr.bf16.mxu0 %v9051_v33  ;;  %v9139_v33 = vld [vmem:[#allocation11 + $0xb30] ss:$28 sps:$4 sm:$0xff]  }
 0x38e   :  { %6605 = vmatpush1.bf16.msra.mxu0 %v9049_v35  ;;  %v9144_v35 = vld [vmem:[#allocation11 + $0xb64] ss:$28 sps:$4 sm:$0xff]  }
 0x38f   :  { %6606 = vmatprep.subr.bf16.mxu0 %v9057_v63  ;;  %v9147_v63 = vld [vmem:[#allocation11 + $0xb6c] ss:$28 sps:$4 sm:$0xff]  }
 0x392   :  { %6607 = vmatpush1.bf16.msra.mxu0 %v9055_v37  ;;  %v9142_v37 = vld [vmem:[#allocation11 + $0xb60] ss:$28 sps:$4 sm:$0xff]  }
 0x393   :  { %6608 = vmatprep.subr.bf16.mxu0 %v9063_v36  ;;  %v9145_v36 = vld [vmem:[#allocation11 + $0xb68] ss:$28 sps:$4 sm:$0xff]  }
 0x396   :  { %6609 = vmatpush1.bf16.msra.mxu0 %v9061_v38  ;;  %v9150_v38 = vld [vmem:[#allocation11 + $0xb9c] ss:$28 sps:$4 sm:$0xff]  }
 0x397   :  { %6610 = vmatprep.subr.bf16.mxu0 %v9069_v53  ;;  %v9153_v53 = vld [vmem:[#allocation11 + $0xba4] ss:$28 sps:$4 sm:$0xff]  }
 0x39a   :  { %6611 = vmatpush1.bf16.msra.mxu0 %v9067_v39  ;;  %v9148_v39 = vld [vmem:[#allocation11 + $0xb98] ss:$28 sps:$4 sm:$0xff]  }
 0x39b   :  { %6612 = vmatprep.subr.bf16.mxu0 %v9075_v41  ;;  %v9151_v41 = vld [vmem:[#allocation11 + $0xba0] ss:$28 sps:$4 sm:$0xff]  }
 0x39e   :  { %6613 = vmatpush1.bf16.msra.mxu0 %v9073_v59  ;;  %v9156_v59 = vld [vmem:[#allocation11 + $0xbd4] ss:$28 sps:$4 sm:$0xff]  }
 0x39f   :  { %6614 = vmatprep.subr.bf16.mxu0 %v9081_v42  ;;  %v9159_v42 = vld [vmem:[#allocation11 + $0xbdc] ss:$28 sps:$4 sm:$0xff]  }
 0x3a2   :  { %6615 = vmatpush1.bf16.msra.mxu0 %v9079_v44  ;;  %v9154_v44 = vld [vmem:[#allocation11 + $0xbd0] ss:$28 sps:$4 sm:$0xff]  }
 0x3a3   :  { %6616 = vmatprep.subr.bf16.mxu0 %v9087_v54  ;;  %v9157_v54 = vld [vmem:[#allocation11 + $0xbd8] ss:$28 sps:$4 sm:$0xff]  }
 0x3a6   :  { %6617 = vmatpush1.bf16.msra.mxu0 %v9085_v45  ;;  %v9162_v45 = vld [vmem:[#allocation11 + $0xc0c] ss:$28 sps:$4 sm:$0xff]  }
 0x3a7   :  { %6618 = vmatprep.subr.bf16.mxu0 %v9093_v46  ;;  %v9165_v46 = vld [vmem:[#allocation11 + $0xc14] ss:$28 sps:$4 sm:$0xff]  }
 0x3aa   :  { %6619 = vmatpush1.bf16.msra.mxu0 %v9091_v47  ;;  %v9160_v47 = vld [vmem:[#allocation11 + $0xc08] ss:$28 sps:$4 sm:$0xff]  }
 0x3ab   :  { %6620 = vmatprep.subr.bf16.mxu0 %v9099_v21  ;;  %v9163_v21 = vld [vmem:[#allocation11 + $0xc10] ss:$28 sps:$4 sm:$0xff]  }
 0x3ae   :  { %6621 = vmatpush1.bf16.msra.mxu0 %v9097_v49  ;;  %v3841_v49 = vmax.f32 %v9900_v9, 0.0  ;;  %v9171_v9 = vld [vmem:[#allocation11 + $0x48] ss:$28 sps:$4 sm:$0xff]  }
 0x3af   :  { %6622 = vmatprep.subr.bf16.mxu0 %v9105_v51  ;;  %v9168_v51 = vld [vmem:[#allocation11 + $0x14] ss:$28 sps:$4 sm:$0xff]  }
 0x3b2   :  { %6623 = vmatpush1.bf16.msra.mxu0 %v9103_v3  ;;  %v9169_v3 = vld [vmem:[#allocation11 + $0x1d8] ss:$28 sps:$4 sm:$0xff]  }
 0x3b3   :  { %6624 = vmatprep.subr.bf16.mxu0 %v9111_v50  ;;  %v9166_v50 = vld [vmem:[#allocation11 + $0x10] ss:$28 sps:$4 sm:$0xff]  }
 0x3b6   :  { %6625 = vmatpush1.bf16.msra.mxu0 %v9109_v52  ;;  %v9918_v52 = vpack.c.bf16 %v3841_v49, %v3841_v49  ;;  %v9228_v49 = vld [vmem:[#allocation11 + $0x2b4] ss:$28 sps:$4 sm:$0xff]  }
 0x3b7   :  { %6626 = vmatprep.subr.bf16.mxu0 %v9117_v57  ;;  %v9170_v57 = vld [vmem:[#allocation11 + $0x18] ss:$28 sps:$4 sm:$0xff]  }
 0x3ba   :  { %6627 = vmatpush1.bf16.msra.mxu0 %v9115_v58  ;;  %v9173_v58 = vld [vmem:[#allocation11 + $0x4c] ss:$28 sps:$4 sm:$0xff]  }
 0x3bb   :  { %6637 = vmatprep.subr.bf16.mxu0 %v9123_v56  ;;  %v9174_v56 = vld [vmem:[#allocation11 + $0x210] ss:$28 sps:$4 sm:$0xff]  }
 0x3d0   :  { %v3668_v62 = vpop.f32.mrb[12].mxu0 }
 0x3d1   :  { %v8097_v12 = vadd.f32 %v3668_v62, %v1151_v60  ;;  %v3670_v5 = vpop.f32.mrb[13].mxu0  ;;  %v9175_v60 = vld [vmem:[#allocation11 + $0x50] ss:$28 sps:$4 sm:$0xff]   ;;  %v9179_v62 = vld [vmem:[#allocation11 + $0x248] ss:$28 sps:$4 sm:$0xff]  }
 0x3d2   :  { %v8098_v6 = vadd.f32 %v3670_v5, %v1155_v61  ;;  %v3672_v7 = vpop.f32.mrb[14].mxu0  ;;  %v9178_v61 = vld [vmem:[#allocation11 + $0x84] ss:$28 sps:$4 sm:$0xff]  }
 0x3d3   :  { %v3839_v8 = vmax.f32 %v8097_v12, 0.0  ;;  %v3673_v10 = vpop.f32.mrb[15].mxu0  ;;  %v9176_v12 = vld [vmem:[#allocation11 + $0x80] ss:$28 sps:$4 sm:$0xff]   ;;  %v9180_v5 = vld [vmem:[#allocation11 + $0x88] ss:$28 sps:$4 sm:$0xff]  }
 0x3d4   :  { %v3840_v11 = vmax.f32 %v8098_v6, 0.0  ;;  %v9183_v6 = vld [vmem:[#allocation11 + $0xbc] ss:$28 sps:$4 sm:$0xff]  }
 0x3d5   :  { %v9909_v55 = vpack.c.bf16 %v3839_v8, %v3839_v8  ;;  %v9184_v7 = vld [vmem:[#allocation11 + $0x280] ss:$28 sps:$4 sm:$0xff]   ;;  %v9181_v8 = vld [vmem:[#allocation11 + $0xb8] ss:$28 sps:$4 sm:$0xff]  }
 0x3d6   :  { %v9907_v14 = vpack.c.bf16 %v3840_v11, %v3840_v11  ;;  %v9185_v10 = vld [vmem:[#allocation11 + $0xc0] ss:$28 sps:$4 sm:$0xff]   ;;  %v9188_v11 = vld [vmem:[#allocation11 + $0xf4] ss:$28 sps:$4 sm:$0xff]  }
 0x3d8   :  { %6464 = vmatprep.mubr.bf16.mxu1 %v9907_v14  ;;  %6628 = vmatprep.mubr.bf16.mxu0 %v9907_v14 }
 0x3d9   :  { %6465 = vmatmul.mubr.bf16.vlgmr.msra.gmra.mrb[28].mxu1 %v9909_v55  ;;  %6629 = vmatmul.mubr.bf16.vlgmr.msra.gmra.mrb[16].mxu0 %v9909_v55 }
 0x3da   :  { %6474 = vmatpush1.bf16.msra.mxu1 %v9118_v15  ;;  %6638 = vmatpush1.bf16.msra.mxu0 %v9121_v20  ;;  %v9186_v15 = vld [vmem:[#allocation11 + $0xf0] ss:$28 sps:$4 sm:$0xff]   ;;  %v9190_v20 = vld [vmem:[#allocation11 + $0xf8] ss:$28 sps:$4 sm:$0xff]  }
 0x3db   :  { %6475 = vmatprep.subr.bf16.mxu1 %v9126_v18  ;;  %6639 = vmatprep.subr.bf16.mxu0 %v9129_v23  ;;  %v9193_v18 = vld [vmem:[#allocation11 + $0x12c] ss:$28 sps:$4 sm:$0xff]  }
 0x3dc   :  { %6505 = vmatprep.mubr.bf16.mxu1 %v9600_v0  ;;  %6669 = vmatprep.mubr.bf16.mxu0 %v9600_v0  ;;  %v9194_v23 = vld [vmem:[#allocation11 + $0x2f0] ss:$28 sps:$4 sm:$0xff]  }
 0x3de   :  { %6476 = vmatpush1.bf16.msra.mxu1 %v9124_v48  ;;  %6640 = vmatpush1.bf16.msra.mxu0 %v9127_v24  ;;  %v9191_v48 = vld [vmem:[#allocation11 + $0x128] ss:$28 sps:$4 sm:$0xff]   ;;  %v9195_v24 = vld [vmem:[#allocation11 + $0x130] ss:$28 sps:$4 sm:$0xff]  }
 0x3df   :  { %6477 = vmatprep.subr.bf16.mxu1 %v9132_v25  ;;  %6641 = vmatprep.subr.bf16.mxu0 %v9135_v26  ;;  %v9198_v25 = vld [vmem:[#allocation11 + $0x164] ss:$28 sps:$4 sm:$0xff]  }
 0x3e0   :  { %v9199_v26 = vld [vmem:[#allocation11 + $0x328] ss:$28 sps:$4 sm:$0xff]  }
 0x3e2   :  { %6478 = vmatpush1.bf16.msra.mxu1 %v9130_v28  ;;  %6642 = vmatpush1.bf16.msra.mxu0 %v9133_v29  ;;  %v9196_v28 = vld [vmem:[#allocation11 + $0x160] ss:$28 sps:$4 sm:$0xff]   ;;  %v9200_v29 = vld [vmem:[#allocation11 + $0x168] ss:$28 sps:$4 sm:$0xff]  }
 0x3e3   :  { %6479 = vmatprep.subr.bf16.mxu1 %v9138_v31  ;;  %6643 = vmatprep.subr.bf16.mxu0 %v9141_v19  ;;  %v9203_v31 = vld [vmem:[#allocation11 + $0x19c] ss:$28 sps:$4 sm:$0xff]  }
 0x3e4   :  { %v9204_v19 = vld [vmem:[#allocation11 + $0x360] ss:$28 sps:$4 sm:$0xff]  }
 0x3e6   :  { %6480 = vmatpush1.bf16.msra.mxu1 %v9136_v32  ;;  %6644 = vmatpush1.bf16.msra.mxu0 %v9139_v33  ;;  %v9201_v32 = vld [vmem:[#allocation11 + $0x198] ss:$28 sps:$4 sm:$0xff]   ;;  %v9205_v33 = vld [vmem:[#allocation11 + $0x1a0] ss:$28 sps:$4 sm:$0xff]  }
 0x3e7   :  { %6481 = vmatprep.subr.bf16.mxu1 %v9144_v35  ;;  %6645 = vmatprep.subr.bf16.mxu0 %v9147_v63  ;;  %v9208_v35 = vld [vmem:[#allocation11 + $0x1d4] ss:$28 sps:$4 sm:$0xff]  }
 0x3e8   :  { %v9209_v63 = vld [vmem:[#allocation11 + $0x558] ss:$28 sps:$4 sm:$0xff]  }
 0x3ea   :  { %6482 = vmatpush1.bf16.msra.mxu1 %v9142_v37  ;;  %6646 = vmatpush1.bf16.msra.mxu0 %v9145_v36  ;;  %v9206_v37 = vld [vmem:[#allocation11 + $0x1d0] ss:$28 sps:$4 sm:$0xff]   ;;  %v9210_v36 = vld [vmem:[#allocation11 + $0x398] ss:$28 sps:$4 sm:$0xff]  }
 0x3eb   :  { %6483 = vmatprep.subr.bf16.mxu1 %v9150_v38  ;;  %6647 = vmatprep.subr.bf16.mxu0 %v9153_v53  ;;  %v9213_v38 = vld [vmem:[#allocation11 + $0x20c] ss:$28 sps:$4 sm:$0xff]  }
 0x3ec   :  { %v9214_v53 = vld [vmem:[#allocation11 + $0x590] ss:$28 sps:$4 sm:$0xff]  }
 0x3ee   :  { %6484 = vmatpush1.bf16.msra.mxu1 %v9148_v39  ;;  %6648 = vmatpush1.bf16.msra.mxu0 %v9151_v41  ;;  %v9211_v39 = vld [vmem:[#allocation11 + $0x208] ss:$28 sps:$4 sm:$0xff]   ;;  %v9215_v41 = vld [vmem:[#allocation11 + $0x3d0] ss:$28 sps:$4 sm:$0xff]  }
 0x3ef   :  { %6485 = vmatprep.subr.bf16.mxu1 %v9156_v59  ;;  %6649 = vmatprep.subr.bf16.mxu0 %v9159_v42  ;;  %v9218_v59 = vld [vmem:[#allocation11 + $0x244] ss:$28 sps:$4 sm:$0xff]  }
 0x3f0   :  { %v9219_v42 = vld [vmem:[#allocation11 + $0x5c8] ss:$28 sps:$4 sm:$0xff]  }
 0x3f2   :  { %6486 = vmatpush1.bf16.msra.mxu1 %v9154_v44  ;;  %6650 = vmatpush1.bf16.msra.mxu0 %v9157_v54  ;;  %v9216_v44 = vld [vmem:[#allocation11 + $0x240] ss:$28 sps:$4 sm:$0xff]   ;;  %v9220_v54 = vld [vmem:[#allocation11 + $0x408] ss:$28 sps:$4 sm:$0xff]  }
 0x3f3   :  { %6487 = vmatprep.subr.bf16.mxu1 %v9162_v45  ;;  %6651 = vmatprep.subr.bf16.mxu0 %v9165_v46  ;;  %v9223_v45 = vld [vmem:[#allocation11 + $0x27c] ss:$28 sps:$4 sm:$0xff]  }
 0x3f4   :  { %v9224_v46 = vld [vmem:[#allocation11 + $0x600] ss:$28 sps:$4 sm:$0xff]  }
 0x3f6   :  { %6488 = vmatpush1.bf16.msra.mxu1 %v9160_v47  ;;  %6652 = vmatpush1.bf16.msra.mxu0 %v9163_v21  ;;  %v9221_v47 = vld [vmem:[#allocation11 + $0x278] ss:$28 sps:$4 sm:$0xff]   ;;  %v9225_v21 = vld [vmem:[#allocation11 + $0x440] ss:$28 sps:$4 sm:$0xff]  }
 0x3f7   :  { %6678 = vmatprep.subr.bf16.mxu1 %v9168_v51  ;;  %7958 = vmatprep.subr.bf16.mxu0 %v9169_v3  ;;  %v9229_v51 = vld [vmem:[#allocation11 + $0x638] ss:$28 sps:$4 sm:$0xff]   ;;  %v9226_v3 = vld [vmem:[#allocation11 + $0x2b0] ss:$28 sps:$4 sm:$0xff]  }
 0x3f9   :  { %6506 = vmatmul.mubr.bf16.vlgmr.msra.gmra.mrb[28].mxu1 %v9918_v52  ;;  %6670 = vmatmul.mubr.bf16.vlgmr.msra.gmra.mrb[16].mxu0 %v9918_v52 }
 0x3fa   :  { %6679 = vmatpush1.bf16.msra.mxu1 %v9166_v50  ;;  %6710 = vmatprep.mubr.bf16.mxu1 %v9873_v13  ;;  %v9230_v50 = vld [vmem:[#allocation11 + $0x478] ss:$28 sps:$4 sm:$0xff]  }
 0x3fb   :  { %7959 = vmatpush3.bf16.msra.mxu0 %v9170_v57  ;;  %6874 = vmatprep.mubr.bf16.mxu0 %v9873_v13  ;;  %v9189_v13 = vld [vmem:[#allocation11 + $0x2b8] ss:$28 sps:$4 sm:$0xff]   ;;  %v9233_v57 = vld [vmem:[#allocation11 + $0x2ec] ss:$28 sps:$4 sm:$0xff]  }
 0x3fc   :  { %6680 = vmatprep.subr.bf16.mxu1 %v9173_v58  ;;  %7960 = vmatprep.subr.bf16.mxu0 %v9174_v56  ;;  %v9234_v58 = vld [vmem:[#allocation11 + $0x670] ss:$28 sps:$4 sm:$0xff]   ;;  %v9231_v56 = vld [vmem:[#allocation11 + $0x2e8] ss:$28 sps:$4 sm:$0xff]  }
 0x3fe   :  { %6681 = vmatpush1.bf16.msra.mxu1 %v9171_v9  ;;  %v9235_v9 = vld [vmem:[#allocation11 + $0x4b0] ss:$28 sps:$4 sm:$0xff]  }
 0x3ff   :  { %7961 = vmatpush3.bf16.msra.mxu0 %v9175_v60  ;;  %6682 = vmatprep.subr.bf16.mxu1 %v9178_v61  ;;  %v9238_v60 = vld [vmem:[#allocation11 + $0x324] ss:$28 sps:$4 sm:$0xff]  }
 0x400   :  { %7962 = vmatprep.subr.bf16.mxu0 %v9179_v62  ;;  %v9239_v61 = vld [vmem:[#allocation11 + $0x6a8] ss:$28 sps:$4 sm:$0xff]   ;;  %v9236_v62 = vld [vmem:[#allocation11 + $0x320] ss:$28 sps:$4 sm:$0xff]  }
 0x402   :  { %6683 = vmatpush1.bf16.msra.mxu1 %v9176_v12  ;;  %v9240_v12 = vld [vmem:[#allocation11 + $0x4e8] ss:$28 sps:$4 sm:$0xff]  }
 0x403   :  { %7963 = vmatpush3.bf16.msra.mxu0 %v9180_v5  ;;  %6684 = vmatprep.subr.bf16.mxu1 %v9183_v6  ;;  %v9243_v5 = vld [vmem:[#allocation11 + $0x35c] ss:$28 sps:$4 sm:$0xff]  }
 0x404   :  { %7964 = vmatprep.subr.bf16.mxu0 %v9184_v7  ;;  %v9244_v6 = vld [vmem:[#allocation11 + $0x6e0] ss:$28 sps:$4 sm:$0xff]   ;;  %v9241_v7 = vld [vmem:[#allocation11 + $0x358] ss:$28 sps:$4 sm:$0xff]  }
 0x406   :  { %6685 = vmatpush1.bf16.msra.mxu1 %v9181_v8  ;;  %v9245_v8 = vld [vmem:[#allocation11 + $0x520] ss:$28 sps:$4 sm:$0xff]  }
 0x407   :  { %7965 = vmatpush3.bf16.msra.mxu0 %v9185_v10  ;;  %6686 = vmatprep.subr.bf16.mxu1 %v9188_v11  ;;  %v9248_v10 = vld [vmem:[#allocation11 + $0x394] ss:$28 sps:$4 sm:$0xff]  }
 0x408   :  { %7966 = vmatprep.subr.bf16.mxu0 %v9189_v13  ;;  %v9249_v11 = vld [vmem:[#allocation11 + $0x8d8] ss:$28 sps:$4 sm:$0xff]   ;;  %v9246_v13 = vld [vmem:[#allocation11 + $0x390] ss:$28 sps:$4 sm:$0xff]  }
 0x40a   :  { %6687 = vmatpush1.bf16.msra.mxu1 %v9186_v15  ;;  %v9250_v15 = vld [vmem:[#allocation11 + $0x718] ss:$28 sps:$4 sm:$0xff]  }
 0x40b   :  { %7967 = vmatpush3.bf16.msra.mxu0 %v9190_v20  ;;  %6688 = vmatprep.subr.bf16.mxu1 %v9193_v18  ;;  %v9253_v20 = vld [vmem:[#allocation11 + $0x3cc] ss:$28 sps:$4 sm:$0xff]  }
 0x40c   :  { %7968 = vmatprep.subr.bf16.mxu0 %v9194_v23  ;;  %v9254_v18 = vld [vmem:[#allocation11 + $0x910] ss:$28 sps:$4 sm:$0xff]   ;;  %v9251_v23 = vld [vmem:[#allocation11 + $0x3c8] ss:$28 sps:$4 sm:$0xff]  }
 0x40e   :  { %6689 = vmatpush1.bf16.msra.mxu1 %v9191_v48  ;;  %v9255_v48 = vld [vmem:[#allocation11 + $0x750] ss:$28 sps:$4 sm:$0xff]  }
 0x40f   :  { %7969 = vmatpush3.bf16.msra.mxu0 %v9195_v24  ;;  %6690 = vmatprep.subr.bf16.mxu1 %v9198_v25  ;;  %v9258_v24 = vld [vmem:[#allocation11 + $0x404] ss:$28 sps:$4 sm:$0xff]  }
 0x410   :  { %7970 = vmatprep.subr.bf16.mxu0 %v9199_v26  ;;  %v9259_v25 = vld [vmem:[#allocation11 + $0x948] ss:$28 sps:$4 sm:$0xff]   ;;  %v9256_v26 = vld [vmem:[#allocation11 + $0x400] ss:$28 sps:$4 sm:$0xff]  }
 0x412   :  { %6691 = vmatpush1.bf16.msra.mxu1 %v9196_v28  ;;  %v9263_v28 = vld [vmem:[#allocation11 + $0x43c] ss:$28 sps:$4 sm:$0xff]  }
 0x413   :  { %7971 = vmatpush3.bf16.msra.mxu0 %v9200_v29  ;;  %6692 = vmatprep.subr.bf16.mxu1 %v9203_v31  ;;  %v9264_v29 = vld [vmem:[#allocation11 + $0x980] ss:$28 sps:$4 sm:$0xff]   ;;  %v9261_v31 = vld [vmem:[#allocation11 + $0x438] ss:$28 sps:$4 sm:$0xff]  }
 0x414   :  { %7972 = vmatprep.subr.bf16.mxu0 %v9204_v19  ;;  %v9268_v19 = vld [vmem:[#allocation11 + $0x474] ss:$28 sps:$4 sm:$0xff]  }
 0x416   :  { %6693 = vmatpush1.bf16.msra.mxu1 %v9201_v32  ;;  %v9269_v32 = vld [vmem:[#allocation11 + $0x9b8] ss:$28 sps:$4 sm:$0xff]  }
 0x417   :  { %7973 = vmatpush3.bf16.msra.mxu0 %v9205_v33  ;;  %6694 = vmatprep.subr.bf16.mxu1 %v9208_v35  ;;  %v9266_v33 = vld [vmem:[#allocation11 + $0x470] ss:$28 sps:$4 sm:$0xff]   ;;  %v9270_v35 = vld [vmem:[#allocation11 + $0x7f8] ss:$28 sps:$4 sm:$0xff]  }
 0x418   :  { %7980 = vmatprep.subr.bf16.mxu0 %v9209_v63  ;;  %v9273_v63 = vld [vmem:[#allocation11 + $0x4ac] ss:$28 sps:$4 sm:$0xff]  }
 0x41a   :  { %6875 = vmatmul.mubr.bf16.vlgmr.msra.gmra.mrb[20].mxu0 %v9875_v16  ;;  %6695 = vmatpush1.bf16.msra.mxu1 %v9206_v37  ;;  %v9274_v37 = vld [vmem:[#allocation11 + $0x9f0] ss:$28 sps:$4 sm:$0xff]  }
 0x41b   :  { %7981 = vmatpush3.bf16.msra.mxu0 %v9210_v36  ;;  %6914 = vmatprep.mubr.bf16.mxu0 %v9878_v22  ;;  %v9271_v36 = vld [vmem:[#allocation11 + $0x4a8] ss:$28 sps:$4 sm:$0xff]  }
 0x41c   :  { %6696 = vmatprep.subr.bf16.mxu1 %v9213_v38  ;;  %7982 = vmatprep.subr.bf16.mxu0 %v9214_v53  ;;  %v9275_v38 = vld [vmem:[#allocation11 + $0x830] ss:$28 sps:$4 sm:$0xff]   ;;  %v9278_v53 = vld [vmem:[#allocation11 + $0x4e4] ss:$28 sps:$4 sm:$0xff]  }
 0x41e   :  { %6697 = vmatpush1.bf16.msra.mxu1 %v9211_v39  ;;  %v9279_v39 = vld [vmem:[#allocation11 + $0xa28] ss:$28 sps:$4 sm:$0xff]  }
 0x41f   :  { %7983 = vmatpush3.bf16.msra.mxu0 %v9215_v41  ;;  %6698 = vmatprep.subr.bf16.mxu1 %v9218_v59  ;;  %v9276_v41 = vld [vmem:[#allocation11 + $0x4e0] ss:$28 sps:$4 sm:$0xff]   ;;  %v9280_v59 = vld [vmem:[#allocation11 + $0x868] ss:$28 sps:$4 sm:$0xff]  }
 0x420   :  { %7984 = vmatprep.subr.bf16.mxu0 %v9219_v42  ;;  %v9283_v42 = vld [vmem:[#allocation11 + $0x51c] ss:$28 sps:$4 sm:$0xff]  }
 0x422   :  { %6699 = vmatpush1.bf16.msra.mxu1 %v9216_v44  ;;  %v9284_v44 = vld [vmem:[#allocation11 + $0xa60] ss:$28 sps:$4 sm:$0xff]  }
 0x423   :  { %7985 = vmatpush3.bf16.msra.mxu0 %v9220_v54  ;;  %6700 = vmatprep.subr.bf16.mxu1 %v9223_v45  ;;  %v9281_v54 = vld [vmem:[#allocation11 + $0x518] ss:$28 sps:$4 sm:$0xff]   ;;  %v9285_v45 = vld [vmem:[#allocation11 + $0x8a0] ss:$28 sps:$4 sm:$0xff]  }
 0x424   :  { %7986 = vmatprep.subr.bf16.mxu0 %v9224_v46  ;;  %v9288_v46 = vld [vmem:[#allocation11 + $0x554] ss:$28 sps:$4 sm:$0xff]  }
 0x426   :  { %6701 = vmatpush1.bf16.msra.mxu1 %v9221_v47  ;;  %v9286_v47 = vld [vmem:[#allocation11 + $0x550] ss:$28 sps:$4 sm:$0xff]  }
 0x427   :  { %7987 = vmatpush3.bf16.msra.mxu0 %v9225_v21  ;;  %6702 = vmatprep.subr.bf16.mxu1 %v9228_v49  ;;  %v9289_v21 = vld [vmem:[#allocation11 + $0xa98] ss:$28 sps:$4 sm:$0xff]   ;;  %v9292_v49 = vld [vmem:[#allocation11 + $0x58c] ss:$28 sps:$4 sm:$0xff]  }
 0x428   :  { %7988 = vmatprep.subr.bf16.mxu0 %v9229_v51  ;;  %v9290_v51 = vld [vmem:[#allocation11 + $0x588] ss:$28 sps:$4 sm:$0xff]  }
 0x42a   :  { %6703 = vmatpush1.bf16.msra.mxu1 %v9226_v3  ;;  %v9293_v3 = vld [vmem:[#allocation11 + $0xad0] ss:$28 sps:$4 sm:$0xff]  }
 0x42b   :  { %7989 = vmatpush3.bf16.msra.mxu0 %v9230_v50  ;;  %6704 = vmatprep.subr.bf16.mxu1 %v9233_v57  ;;  %v9296_v50 = vld [vmem:[#allocation11 + $0x5c4] ss:$28 sps:$4 sm:$0xff]  }
 0x42c   :  { %7990 = vmatprep.subr.bf16.mxu0 %v9234_v58  ;;  %v9294_v57 = vld [vmem:[#allocation11 + $0x5c0] ss:$28 sps:$4 sm:$0xff]   ;;  %v9297_v58 = vld [vmem:[#allocation11 + $0xb08] ss:$28 sps:$4 sm:$0xff]  }
 0x42e   :  { %6705 = vmatpush1.bf16.msra.mxu1 %v9231_v56  ;;  %v9300_v56 = vld [vmem:[#allocation11 + $0x5fc] ss:$28 sps:$4 sm:$0xff]  }
 0x42f   :  { %7991 = vmatpush3.bf16.msra.mxu0 %v9235_v9  ;;  %6706 = vmatprep.subr.bf16.mxu1 %v9238_v60  ;;  %v9298_v9 = vld [vmem:[#allocation11 + $0x5f8] ss:$28 sps:$4 sm:$0xff]   ;;  %v9301_v60 = vld [vmem:[#allocation11 + $0xb40] ss:$28 sps:$4 sm:$0xff]  }
 0x430   :  { %7992 = vmatprep.subr.bf16.mxu0 %v9239_v61  ;;  %v9304_v61 = vld [vmem:[#allocation11 + $0x634] ss:$28 sps:$4 sm:$0xff]  }
 0x432   :  { %6707 = vmatpush1.bf16.msra.mxu1 %v9236_v62  ;;  %v9302_v62 = vld [vmem:[#allocation11 + $0x630] ss:$28 sps:$4 sm:$0xff]  }
 0x433   :  { %7993 = vmatpush3.bf16.msra.mxu0 %v9240_v12  ;;  %6708 = vmatprep.subr.bf16.mxu1 %v9243_v5  ;;  %v9305_v12 = vld [vmem:[#allocation11 + $0xb78] ss:$28 sps:$4 sm:$0xff]   ;;  %v9308_v5 = vld [vmem:[#allocation11 + $0x66c] ss:$28 sps:$4 sm:$0xff]  }
 0x434   :  { %7994 = vmatprep.subr.bf16.mxu0 %v9244_v6  ;;  %v9306_v6 = vld [vmem:[#allocation11 + $0x668] ss:$28 sps:$4 sm:$0xff]  }
 0x436   :  { %6709 = vmatpush1.bf16.msra.mxu1 %v9241_v7  ;;  %v9309_v7 = vld [vmem:[#allocation11 + $0xbb0] ss:$28 sps:$4 sm:$0xff]  }
 0x437   :  { %7995 = vmatpush3.bf16.msra.mxu0 %v9245_v8  ;;  %6719 = vmatprep.subr.bf16.mxu1 %v9248_v10  ;;  %v9312_v8 = vld [vmem:[#allocation11 + $0x6a4] ss:$28 sps:$4 sm:$0xff]  }
 0x438   :  { %8002 = vmatprep.subr.bf16.mxu0 %v9249_v11  ;;  %v9310_v10 = vld [vmem:[#allocation11 + $0x6a0] ss:$28 sps:$4 sm:$0xff]   ;;  %v9313_v11 = vld [vmem:[#allocation11 + $0xbe8] ss:$28 sps:$4 sm:$0xff]  }
 0x439   :  { %6711 = vmatmul.mubr.bf16.vlgmr.msra.gmra.mrb[32].mxu1 %v9875_v16  ;;  %v9260_v16 = vld [vmem:[#allocation11 + $0x788] ss:$28 sps:$4 sm:$0xff]  }
 0x43a   :  { %6915 = vmatmul.mubr.bf16.vlgmr.msra.gmra.mrb[24].mxu0 %v9894_v1  ;;  %6720 = vmatpush1.bf16.msra.mxu1 %v9246_v13  ;;  %v9316_v13 = vld [vmem:[#allocation11 + $0x6dc] ss:$28 sps:$4 sm:$0xff]  }
 0x43b   :  { %6751 = vmatprep.mubr.bf16.mxu1 %v9878_v22  ;;  %8003 = vmatpush3.bf16.msra.mxu0 %v9250_v15  ;;  %v9265_v22 = vld [vmem:[#allocation11 + $0x7c0] ss:$28 sps:$4 sm:$0xff]   ;;  %v9314_v15 = vld [vmem:[#allocation11 + $0x6d8] ss:$28 sps:$4 sm:$0xff]  }
 0x43c   :  { %6954 = vmatprep.mubr.bf16.mxu0 %v9907_v14  ;;  %6721 = vmatprep.subr.bf16.mxu1 %v9253_v20  ;;  %v9317_v20 = vld [vmem:[#allocation11 + $0xc20] ss:$28 sps:$4 sm:$0xff]  }
 0x43d   :  { %8004 = vmatprep.subr.bf16.mxu0 %v9254_v18  ;;  %v9320_v18 = vld [vmem:[#allocation11 + $0x714] ss:$28 sps:$4 sm:$0xff]  }
 0x43e   :  { %6722 = vmatpush1.bf16.msra.mxu1 %v9251_v23  ;;  %v9318_v23 = vld [vmem:[#allocation11 + $0x710] ss:$28 sps:$4 sm:$0xff]  }
 0x43f   :  { %8005 = vmatpush3.bf16.msra.mxu0 %v9255_v48  ;;  %6723 = vmatprep.subr.bf16.mxu1 %v9258_v24  ;;  %v9323_v48 = vld [vmem:[#allocation11 + $0x74c] ss:$28 sps:$4 sm:$0xff]  }
 0x440   :  { %8006 = vmatprep.subr.bf16.mxu0 %v9259_v25  ;;  %v9321_v24 = vld [vmem:[#allocation11 + $0x748] ss:$28 sps:$4 sm:$0xff]  }
 0x441   :  { %v9326_v25 = vld [vmem:[#allocation11 + $0x784] ss:$28 sps:$4 sm:$0xff]  }
 0x442   :  { %6724 = vmatpush1.bf16.msra.mxu1 %v9256_v26  ;;  %v9324_v26 = vld [vmem:[#allocation11 + $0x780] ss:$28 sps:$4 sm:$0xff]  }
 0x443   :  { %8007 = vmatpush3.bf16.msra.mxu0 %v9260_v16  ;;  %6725 = vmatprep.subr.bf16.mxu1 %v9263_v28  ;;  %v9329_v16 = vld [vmem:[#allocation11 + $0x7bc] ss:$28 sps:$4 sm:$0xff]   ;;  %v9332_v28 = vld [vmem:[#allocation11 + $0x7f4] ss:$28 sps:$4 sm:$0xff]  }
 0x444   :  { %8008 = vmatprep.subr.bf16.mxu0 %v9264_v29  ;;  %v9330_v29 = vld [vmem:[#allocation11 + $0x7f0] ss:$28 sps:$4 sm:$0xff]  }
 0x446   :  { %6726 = vmatpush1.bf16.msra.mxu1 %v9261_v31  ;;  %v9333_v31 = vld [vmem:[#allocation11 + $0x828] ss:$28 sps:$4 sm:$0xff]  }
 0x447   :  { %8009 = vmatpush3.bf16.msra.mxu0 %v9265_v22  ;;  %6727 = vmatprep.subr.bf16.mxu1 %v9268_v19  ;;  %v9338_v22 = vld [vmem:[#allocation11 + $0x864] ss:$28 sps:$4 sm:$0xff]   ;;  %v9341_v19 = vld [vmem:[#allocation11 + $0x89c] ss:$28 sps:$4 sm:$0xff]  }
 0x448   :  { %8010 = vmatprep.subr.bf16.mxu0 %v9269_v32  ;;  %v9339_v32 = vld [vmem:[#allocation11 + $0x898] ss:$28 sps:$4 sm:$0xff]  }
 0x44a   :  { %6728 = vmatpush1.bf16.msra.mxu1 %v9266_v33  ;;  %v9344_v33 = vld [vmem:[#allocation11 + $0x8d4] ss:$28 sps:$4 sm:$0xff]  }
 0x44b   :  { %8011 = vmatpush3.bf16.msra.mxu0 %v9270_v35  ;;  %6729 = vmatprep.subr.bf16.mxu1 %v9273_v63  ;;  %v9342_v35 = vld [vmem:[#allocation11 + $0x8d0] ss:$28 sps:$4 sm:$0xff]  }
 0x44c   :  { %8012 = vmatprep.subr.bf16.mxu0 %v9274_v37  ;;  %v9347_v63 = vld [vmem:[#allocation11 + $0x90c] ss:$28 sps:$4 sm:$0xff]  }
 0x44d   :  { %v9345_v37 = vld [vmem:[#allocation11 + $0x908] ss:$28 sps:$4 sm:$0xff]  }
 0x44e   :  { %6730 = vmatpush1.bf16.msra.mxu1 %v9271_v36  ;;  %v9350_v36 = vld [vmem:[#allocation11 + $0x944] ss:$28 sps:$4 sm:$0xff]  }
 0x44f   :  { %8013 = vmatpush3.bf16.msra.mxu0 %v9275_v38  ;;  %6731 = vmatprep.subr.bf16.mxu1 %v9278_v53  ;;  %v9348_v38 = vld [vmem:[#allocation11 + $0x940] ss:$28 sps:$4 sm:$0xff]  }
 0x450   :  { %8014 = vmatprep.subr.bf16.mxu0 %v9279_v39  ;;  %v9353_v53 = vld [vmem:[#allocation11 + $0x97c] ss:$28 sps:$4 sm:$0xff]  }
 0x451   :  { %v9351_v39 = vld [vmem:[#allocation11 + $0x978] ss:$28 sps:$4 sm:$0xff]  }
 0x452   :  { %6732 = vmatpush1.bf16.msra.mxu1 %v9276_v41  ;;  %v9356_v41 = vld [vmem:[#allocation11 + $0x9b4] ss:$28 sps:$4 sm:$0xff]  }
 0x453   :  { %8015 = vmatpush3.bf16.msra.mxu0 %v9280_v59  ;;  %6733 = vmatprep.subr.bf16.mxu1 %v9283_v42  ;;  %v9354_v59 = vld [vmem:[#allocation11 + $0x9b0] ss:$28 sps:$4 sm:$0xff]  }
 0x454   :  { %8016 = vmatprep.subr.bf16.mxu0 %v9284_v44  ;;  %v9359_v42 = vld [vmem:[#allocation11 + $0x9ec] ss:$28 sps:$4 sm:$0xff]  }
 0x455   :  { %v9357_v44 = vld [vmem:[#allocation11 + $0x9e8] ss:$28 sps:$4 sm:$0xff]  }
 0x456   :  { %6734 = vmatpush1.bf16.msra.mxu1 %v9281_v54  ;;  %v9362_v54 = vld [vmem:[#allocation11 + $0xa24] ss:$28 sps:$4 sm:$0xff]  }
 0x457   :  { %8017 = vmatpush3.bf16.msra.mxu0 %v9285_v45  ;;  %6735 = vmatprep.subr.bf16.mxu1 %v9288_v46  ;;  %v9360_v45 = vld [vmem:[#allocation11 + $0xa20] ss:$28 sps:$4 sm:$0xff]  }
 0x458   :  { %8073 = vmatprep.subr.bf16.mxu0 %v9601_v43  ;;  %v9365_v46 = vld [vmem:[#allocation11 + $0xa5c] ss:$28 sps:$4 sm:$0xff]  }
 0x45a   :  { %6955 = vmatmul.mubr.bf16.vlgmr.msra.gmra.mrb[28].mxu0 %v9909_v55  ;;  %6736 = vmatpush1.bf16.msra.mxu1 %v9286_v47  ;;  %v9363_v47 = vld [vmem:[#allocation11 + $0xa58] ss:$28 sps:$4 sm:$0xff]  }
 0x45b   :  { %8074 = vmatpush3.bf16.msra.mxu0 %v9289_v21  ;;  %6737 = vmatprep.subr.bf16.mxu1 %v9292_v49  ;;  %v9368_v21 = vld [vmem:[#allocation11 + $0xa94] ss:$28 sps:$4 sm:$0xff]  }
 0x45c   :  { %8075 = vmatprep.subr.bf16.mxu0 %v9601_v43  ;;  %8089 = vmatprep.mubr.msk.bf16.mxu0 %vm9602_vm0, %v9601_v43  ;;  %v9366_v49 = vld [vmem:[#allocation11 + $0xa90] ss:$28 sps:$4 sm:$0xff]  }
 0x45e   :  { %6738 = vmatpush1.bf16.msra.mxu1 %v9290_v51  ;;  %v9371_v51 = vld [vmem:[#allocation11 + $0xacc] ss:$28 sps:$4 sm:$0xff]  }
 0x45f   :  { %8076 = vmatpush3.bf16.msra.mxu0 %v9293_v3  ;;  %6739 = vmatprep.subr.bf16.mxu1 %v9296_v50  ;;  %v9369_v3 = vld [vmem:[#allocation11 + $0xac8] ss:$28 sps:$4 sm:$0xff]  }
 0x460   :  { %8077 = vmatprep.subr.bf16.mxu0 %v9601_v43  ;;  %v9374_v50 = vld [vmem:[#allocation11 + $0xb04] ss:$28 sps:$4 sm:$0xff]  }
 0x462   :  { %6740 = vmatpush1.bf16.msra.mxu1 %v9294_v57  ;;  %v9372_v57 = vld [vmem:[#allocation11 + $0xb00] ss:$28 sps:$4 sm:$0xff]  }
 0x463   :  { %8078 = vmatpush3.bf16.msra.mxu0 %v9297_v58  ;;  %6741 = vmatprep.subr.bf16.mxu1 %v9300_v56  ;;  %v9377_v58 = vld [vmem:[#allocation11 + $0xb3c] ss:$28 sps:$4 sm:$0xff]  }
 0x464   :  { %8079 = vmatprep.subr.bf16.mxu0 %v9601_v43  ;;  %v9375_v56 = vld [vmem:[#allocation11 + $0xb38] ss:$28 sps:$4 sm:$0xff]  }
 0x466   :  { %6742 = vmatpush1.bf16.msra.mxu1 %v9298_v9  ;;  %v9380_v9 = vld [vmem:[#allocation11 + $0xb74] ss:$28 sps:$4 sm:$0xff]  }
 0x467   :  { %8080 = vmatpush3.bf16.msra.mxu0 %v9301_v60  ;;  %6743 = vmatprep.subr.bf16.mxu1 %v9304_v61  ;;  %v9378_v60 = vld [vmem:[#allocation11 + $0xb70] ss:$28 sps:$4 sm:$0xff]   ;;  %v9946_v61 = vld [vmem:[#allocation13] sm:$0xff] }
 0x468   :  { %8081 = vmatprep.subr.bf16.mxu0 %v9601_v43 }
 0x46a   :  { %6744 = vmatpush1.bf16.msra.mxu1 %v9302_v62  ;;  %v4302_v62 = vrot.slane %v9946_v61, %v9759_v2 }
 0x46b   :  { %8082 = vmatpush3.bf16.msra.mxu0 %v9305_v12  ;;  %6745 = vmatprep.subr.bf16.mxu1 %v9308_v5  ;;  %v4306_v12 = vrot.slane %v9946_v61, %v9764_v4  ;;  %v4314_v5 = vrot.slane %v9946_v61, %v9771_v17  ;;  %v9389_v17 = vld [vmem:[#allocation11 + $0xc1c] ss:$28 sps:$4 sm:$0xff]  }
 0x46c   :  { %8083 = vmatprep.subr.bf16.mxu0 %v9601_v43 }
 0x46e   :  { %6746 = vmatpush1.bf16.msra.mxu1 %v9306_v6  ;;  %v9381_v6 = vld [vmem:[#allocation11 + $0xba8] ss:$28 sps:$4 sm:$0xff]  }
 0x46f   :  { %8084 = vmatpush3.bf16.msra.mxu0 %v9309_v7  ;;  %6747 = vmatprep.subr.bf16.mxu1 %v9312_v8  ;;  %v9386_v7 = vld [vmem:[#allocation11 + $0xbe4] ss:$28 sps:$4 sm:$0xff]  }
 0x470   :  { %8085 = vmatprep.subr.bf16.mxu0 %v9601_v43 }
 0x472   :  { %6748 = vmatpush1.bf16.msra.mxu1 %v9310_v10 }
 0x473   :  { %8086 = vmatpush3.bf16.msra.mxu0 %v9313_v11  ;;  %6749 = vmatprep.subr.bf16.mxu1 %v9316_v13 }
 0x474   :  { %8087 = vmatprep.subr.bf16.mxu0 %v9601_v43  ;;  %v9327_v43 = vld [vmem:[#allocation11 + $0x7b8] ss:$28 sps:$4 sm:$0xff]  }
 0x476   :  { %6750 = vmatpush1.bf16.msra.mxu1 %v9314_v15 }
 0x477   :  { %8088 = vmatpush3.bf16.msra.mxu0 %v9317_v20  ;;  %6760 = vmatprep.subr.bf16.mxu1 %v9320_v18 }
 0x479   :  { %6752 = vmatmul.mubr.bf16.vlgmr.msra.gmra.mrb[32].mxu1 %v9894_v1  ;;  %v9335_v1 = vld [vmem:[#allocation11 + $0x82c] ss:$28 sps:$4 sm:$0xff]  }
 0x47a   :  { %8090 = vmatmul.mubr.bf16.vlgmr.msra.gmra.mrb[32].mxu0 %v9918_v52  ;;  %6761 = vmatpush1.bf16.msra.mxu1 %v9318_v23 }
 0x47b   :  { %6792 = vmatprep.mubr.bf16.mxu1 %v9907_v14  ;;  %6762 = vmatprep.subr.bf16.mxu1 %v9323_v48  ;;  %v9336_v14 = vld [vmem:[#allocation11 + $0x860] ss:$28 sps:$4 sm:$0xff]  }
 0x47c   :  { %v9384_v48 = vld [vmem:[#allocation11 + $0xbe0] ss:$28 sps:$4 sm:$0xff]  }
 0x47e   :  { %6763 = vmatpush1.bf16.msra.mxu1 %v9321_v24 }
 0x47f   :  { %6764 = vmatprep.subr.bf16.mxu1 %v9326_v25  ;;  %v9387_v25 = vld [vmem:[#allocation11 + $0xc18] ss:$28 sps:$4 sm:$0xff]  }
 0x482   :  { %6765 = vmatpush1.bf16.msra.mxu1 %v9324_v26 }
 0x483   :  { %6766 = vmatprep.subr.bf16.mxu1 %v9329_v16 }
 0x486   :  { %6767 = vmatpush1.bf16.msra.mxu1 %v9327_v43 }
 0x487   :  { %6768 = vmatprep.subr.bf16.mxu1 %v9332_v28 }
 0x48a   :  { %6769 = vmatpush1.bf16.msra.mxu1 %v9330_v29 }
 0x48b   :  { %6770 = vmatprep.subr.bf16.mxu1 %v9335_v1 }
 0x48e   :  { %6771 = vmatpush1.bf16.msra.mxu1 %v9333_v31 }
 0x48f   :  { %6772 = vmatprep.subr.bf16.mxu1 %v9338_v22 }
 0x492   :  { %6773 = vmatpush1.bf16.msra.mxu1 %v9336_v14 }
 0x493   :  { %6774 = vmatprep.subr.bf16.mxu1 %v9341_v19  ;;  %v4326_v19 = vrot.slane %v9946_v61, %v9830_v40 }
 0x496   :  { %6775 = vmatpush1.bf16.msra.mxu1 %v9339_v32 }
 0x497   :  { %6776 = vmatprep.subr.bf16.mxu1 %v9344_v33 }
 0x49a   :  { %6777 = vmatpush1.bf16.msra.mxu1 %v9342_v35 }
 0x49b   :  { %6778 = vmatprep.subr.bf16.mxu1 %v9347_v63 }
 0x49e   :  { %6779 = vmatpush1.bf16.msra.mxu1 %v9345_v37 }
 0x49f   :  { %6780 = vmatprep.subr.bf16.mxu1 %v9350_v36 }
 0x4a2   :  { %6781 = vmatpush1.bf16.msra.mxu1 %v9348_v38 }
 0x4a3   :  { %6782 = vmatprep.subr.bf16.mxu1 %v9353_v53 }
 0x4a6   :  { %6783 = vmatpush1.bf16.msra.mxu1 %v9351_v39 }
 0x4a7   :  { %6784 = vmatprep.subr.bf16.mxu1 %v9356_v41 }
 0x4aa   :  { %6785 = vmatpush1.bf16.msra.mxu1 %v9354_v59 }
 0x4ab   :  { %6786 = vmatprep.subr.bf16.mxu1 %v9359_v42 }
 0x4ae   :  { %6787 = vmatpush1.bf16.msra.mxu1 %v9357_v44 }
 0x4af   :  { %6788 = vmatprep.subr.bf16.mxu1 %v9362_v54 }
 0x4b2   :  { %6789 = vmatpush1.bf16.msra.mxu1 %v9360_v45 }
 0x4b3   :  { %6790 = vmatprep.subr.bf16.mxu1 %v9365_v46 }
 0x4b6   :  { %6791 = vmatpush1.bf16.msra.mxu1 %v9363_v47 }
 0x4b7   :  { %6801 = vmatprep.subr.bf16.mxu1 %v9368_v21  ;;  %v4318_v21 = vrot.slane %v9946_v61, %v9816_v27 }
 0x4b9   :  { %6793 = vmatmul.mubr.bf16.vlgmr.msra.gmra.mrb[32].mxu1 %v9909_v55  ;;  %v9383_v55 = vld [vmem:[#allocation11 + $0xbac] ss:$28 sps:$4 sm:$0xff]  }
 0x4ba   :  { %6802 = vmatpush1.bf16.msra.mxu1 %v9366_v49  ;;  %6833 = vmatprep.mubr.bf16.mxu1 %v9600_v0  ;;  %v4310_v0 = vrot.slane %v9946_v61, %v9796_v30  ;;  %v4322_v49 = vrot.slane %v9946_v61, %v9799_v34 }
 0x4bb   :  { %6803 = vmatprep.subr.bf16.mxu1 %v9371_v51 }
 0x4be   :  { %6804 = vmatpush1.bf16.msra.mxu1 %v9369_v3 }
 0x4bf   :  { %6805 = vmatprep.subr.bf16.mxu1 %v9374_v50 }
 0x4c2   :  { %6806 = vmatpush1.bf16.msra.mxu1 %v9372_v57 }
 0x4c3   :  { %6807 = vmatprep.subr.bf16.mxu1 %v9377_v58 }
 0x4c6   :  { %6808 = vmatpush1.bf16.msra.mxu1 %v9375_v56 }
 0x4c7   :  { %6809 = vmatprep.subr.bf16.mxu1 %v9380_v9 }
 0x4ca   :  { %6810 = vmatpush1.bf16.msra.mxu1 %v9378_v60 }
 0x4cb   :  { %6811 = vmatprep.subr.bf16.mxu1 %v9383_v55 }
 0x4cc   :  { %v6507_v8 = vpop.f32.mrb[28].mxu1  ;;  %v6671_v10 = vpop.f32.mrb[16].mxu0 }
 0x4cd   :  { %v8099_v11 = vadd.f32 %v6507_v8, %v4302_v62  ;;  %v8101_v13 = vadd.f32 %v6671_v10, %v4310_v0  ;;  %v6509_v15 = vpop.f32.mrb[29].mxu1  ;;  %v6673_v20 = vpop.f32.mrb[17].mxu0 }
 0x4ce   :  { %v8100_v2 = vadd.f32 %v6509_v15, %v4306_v12  ;;  %v8102_v18 = vadd.f32 %v6673_v20, %v4314_v5  ;;  %v6511_v23 = vpop.f32.mrb[30].mxu1  ;;  %v6675_v30 = vpop.f32.mrb[18].mxu0  ;;  %6812 = vmatpush1.bf16.msra.mxu1 %v9381_v6 }
 0x4cf   :  { %9390 = vtanh.f32 %v8099_v11  ;;  %v6512_v4 = vpop.f32.mrb[31].mxu1  ;;  %v6676_v24 = vpop.f32.mrb[19].mxu0  ;;  %6813 = vmatprep.subr.bf16.mxu1 %v9386_v7 }
 0x4d0   :  { %9392 = vtanh.f32 %v8101_v13 }
 0x4d1   :  { %9394 = vtanh.f32 %v8100_v2 }
 0x4d2   :  { %9396 = vtanh.f32 %v8102_v18  ;;  %6814 = vmatpush1.bf16.msra.mxu1 %v9384_v48 }
 0x4d3   :  { %6815 = vmatprep.subr.bf16.mxu1 %v9389_v17 }
 0x4d6   :  { %6816 = vmatpush1.bf16.msra.mxu1 %v9387_v25 }
 0x4d9   :  { %v9391_v26 = vpop.eup %9390  ;;  %6834 = vmatmul.mubr.bf16.vlgmr.msra.gmra.mrb[32].mxu1 %v9918_v52 }
 0x4da   :  { %v9393_v16 = vpop.eup %9392  ;;  %7009 = vst [vmem:[#allocation14] sm:$0xff] %v9391_v26 }
 0x4db   :  { %v9395_v43 = vpop.eup %9394  ;;  %7011 = vst [vmem:[#allocation14 + $0x10] sm:$0xff] %v9393_v16 }
 0x4dc   :  { %v9397_v28 = vpop.eup %9396  ;;  %7010 = vst [vmem:[#allocation14 + $0x8] sm:$0xff] %v9395_v43 }
 0x4dd   :  { %7012 = vst [vmem:[#allocation14 + $0x18] sm:$0xff] %v9397_v28 }
 0x4ed   :  { %v7974_v29 = vpop.f32.mrb[20].mxu0 }
 0x4ee   :  { %v7975_v1 = vpop.f32.mrb[21].mxu0 }
 0x4ef   :  { %v7976_v31 = vadd.f32 %v7975_v1, %v7974_v29  ;;  %v7977_v22 = vpop.f32.mrb[22].mxu0 }
 0x4f0   :  { %v7978_v14 = vpop.f32.mrb[23].mxu0 }
 0x4f1   :  { %v6877_v35 = vadd.f32 %v7976_v31, %v4326_v19 }
 0x50d   :  { %v7996_v32 = vpop.f32.mrb[24].mxu0 }
 0x50e   :  { %v7997_v33 = vpop.f32.mrb[25].mxu0 }
 0x50f   :  { %v7998_v63 = vadd.f32 %v7997_v33, %v7996_v32  ;;  %v7999_v52 = vpop.f32.mrb[26].mxu0 }
 0x510   :  { %v8000_v37 = vpop.f32.mrb[27].mxu0 }
 0x511   :  { %v6917_v36 = vadd.f32 %v7998_v63, %v6877_v35 }
 0x52d   :  { %v8018_v38 = vpop.f32.mrb[28].mxu0 }
 0x52e   :  { %v8019_v53 = vpop.f32.mrb[29].mxu0 }
 0x52f   :  { %v8020_v39 = vadd.f32 %v8019_v53, %v8018_v38  ;;  %v8021_v41 = vpop.f32.mrb[30].mxu0 }
 0x530   :  { %v8022_v59 = vpop.f32.mrb[31].mxu0 }
 0x531   :  { %v6957_v42 = vadd.f32 %v8020_v39, %v6917_v36 }
 0x54d   :  { %v6996_v44 = vpop.f32.mrb[32].mxu0 }
 0x54e   :  { %v6997_v54 = vadd.f32 %v6996_v44, %v6957_v42  ;;  %v8091_v45 = vpop.f32.mrb[33].mxu0 }
 0x54f   :  { %v6999_v46 = vpop.f32.mrb[34].mxu0 }
 0x550   :  { %9398 = vtanh.f32 %v6997_v54  ;;  %v8092_v47 = vpop.f32.mrb[35].mxu0 }
 0x55a   :  { %v9399_v40 = vpop.eup %9398 }
 0x55b   :  { %7015 = vst [vmem:[#allocation14 + $0x30] sm:$0xff] %v9399_v40 }
 0x5ac   :  { %v6835_v51 = vpop.f32.mrb[32].mxu1 }
 0x5ad   :  { %v8103_v3 = vadd.f32 %v6835_v51, %v4318_v21  ;;  %v6837_v50 = vpop.f32.mrb[33].mxu1 }
 0x5ae   :  { %v8104_v57 = vadd.f32 %v6837_v50, %v4322_v49  ;;  %v6839_v58 = vpop.f32.mrb[34].mxu1 }
 0x5af   :  { %9400 = vtanh.f32 %v8103_v3  ;;  %v6840_v56 = vpop.f32.mrb[35].mxu1 }
 0x5b0   :  { %9402 = vtanh.f32 %v8104_v57 }
 0x5b9   :  { %v9401_v9 = vpop.eup %9400 }
 0x5ba   :  { %v9403_v60 = vpop.eup %9402  ;;  %7013 = vst [vmem:[#allocation14 + $0x20] sm:$0xff] %v9401_v9 }
 0x5bb   :  { %7014 = vst [vmem:[#allocation14 + $0x28] sm:$0xff] %v9403_v60 }
 0x5bc   :  { %9570 = shalt.err (!%p9567_p4)
}
 0x5bd   :  { %s9571_s15 = scalar_lea.hbm %s9982_s7, 896 }
 0x5be   :  { %p9572_p5 = scmp.ne.s32.totalorder %s9982_s7, %s9571_s15  ;;  %p9575_p6 = scmp.lt.u32.totalorder %s9571_s15, %s9982_s7 }
 0x5c0   :  { %p9577_p7 = pnand %p9575_p6, %p9572_p5 }
 0x5c2   :  { %9580 = shalt.err (!%p9577_p7)
}
 0x5c3   :  { %7025 = dma.vmem_to_hbm [thread:$0]  %s7023_s13, 896, %s9982_s7, [#allocation4]  }
 0x5c4   :  { %9589 = dma.done.wait [#allocation4], 896  }
 0x5c5   :  { %9590 = vsyncadd [#allocation4], 4294966400 }
 0x5c6   :  { %7029 = vsyncpa [#allocation3], 1 }
 0x5c7   :  { %7030 = vsyncpa [#allocation6], 1 }
 0x5c8   :  { %7031 = vsyncpa [#allocation9], 1 }
 0x5c9   :  { %7032 = vsyncpa [#allocation12], 1 }
 0x5ca   :  { %7033 = vsyncpa [#allocation4], 1 }

</bundles_post_ra>
